<compile_context>
chip_gen: v6e
topology: v6e:2x2x1
jax: 0.10.0
libtpu: 0.0.40
codegen_flags: <defaults>
</compile_context>

<pallas_src>
import math
from functools import partial

import numpy as np
import jax
import jax.numpy as jnp
from jax.experimental import pallas as pl
from jax.experimental.pallas import tpu as pltpu


# ---------------------------------------------------------------------------
# Fused whole-model forward kernel (one grid step per batch element)
# ---------------------------------------------------------------------------
def _vit_forward_kernel(
        x_ref, pe_ref, freq_ref, phase_ref,
        ln1_w_ref, ln1_b_ref, qkv_w_ref, qkv_b_ref,
        proj_w_ref, proj_b_ref, ln2_w_ref, ln2_b_ref,
        fc1_w_ref, fc1_b_ref, fc2_w_ref, fc2_b_ref,
        norm_w_ref, norm_b_ref,
        o_ref,
        *, depth, num_heads, head_dim, scale):
    N, C = x_ref.shape
    f32 = jnp.float32
    mm_dtype = qkv_w_ref.dtype                       # bf16 (or f32 fallback)

    def ln(v, w, b):
        mu = jnp.mean(v, axis=-1, keepdims=True)
        vc = v - mu
        var = jnp.mean(vc * vc, axis=-1, keepdims=True)
        return vc * jax.lax.rsqrt(var + 1e-5) * w + b

    def mm(a, w):
        return jnp.dot(a.astype(w.dtype), w, preferred_element_type=f32)

    # NeRF positional encoding (include_input=False) fused with the input add:
    # pe[n, c] = sin(phase[c//3] + PE[n, c%3] * freq[c//3])  (pe_ref is PE tiled to C lanes)
    x = x_ref[...] + jnp.sin(phase_ref[...] + pe_ref[...] * freq_ref[...])   # (N, C) f32

    for d in range(depth):
        # ---------------- multi-head self-attention ----------------
        h = ln(x, ln1_w_ref[d], ln1_b_ref[d])
        qkv = mm(h, qkv_w_ref[d]) + qkv_b_ref[d]                 # (N, 3C) f32
        attn_out = jnp.zeros((N, C), f32)
        for hd in range(num_heads):
            o = hd * head_dim
            q = qkv[:, o:o + head_dim].astype(mm_dtype)           # (N, Dh)
            k = qkv[:, C + o:C + o + head_dim].astype(mm_dtype)   # (N, Dh)
            v = qkv[:, 2 * C + o:2 * C + o + head_dim].astype(mm_dtype)
            s = jax.lax.dot_general(q, k, (((1,), (1,)), ((), ())),
                                    preferred_element_type=f32) * scale      # (N, N)
            s = s - jnp.max(s, axis=-1, keepdims=True)
            p = jnp.exp(s)
            p = p * pl.reciprocal(jnp.sum(p, axis=-1, keepdims=True), approx=True)
            y = jnp.dot(p.astype(mm_dtype), v, preferred_element_type=f32)   # (N, Dh)
            # head-merge + output projection fused:
            #   concat_h(y_h) @ proj_w == sum_h y_h @ proj_w[h*Dh:(h+1)*Dh, :]
            attn_out = attn_out + jnp.dot(y.astype(mm_dtype),
                                          proj_w_ref[d, o:o + head_dim, :],
                                          preferred_element_type=f32)
        x = x + attn_out + proj_b_ref[d]                          # drop_path = identity

        # ---------------- MLP ----------------
        h2 = ln(x, ln2_w_ref[d], ln2_b_ref[d])
        m = mm(h2, fc1_w_ref[d]) + fc1_b_ref[d]                   # (N, hidden) f32
        # TODO(synk): PyTorch nn.GELU default is the exact erf form; the tanh
        # approximation is used here (max abs difference ~1e-3).
        c = math.sqrt(2.0 / math.pi)
        m = 0.5 * m * (1.0 + jnp.tanh(c * (m + 0.044715 * m * m * m)))
        x = x + mm(m, fc2_w_ref[d]) + fc2_b_ref[d]

    # final LayerNorm, single store (head = Identity)
    o_ref[...] = ln(x, norm_w_ref[...], norm_b_ref[...]).astype(o_ref.dtype)


# ---------------------------------------------------------------------------
# VisionTransformer (forward only, eval mode)
# ---------------------------------------------------------------------------
class VisionTransformerPallas:
    def __init__(self, embed_dim=48, depth=2, num_heads=4, mlp_ratio=4.0,
                 qkv_bias=False, qk_scale=None, use_bf16_matmul=True, key=None):
        assert embed_dim % 6 == 0
        assert embed_dim % num_heads == 0
        self.embed_dim = embed_dim
        self.depth = depth
        self.num_heads = num_heads
        self.head_dim = embed_dim // num_heads
        self.scale = qk_scale or self.head_dim ** (-0.5)
        self.num_freqs = embed_dim // 6          # PE(num_freqs, d_in=3, include_input=False)
        self.hidden = int(embed_dim * mlp_ratio)
        self.mm_dtype = jnp.bfloat16 if use_bf16_matmul else jnp.float32

        C, D, Hd = embed_dim, depth, self.hidden
        key = jax.random.PRNGKey(0) if key is None else key
        ks = list(jax.random.split(key, 12))

        def w_init(k, shape):
            return 0.02 * jax.random.normal(k, shape, jnp.float32)

        # cls_token is a parameter of the module but unused by forward(); mask_token
        # is only used when a mask is provided.
        self.cls_token = w_init(ks.pop(), (1, 1, C))
        self.mask_token = w_init(ks.pop(), (1, 1, C))

        # stacked per-depth parameters (f32 masters, also used by the pure-JAX reference)
        self.ln1_w = jnp.ones((D, 1, C), jnp.float32)
        self.ln1_b = jnp.zeros((D, 1, C), jnp.float32)
        self.ln2_w = jnp.ones((D, 1, C), jnp.float32)
        self.ln2_b = jnp.zeros((D, 1, C), jnp.float32)
        self.qkv_w = w_init(ks.pop(), (D, C, 3 * C))
        self.qkv_b = (w_init(ks.pop(), (D, 1, 3 * C)) if qkv_bias
                      else jnp.zeros((D, 1, 3 * C), jnp.float32))
        self.proj_w = w_init(ks.pop(), (D, C, C))
        self.proj_b = w_init(ks.pop(), (D, 1, C))
        self.fc1_w = w_init(ks.pop(), (D, C, Hd))
        self.fc1_b = w_init(ks.pop(), (D, 1, Hd))
        self.fc2_w = w_init(ks.pop(), (D, Hd, C))
        self.fc2_b = w_init(ks.pop(), (D, 1, C))
        self.norm_w = jnp.ones((1, C), jnp.float32)
        self.norm_b = jnp.zeros((1, C), jnp.float32)

        # bf16 copies of the matmul weights (halves weight DMA bytes, MXU-native on v6e/v7x)
        md = self.mm_dtype
        self.qkv_w_mm = self.qkv_w.astype(md)
        self.proj_w_mm = self.proj_w.astype(md)
        self.fc1_w_mm = self.fc1_w.astype(md)
        self.fc2_w_mm = self.fc2_w.astype(md)

        # per-output-column NeRF PE frequency / phase rows (column c = f2_idx*3 + j)
        f2 = 2 * self.num_freqs
        freqs = math.pi * (2.0 ** np.arange(self.num_freqs, dtype=np.float64))
        freq_row = np.repeat(np.repeat(freqs, 2), 3)            # (C,)
        phase = np.zeros(f2, np.float64)
        phase[1::2] = np.pi * 0.5
        phase_row = np.repeat(phase, 3)                         # (C,)
        self.pe_freq = jnp.asarray(freq_row.reshape(1, C), jnp.float32)
        self.pe_phase = jnp.asarray(phase_row.reshape(1, C), jnp.float32)

    def __call__(self, x, PE, mask=None):
        B, N, C = x.shape
        assert C == self.embed_dim
        D, Hd, H, Dh = self.depth, self.hidden, self.num_heads, self.head_dim

        x = x.astype(jnp.float32)
        if mask is not None:
            x = jnp.where(mask[..., None], self.mask_token, x)

        # tile the 3 coords across the 2*num_freqs bands so kernel column c picks PE[..., c % 3]
        pe_tiled = jnp.tile(PE.astype(jnp.float32), (1, 1, 2 * self.num_freqs))   # (B, N, C)

        row_spec = pl.BlockSpec((None, N, C), lambda b: (b, 0, 0))

        def full(shape):
            nd = len(shape)
            return pl.BlockSpec(tuple(shape), lambda b, nd=nd: (0,) * nd)

        weights = (self.pe_freq, self.pe_phase,
                   self.ln1_w, self.ln1_b, self.qkv_w_mm, self.qkv_b,
                   self.proj_w_mm, self.proj_b, self.ln2_w, self.ln2_b,
                   self.fc1_w_mm, self.fc1_b, self.fc2_w_mm, self.fc2_b,
                   self.norm_w, self.norm_b)
        weight_specs = [full(w.shape) for w in weights]

        flops = B * D * (2 * N * C * 3 * C                          # qkv projection
                         + H * (4 * N * N * Dh + 2 * N * Dh * C)    # attention + fused proj
                         + 4 * N * C * Hd)                          # MLP
        transcendentals = B * (N * C + D * (H * N * N + N * Hd))
        bytes_accessed = 4 * (3 * B * N * C) + sum(
            int(np.prod(w.shape)) * w.dtype.itemsize for w in weights)

        out = pl.pallas_call(
            partial(_vit_forward_kernel, depth=D, num_heads=H,
                    head_dim=Dh, scale=float(self.scale)),
            out_shape=jax.ShapeDtypeStruct((B, N, C), jnp.float32),
            grid=(B,),
            in_specs=[row_spec, row_spec] + weight_specs,
            out_specs=row_spec,
            compiler_params=pltpu.CompilerParams(
                dimension_semantics=("parallel",)),
            cost_estimate=pl.CostEstimate(flops=flops,
                                          transcendentals=transcendentals,
                                          bytes_accessed=bytes_accessed),
        )(x, pe_tiled, *weights)
        return out                                                  # head = Identity


# ---------------------------------------------------------------------------
# Pure-JAX reference (mirrors the PyTorch forward) for a sanity check
# ---------------------------------------------------------------------------
def _ref_pe(xf, num_freqs, freq_factor=math.pi):
    freqs = jnp.asarray(freq_factor * 2.0 ** np.arange(num_freqs), jnp.float32)
    freqs = jnp.repeat(freqs, 2).reshape(1, -1, 1)
    phases = np.zeros((2 * num_freqs,), np.float32)
    phases[1::2] = np.pi * 0.5
    phases = jnp.asarray(phases).reshape(1, -1, 1)
    emb = jnp.sin(phases + xf[:, None, :] * freqs)
    return emb.reshape(xf.shape[0], -1)


def _ref_layernorm(x, w, b, eps=1e-5):
    mu = x.mean(-1, keepdims=True)
    var = ((x - mu) ** 2).mean(-1, keepdims=True)
    return (x - mu) * jax.lax.rsqrt(var + eps) * w.reshape(-1) + b.reshape(-1)


def _ref_gelu(x):
    c = np.sqrt(2.0 / np.pi)
    return 0.5 * x * (1.0 + jnp.tanh(c * (x + 0.044715 * x ** 3)))


def _ref_forward(model, x, PE, mask=None):
    B, N, C = x.shape
    H, Dh = model.num_heads, model.head_dim
    x = x.astype(jnp.float32)
    if mask is not None:
        x = jnp.where(mask[..., None], model.mask_token, x)
    x = x + _ref_pe(PE.reshape(B * N, -1), model.num_freqs).reshape(B, N, C)
    for d in range(model.depth):
        h = _ref_layernorm(x, model.ln1_w[d], model.ln1_b[d])
        qkv = h.reshape(B * N, C) @ model.qkv_w[d] + model.qkv_b[d].reshape(-1)
        qkv = qkv.reshape(B, N, 3, H, Dh).transpose(2, 0, 3, 1, 4)
        q, k, v = qkv[0], qkv[1], qkv[2]
        attn = jnp.einsum("bhnd,bhmd->bhnm", q, k) * model.scale
        attn = jax.nn.softmax(attn, axis=-1)
        y = jnp.einsum("bhnm,bhmd->bhnd", attn, v)
        y = (y.transpose(0, 2, 1, 3).reshape(B * N, C) @ model.proj_w[d]
             + model.proj_b[d].reshape(-1))
        x = x + y.reshape(B, N, C)
        h2 = _ref_layernorm(x, model.ln2_w[d], model.ln2_b[d])
        m = _ref_gelu(h2.reshape(B * N, C) @ model.fc1_w[d] + model.fc1_b[d].reshape(-1))
        m = m @ model.fc2_w[d] + model.fc2_b[d].reshape(-1)
        x = x + m.reshape(B, N, C)
    return _ref_layernorm(x, model.norm_w, model.norm_b)


if __name__ == "__main__":
    key = jax.random.PRNGKey(0)
    kx, kpe, kparam = jax.random.split(key, 3)

    B, N, C = 2, 16, 48           # embed_dim % 6 == 0 -> num_freqs = 8, PE d_out = 48
    depth, num_heads = 2, 4

    x = jax.random.normal(kx, (B, N, C), jnp.float32)
    PE = jax.random.uniform(kpe, (B, N, 3), jnp.float32, minval=-1.0, maxval=1.0)

    model = VisionTransformerPallas(embed_dim=C, depth=depth, num_heads=num_heads,
                                    key=kparam)

    fwd = jax.jit(lambda xx, pp: model(xx, pp))
    out = fwd(x, PE)
    jax.block_until_ready(out)
    assert out.shape == (B, N, C)

    ref = _ref_forward(model, x, PE, mask=None)
    np.testing.assert_allclose(np.asarray(out), np.asarray(ref), atol=5e-2, rtol=5e-2)

    print("KERNEL_OK")
</pallas_src>

<mosaic_0001>
module attributes {stable_mosaic.version = 11 : i64} {
  func.func @_vit_forward_kernel(%arg0: i32, %arg1: memref<1x16x48xf32, #tpu.memory_space<vmem>>, %arg2: memref<1x16x48xf32, #tpu.memory_space<vmem>>, %arg3: memref<1x48xf32, #tpu.memory_space<vmem>>, %arg4: memref<1x48xf32, #tpu.memory_space<vmem>>, %arg5: memref<2x1x48xf32, #tpu.memory_space<vmem>>, %arg6: memref<2x1x48xf32, #tpu.memory_space<vmem>>, %arg7: memref<2x48x144xbf16, #tpu.memory_space<vmem>>, %arg8: memref<2x1x144xf32, #tpu.memory_space<vmem>>, %arg9: memref<2x48x48xbf16, #tpu.memory_space<vmem>>, %arg10: memref<2x1x48xf32, #tpu.memory_space<vmem>>, %arg11: memref<2x1x48xf32, #tpu.memory_space<vmem>>, %arg12: memref<2x1x48xf32, #tpu.memory_space<vmem>>, %arg13: memref<2x48x192xbf16, #tpu.memory_space<vmem>>, %arg14: memref<2x1x192xf32, #tpu.memory_space<vmem>>, %arg15: memref<2x192x48xbf16, #tpu.memory_space<vmem>>, %arg16: memref<2x1x48xf32, #tpu.memory_space<vmem>>, %arg17: memref<1x48xf32, #tpu.memory_space<vmem>>, %arg18: memref<1x48xf32, #tpu.memory_space<vmem>>, %arg19: memref<1x16x48xf32, #tpu.memory_space<vmem>>) attributes {dimension_semantics = [#tpu.dimension_semantics<parallel>], iteration_bounds = array<i64: 2>, scalar_prefetch = 0 : i64, scratch_operands = 0 : i64, tpu.core_type = #tpu.core_type<tc>, window_params = [{transform_indices = @transform_0, window_bounds = array<i64: 1, 16, 48>}, {transform_indices = @transform_1, window_bounds = array<i64: 1, 16, 48>}, {pipeline_mode = #tpu.pipeline_mode<synchronous>, transform_indices = @transform_2, window_bounds = array<i64: 1, 48>}, {pipeline_mode = #tpu.pipeline_mode<synchronous>, transform_indices = @transform_3, window_bounds = array<i64: 1, 48>}, {pipeline_mode = #tpu.pipeline_mode<synchronous>, transform_indices = @transform_4, window_bounds = array<i64: 2, 1, 48>}, {pipeline_mode = #tpu.pipeline_mode<synchronous>, transform_indices = @transform_5, window_bounds = array<i64: 2, 1, 48>}, {pipeline_mode = #tpu.pipeline_mode<synchronous>, transform_indices = @transform_6, window_bounds = array<i64: 2, 48, 144>}, {pipeline_mode = #tpu.pipeline_mode<synchronous>, transform_indices = @transform_7, window_bounds = array<i64: 2, 1, 144>}, {pipeline_mode = #tpu.pipeline_mode<synchronous>, transform_indices = @transform_8, window_bounds = array<i64: 2, 48, 48>}, {pipeline_mode = #tpu.pipeline_mode<synchronous>, transform_indices = @transform_9, window_bounds = array<i64: 2, 1, 48>}, {pipeline_mode = #tpu.pipeline_mode<synchronous>, transform_indices = @transform_10, window_bounds = array<i64: 2, 1, 48>}, {pipeline_mode = #tpu.pipeline_mode<synchronous>, transform_indices = @transform_11, window_bounds = array<i64: 2, 1, 48>}, {pipeline_mode = #tpu.pipeline_mode<synchronous>, transform_indices = @transform_12, window_bounds = array<i64: 2, 48, 192>}, {pipeline_mode = #tpu.pipeline_mode<synchronous>, transform_indices = @transform_13, window_bounds = array<i64: 2, 1, 192>}, {pipeline_mode = #tpu.pipeline_mode<synchronous>, transform_indices = @transform_14, window_bounds = array<i64: 2, 192, 48>}, {pipeline_mode = #tpu.pipeline_mode<synchronous>, transform_indices = @transform_15, window_bounds = array<i64: 2, 1, 48>}, {pipeline_mode = #tpu.pipeline_mode<synchronous>, transform_indices = @transform_16, window_bounds = array<i64: 1, 48>}, {pipeline_mode = #tpu.pipeline_mode<synchronous>, transform_indices = @transform_17, window_bounds = array<i64: 1, 48>}, {transform_indices = @transform_18, window_bounds = array<i64: 1, 16, 48>}]} {
    %c0 = arith.constant 0 : index
    %c0_0 = arith.constant 0 : index
    %c0_1 = arith.constant 0 : index
    %0 = vector.load %arg1[%c0, %c0_0, %c0_1] : memref<1x16x48xf32, #tpu.memory_space<vmem>>, vector<1x16x48xf32>
    %1 = vector.shape_cast %0 : vector<1x16x48xf32> to vector<16x48xf32>
    %c0_2 = arith.constant 0 : index
    %c0_3 = arith.constant 0 : index
    %2 = vector.load %arg4[%c0_2, %c0_3] : memref<1x48xf32, #tpu.memory_space<vmem>>, vector<1x48xf32>
    %c0_4 = arith.constant 0 : index
    %c0_5 = arith.constant 0 : index
    %c0_6 = arith.constant 0 : index
    %3 = vector.load %arg2[%c0_4, %c0_5, %c0_6] : memref<1x16x48xf32, #tpu.memory_space<vmem>>, vector<1x16x48xf32>
    %4 = vector.shape_cast %3 : vector<1x16x48xf32> to vector<16x48xf32>
    %c0_7 = arith.constant 0 : index
    %c0_8 = arith.constant 0 : index
    %5 = vector.load %arg3[%c0_7, %c0_8] : memref<1x48xf32, #tpu.memory_space<vmem>>, vector<1x48xf32>
    %6 = vector.broadcast %5 : vector<1x48xf32> to vector<16x48xf32>
    %7 = arith.mulf %4, %6 : vector<16x48xf32>
    %8 = vector.broadcast %2 : vector<1x48xf32> to vector<16x48xf32>
    %9 = arith.addf %8, %7 : vector<16x48xf32>
    %10 = math.sin %9 : vector<16x48xf32>
    %11 = arith.addf %1, %10 : vector<16x48xf32>
    %c0_9 = arith.constant 0 : index
    %c0_10 = arith.constant 0 : index
    %c0_11 = arith.constant 0 : index
    %12 = vector.load %arg5[%c0_9, %c0_10, %c0_11] : memref<2x1x48xf32, #tpu.memory_space<vmem>>, vector<1x1x48xf32>
    %13 = vector.shape_cast %12 : vector<1x1x48xf32> to vector<1x48xf32>
    %c0_12 = arith.constant 0 : index
    %c0_13 = arith.constant 0 : index
    %c0_14 = arith.constant 0 : index
    %14 = vector.load %arg6[%c0_12, %c0_13, %c0_14] : memref<2x1x48xf32, #tpu.memory_space<vmem>>, vector<1x1x48xf32>
    %15 = vector.shape_cast %14 : vector<1x1x48xf32> to vector<1x48xf32>
    %cst = arith.constant dense<0.000000e+00> : vector<16xf32>
    %16 = vector.multi_reduction <add>, %11, %cst [1] : vector<16x48xf32> to vector<16xf32>
    %17 = vector.shape_cast %16 : vector<16xf32> to vector<16x1xf32>
    %cst_15 = arith.constant 4.800000e+01 : f32
    %18 = vector.broadcast %cst_15 : f32 to vector<16x1xf32>
    %19 = arith.divf %17, %18 : vector<16x1xf32>
    %20 = vector.broadcast %19 : vector<16x1xf32> to vector<16x48xf32>
    %21 = arith.subf %11, %20 : vector<16x48xf32>
    %22 = arith.mulf %21, %21 : vector<16x48xf32>
    %cst_16 = arith.constant dense<0.000000e+00> : vector<16xf32>
    %23 = vector.multi_reduction <add>, %22, %cst_16 [1] : vector<16x48xf32> to vector<16xf32>
    %24 = vector.shape_cast %23 : vector<16xf32> to vector<16x1xf32>
    %cst_17 = arith.constant 4.800000e+01 : f32
    %25 = vector.broadcast %cst_17 : f32 to vector<16x1xf32>
    %26 = arith.divf %24, %25 : vector<16x1xf32>
    %cst_18 = arith.constant 9.99999974E-6 : f32
    %27 = vector.broadcast %cst_18 : f32 to vector<16x1xf32>
    %28 = arith.addf %26, %27 : vector<16x1xf32>
    %29 = math.rsqrt %28 : vector<16x1xf32>
    %30 = vector.broadcast %29 : vector<16x1xf32> to vector<16x48xf32>
    %31 = arith.mulf %21, %30 : vector<16x48xf32>
    %32 = vector.broadcast %13 : vector<1x48xf32> to vector<16x48xf32>
    %33 = arith.mulf %31, %32 : vector<16x48xf32>
    %34 = vector.broadcast %15 : vector<1x48xf32> to vector<16x48xf32>
    %35 = arith.addf %33, %34 : vector<16x48xf32>
    %c0_19 = arith.constant 0 : index
    %c0_20 = arith.constant 0 : index
    %c0_21 = arith.constant 0 : index
    %36 = vector.load %arg7[%c0_19, %c0_20, %c0_21] : memref<2x48x144xbf16, #tpu.memory_space<vmem>>, vector<1x48x144xbf16>
    %37 = vector.shape_cast %36 : vector<1x48x144xbf16> to vector<48x144xbf16>
    %38 = arith.truncf %35 : vector<16x48xf32> to vector<16x48xbf16>
    %cst_22 = arith.constant dense<0.000000e+00> : vector<16x144xf32>
    %39 = tpu.matmul %38, %37, %cst_22 {dimension_numbers = #tpu.dot_dimension_numbers<[1], [0], [0], [1], [0, 0, 1, 1], [], []>} : vector<16x48xbf16>, vector<48x144xbf16>, vector<16x144xf32> -> vector<16x144xf32>
    %c0_23 = arith.constant 0 : index
    %c0_24 = arith.constant 0 : index
    %c0_25 = arith.constant 0 : index
    %40 = vector.load %arg8[%c0_23, %c0_24, %c0_25] : memref<2x1x144xf32, #tpu.memory_space<vmem>>, vector<1x1x144xf32>
    %41 = vector.shape_cast %40 : vector<1x1x144xf32> to vector<1x144xf32>
    %42 = vector.broadcast %41 : vector<1x144xf32> to vector<16x144xf32>
    %43 = arith.addf %39, %42 : vector<16x144xf32>
    %cst_26 = arith.constant 0.000000e+00 : f32
    %44 = vector.broadcast %cst_26 : f32 to vector<16x48xf32>
    %45 = vector.extract_strided_slice %43 {offsets = [0, 0], sizes = [16, 12], strides = [1, 1]} : vector<16x144xf32> to vector<16x12xf32>
    %46 = arith.truncf %45 : vector<16x12xf32> to vector<16x12xbf16>
    %47 = vector.extract_strided_slice %43 {offsets = [0, 48], sizes = [16, 12], strides = [1, 1]} : vector<16x144xf32> to vector<16x12xf32>
    %48 = arith.truncf %47 : vector<16x12xf32> to vector<16x12xbf16>
    %49 = vector.extract_strided_slice %43 {offsets = [0, 96], sizes = [16, 12], strides = [1, 1]} : vector<16x144xf32> to vector<16x12xf32>
    %50 = arith.truncf %49 : vector<16x12xf32> to vector<16x12xbf16>
    %cst_27 = arith.constant dense<0.000000e+00> : vector<16x16xf32>
    %51 = tpu.matmul %46, %48, %cst_27 {dimension_numbers = #tpu.dot_dimension_numbers<[1], [1], [0], [0], [0, 0, 1, 0], [], []>} : vector<16x12xbf16>, vector<16x12xbf16>, vector<16x16xf32> -> vector<16x16xf32>
    %cst_28 = arith.constant 0.288675129 : f32
    %52 = vector.broadcast %cst_28 : f32 to vector<16x16xf32>
    %53 = arith.mulf %51, %52 : vector<16x16xf32>
    %cst_29 = arith.constant dense<0xFF800000> : vector<16xf32>
    %54 = vector.multi_reduction <maximumf>, %53, %cst_29 [1] : vector<16x16xf32> to vector<16xf32>
    %55 = vector.shape_cast %54 : vector<16xf32> to vector<16x1xf32>
    %56 = vector.broadcast %55 : vector<16x1xf32> to vector<16x16xf32>
    %57 = arith.subf %53, %56 : vector<16x16xf32>
    %58 = math.exp %57 : vector<16x16xf32>
    %cst_30 = arith.constant dense<0.000000e+00> : vector<16xf32>
    %59 = vector.multi_reduction <add>, %58, %cst_30 [1] : vector<16x16xf32> to vector<16xf32>
    %60 = vector.shape_cast %59 : vector<16xf32> to vector<16x1xf32>
    %61 = tpu.reciprocal %60 {approx = true} : vector<16x1xf32> -> vector<16x1xf32>
    %62 = vector.broadcast %61 : vector<16x1xf32> to vector<16x16xf32>
    %63 = arith.mulf %58, %62 : vector<16x16xf32>
    %64 = arith.truncf %63 : vector<16x16xf32> to vector<16x16xbf16>
    %cst_31 = arith.constant dense<0.000000e+00> : vector<16x12xf32>
    %65 = tpu.matmul %64, %50, %cst_31 {dimension_numbers = #tpu.dot_dimension_numbers<[1], [0], [0], [1], [0, 0, 1, 1], [], []>} : vector<16x16xbf16>, vector<16x12xbf16>, vector<16x12xf32> -> vector<16x12xf32>
    %66 = arith.truncf %65 : vector<16x12xf32> to vector<16x12xbf16>
    %c0_32 = arith.constant 0 : index
    %c0_33 = arith.constant 0 : index
    %c0_34 = arith.constant 0 : index
    %67 = vector.load %arg9[%c0_32, %c0_33, %c0_34] : memref<2x48x48xbf16, #tpu.memory_space<vmem>>, vector<1x12x48xbf16>
    %68 = vector.shape_cast %67 : vector<1x12x48xbf16> to vector<12x48xbf16>
    %cst_35 = arith.constant dense<0.000000e+00> : vector<16x48xf32>
    %69 = tpu.matmul %66, %68, %cst_35 {dimension_numbers = #tpu.dot_dimension_numbers<[1], [0], [0], [1], [0, 0, 1, 1], [], []>} : vector<16x12xbf16>, vector<12x48xbf16>, vector<16x48xf32> -> vector<16x48xf32>
    %70 = arith.addf %44, %69 : vector<16x48xf32>
    %71 = vector.extract_strided_slice %43 {offsets = [0, 12], sizes = [16, 12], strides = [1, 1]} : vector<16x144xf32> to vector<16x12xf32>
    %72 = arith.truncf %71 : vector<16x12xf32> to vector<16x12xbf16>
    %73 = vector.extract_strided_slice %43 {offsets = [0, 60], sizes = [16, 12], strides = [1, 1]} : vector<16x144xf32> to vector<16x12xf32>
    %74 = arith.truncf %73 : vector<16x12xf32> to vector<16x12xbf16>
    %75 = vector.extract_strided_slice %43 {offsets = [0, 108], sizes = [16, 12], strides = [1, 1]} : vector<16x144xf32> to vector<16x12xf32>
    %76 = arith.truncf %75 : vector<16x12xf32> to vector<16x12xbf16>
    %cst_36 = arith.constant dense<0.000000e+00> : vector<16x16xf32>
    %77 = tpu.matmul %72, %74, %cst_36 {dimension_numbers = #tpu.dot_dimension_numbers<[1], [1], [0], [0], [0, 0, 1, 0], [], []>} : vector<16x12xbf16>, vector<16x12xbf16>, vector<16x16xf32> -> vector<16x16xf32>
    %cst_37 = arith.constant 0.288675129 : f32
    %78 = vector.broadcast %cst_37 : f32 to vector<16x16xf32>
    %79 = arith.mulf %77, %78 : vector<16x16xf32>
    %cst_38 = arith.constant dense<0xFF800000> : vector<16xf32>
    %80 = vector.multi_reduction <maximumf>, %79, %cst_38 [1] : vector<16x16xf32> to vector<16xf32>
    %81 = vector.shape_cast %80 : vector<16xf32> to vector<16x1xf32>
    %82 = vector.broadcast %81 : vector<16x1xf32> to vector<16x16xf32>
    %83 = arith.subf %79, %82 : vector<16x16xf32>
    %84 = math.exp %83 : vector<16x16xf32>
    %cst_39 = arith.constant dense<0.000000e+00> : vector<16xf32>
    %85 = vector.multi_reduction <add>, %84, %cst_39 [1] : vector<16x16xf32> to vector<16xf32>
    %86 = vector.shape_cast %85 : vector<16xf32> to vector<16x1xf32>
    %87 = tpu.reciprocal %86 {approx = true} : vector<16x1xf32> -> vector<16x1xf32>
    %88 = vector.broadcast %87 : vector<16x1xf32> to vector<16x16xf32>
    %89 = arith.mulf %84, %88 : vector<16x16xf32>
    %90 = arith.truncf %89 : vector<16x16xf32> to vector<16x16xbf16>
    %cst_40 = arith.constant dense<0.000000e+00> : vector<16x12xf32>
    %91 = tpu.matmul %90, %76, %cst_40 {dimension_numbers = #tpu.dot_dimension_numbers<[1], [0], [0], [1], [0, 0, 1, 1], [], []>} : vector<16x16xbf16>, vector<16x12xbf16>, vector<16x12xf32> -> vector<16x12xf32>
    %92 = arith.truncf %91 : vector<16x12xf32> to vector<16x12xbf16>
    %c0_41 = arith.constant 0 : index
    %c12 = arith.constant 12 : index
    %c0_42 = arith.constant 0 : index
    %93 = vector.load %arg9[%c0_41, %c12, %c0_42] : memref<2x48x48xbf16, #tpu.memory_space<vmem>>, vector<1x12x48xbf16>
    %94 = vector.shape_cast %93 : vector<1x12x48xbf16> to vector<12x48xbf16>
    %cst_43 = arith.constant dense<0.000000e+00> : vector<16x48xf32>
    %95 = tpu.matmul %92, %94, %cst_43 {dimension_numbers = #tpu.dot_dimension_numbers<[1], [0], [0], [1], [0, 0, 1, 1], [], []>} : vector<16x12xbf16>, vector<12x48xbf16>, vector<16x48xf32> -> vector<16x48xf32>
    %96 = arith.addf %70, %95 : vector<16x48xf32>
    %97 = vector.extract_strided_slice %43 {offsets = [0, 24], sizes = [16, 12], strides = [1, 1]} : vector<16x144xf32> to vector<16x12xf32>
    %98 = arith.truncf %97 : vector<16x12xf32> to vector<16x12xbf16>
    %99 = vector.extract_strided_slice %43 {offsets = [0, 72], sizes = [16, 12], strides = [1, 1]} : vector<16x144xf32> to vector<16x12xf32>
    %100 = arith.truncf %99 : vector<16x12xf32> to vector<16x12xbf16>
    %101 = vector.extract_strided_slice %43 {offsets = [0, 120], sizes = [16, 12], strides = [1, 1]} : vector<16x144xf32> to vector<16x12xf32>
    %102 = arith.truncf %101 : vector<16x12xf32> to vector<16x12xbf16>
    %cst_44 = arith.constant dense<0.000000e+00> : vector<16x16xf32>
    %103 = tpu.matmul %98, %100, %cst_44 {dimension_numbers = #tpu.dot_dimension_numbers<[1], [1], [0], [0], [0, 0, 1, 0], [], []>} : vector<16x12xbf16>, vector<16x12xbf16>, vector<16x16xf32> -> vector<16x16xf32>
    %cst_45 = arith.constant 0.288675129 : f32
    %104 = vector.broadcast %cst_45 : f32 to vector<16x16xf32>
    %105 = arith.mulf %103, %104 : vector<16x16xf32>
    %cst_46 = arith.constant dense<0xFF800000> : vector<16xf32>
    %106 = vector.multi_reduction <maximumf>, %105, %cst_46 [1] : vector<16x16xf32> to vector<16xf32>
    %107 = vector.shape_cast %106 : vector<16xf32> to vector<16x1xf32>
    %108 = vector.broadcast %107 : vector<16x1xf32> to vector<16x16xf32>
    %109 = arith.subf %105, %108 : vector<16x16xf32>
    %110 = math.exp %109 : vector<16x16xf32>
    %cst_47 = arith.constant dense<0.000000e+00> : vector<16xf32>
    %111 = vector.multi_reduction <add>, %110, %cst_47 [1] : vector<16x16xf32> to vector<16xf32>
    %112 = vector.shape_cast %111 : vector<16xf32> to vector<16x1xf32>
    %113 = tpu.reciprocal %112 {approx = true} : vector<16x1xf32> -> vector<16x1xf32>
    %114 = vector.broadcast %113 : vector<16x1xf32> to vector<16x16xf32>
    %115 = arith.mulf %110, %114 : vector<16x16xf32>
    %116 = arith.truncf %115 : vector<16x16xf32> to vector<16x16xbf16>
    %cst_48 = arith.constant dense<0.000000e+00> : vector<16x12xf32>
    %117 = tpu.matmul %116, %102, %cst_48 {dimension_numbers = #tpu.dot_dimension_numbers<[1], [0], [0], [1], [0, 0, 1, 1], [], []>} : vector<16x16xbf16>, vector<16x12xbf16>, vector<16x12xf32> -> vector<16x12xf32>
    %118 = arith.truncf %117 : vector<16x12xf32> to vector<16x12xbf16>
    %c0_49 = arith.constant 0 : index
    %c24 = arith.constant 24 : index
    %c0_50 = arith.constant 0 : index
    %119 = vector.load %arg9[%c0_49, %c24, %c0_50] : memref<2x48x48xbf16, #tpu.memory_space<vmem>>, vector<1x12x48xbf16>
    %120 = vector.shape_cast %119 : vector<1x12x48xbf16> to vector<12x48xbf16>
    %cst_51 = arith.constant dense<0.000000e+00> : vector<16x48xf32>
    %121 = tpu.matmul %118, %120, %cst_51 {dimension_numbers = #tpu.dot_dimension_numbers<[1], [0], [0], [1], [0, 0, 1, 1], [], []>} : vector<16x12xbf16>, vector<12x48xbf16>, vector<16x48xf32> -> vector<16x48xf32>
    %122 = arith.addf %96, %121 : vector<16x48xf32>
    %123 = vector.extract_strided_slice %43 {offsets = [0, 36], sizes = [16, 12], strides = [1, 1]} : vector<16x144xf32> to vector<16x12xf32>
    %124 = arith.truncf %123 : vector<16x12xf32> to vector<16x12xbf16>
    %125 = vector.extract_strided_slice %43 {offsets = [0, 84], sizes = [16, 12], strides = [1, 1]} : vector<16x144xf32> to vector<16x12xf32>
    %126 = arith.truncf %125 : vector<16x12xf32> to vector<16x12xbf16>
    %127 = vector.extract_strided_slice %43 {offsets = [0, 132], sizes = [16, 12], strides = [1, 1]} : vector<16x144xf32> to vector<16x12xf32>
    %128 = arith.truncf %127 : vector<16x12xf32> to vector<16x12xbf16>
    %cst_52 = arith.constant dense<0.000000e+00> : vector<16x16xf32>
    %129 = tpu.matmul %124, %126, %cst_52 {dimension_numbers = #tpu.dot_dimension_numbers<[1], [1], [0], [0], [0, 0, 1, 0], [], []>} : vector<16x12xbf16>, vector<16x12xbf16>, vector<16x16xf32> -> vector<16x16xf32>
    %cst_53 = arith.constant 0.288675129 : f32
    %130 = vector.broadcast %cst_53 : f32 to vector<16x16xf32>
    %131 = arith.mulf %129, %130 : vector<16x16xf32>
    %cst_54 = arith.constant dense<0xFF800000> : vector<16xf32>
    %132 = vector.multi_reduction <maximumf>, %131, %cst_54 [1] : vector<16x16xf32> to vector<16xf32>
    %133 = vector.shape_cast %132 : vector<16xf32> to vector<16x1xf32>
    %134 = vector.broadcast %133 : vector<16x1xf32> to vector<16x16xf32>
    %135 = arith.subf %131, %134 : vector<16x16xf32>
    %136 = math.exp %135 : vector<16x16xf32>
    %cst_55 = arith.constant dense<0.000000e+00> : vector<16xf32>
    %137 = vector.multi_reduction <add>, %136, %cst_55 [1] : vector<16x16xf32> to vector<16xf32>
    %138 = vector.shape_cast %137 : vector<16xf32> to vector<16x1xf32>
    %139 = tpu.reciprocal %138 {approx = true} : vector<16x1xf32> -> vector<16x1xf32>
    %140 = vector.broadcast %139 : vector<16x1xf32> to vector<16x16xf32>
    %141 = arith.mulf %136, %140 : vector<16x16xf32>
    %142 = arith.truncf %141 : vector<16x16xf32> to vector<16x16xbf16>
    %cst_56 = arith.constant dense<0.000000e+00> : vector<16x12xf32>
    %143 = tpu.matmul %142, %128, %cst_56 {dimension_numbers = #tpu.dot_dimension_numbers<[1], [0], [0], [1], [0, 0, 1, 1], [], []>} : vector<16x16xbf16>, vector<16x12xbf16>, vector<16x12xf32> -> vector<16x12xf32>
    %144 = arith.truncf %143 : vector<16x12xf32> to vector<16x12xbf16>
    %c0_57 = arith.constant 0 : index
    %c36 = arith.constant 36 : index
    %c0_58 = arith.constant 0 : index
    %145 = vector.load %arg9[%c0_57, %c36, %c0_58] : memref<2x48x48xbf16, #tpu.memory_space<vmem>>, vector<1x12x48xbf16>
    %146 = vector.shape_cast %145 : vector<1x12x48xbf16> to vector<12x48xbf16>
    %cst_59 = arith.constant dense<0.000000e+00> : vector<16x48xf32>
    %147 = tpu.matmul %144, %146, %cst_59 {dimension_numbers = #tpu.dot_dimension_numbers<[1], [0], [0], [1], [0, 0, 1, 1], [], []>} : vector<16x12xbf16>, vector<12x48xbf16>, vector<16x48xf32> -> vector<16x48xf32>
    %148 = arith.addf %122, %147 : vector<16x48xf32>
    %149 = arith.addf %11, %148 : vector<16x48xf32>
    %c0_60 = arith.constant 0 : index
    %c0_61 = arith.constant 0 : index
    %c0_62 = arith.constant 0 : index
    %150 = vector.load %arg10[%c0_60, %c0_61, %c0_62] : memref<2x1x48xf32, #tpu.memory_space<vmem>>, vector<1x1x48xf32>
    %151 = vector.shape_cast %150 : vector<1x1x48xf32> to vector<1x48xf32>
    %152 = vector.broadcast %151 : vector<1x48xf32> to vector<16x48xf32>
    %153 = arith.addf %149, %152 : vector<16x48xf32>
    %c0_63 = arith.constant 0 : index
    %c0_64 = arith.constant 0 : index
    %c0_65 = arith.constant 0 : index
    %154 = vector.load %arg11[%c0_63, %c0_64, %c0_65] : memref<2x1x48xf32, #tpu.memory_space<vmem>>, vector<1x1x48xf32>
    %155 = vector.shape_cast %154 : vector<1x1x48xf32> to vector<1x48xf32>
    %c0_66 = arith.constant 0 : index
    %c0_67 = arith.constant 0 : index
    %c0_68 = arith.constant 0 : index
    %156 = vector.load %arg12[%c0_66, %c0_67, %c0_68] : memref<2x1x48xf32, #tpu.memory_space<vmem>>, vector<1x1x48xf32>
    %157 = vector.shape_cast %156 : vector<1x1x48xf32> to vector<1x48xf32>
    %cst_69 = arith.constant dense<0.000000e+00> : vector<16xf32>
    %158 = vector.multi_reduction <add>, %153, %cst_69 [1] : vector<16x48xf32> to vector<16xf32>
    %159 = vector.shape_cast %158 : vector<16xf32> to vector<16x1xf32>
    %cst_70 = arith.constant 4.800000e+01 : f32
    %160 = vector.broadcast %cst_70 : f32 to vector<16x1xf32>
    %161 = arith.divf %159, %160 : vector<16x1xf32>
    %162 = vector.broadcast %161 : vector<16x1xf32> to vector<16x48xf32>
    %163 = arith.subf %153, %162 : vector<16x48xf32>
    %164 = arith.mulf %163, %163 : vector<16x48xf32>
    %cst_71 = arith.constant dense<0.000000e+00> : vector<16xf32>
    %165 = vector.multi_reduction <add>, %164, %cst_71 [1] : vector<16x48xf32> to vector<16xf32>
    %166 = vector.shape_cast %165 : vector<16xf32> to vector<16x1xf32>
    %cst_72 = arith.constant 4.800000e+01 : f32
    %167 = vector.broadcast %cst_72 : f32 to vector<16x1xf32>
    %168 = arith.divf %166, %167 : vector<16x1xf32>
    %cst_73 = arith.constant 9.99999974E-6 : f32
    %169 = vector.broadcast %cst_73 : f32 to vector<16x1xf32>
    %170 = arith.addf %168, %169 : vector<16x1xf32>
    %171 = math.rsqrt %170 : vector<16x1xf32>
    %172 = vector.broadcast %171 : vector<16x1xf32> to vector<16x48xf32>
    %173 = arith.mulf %163, %172 : vector<16x48xf32>
    %174 = vector.broadcast %155 : vector<1x48xf32> to vector<16x48xf32>
    %175 = arith.mulf %173, %174 : vector<16x48xf32>
    %176 = vector.broadcast %157 : vector<1x48xf32> to vector<16x48xf32>
    %177 = arith.addf %175, %176 : vector<16x48xf32>
    %c0_74 = arith.constant 0 : index
    %c0_75 = arith.constant 0 : index
    %c0_76 = arith.constant 0 : index
    %178 = vector.load %arg13[%c0_74, %c0_75, %c0_76] : memref<2x48x192xbf16, #tpu.memory_space<vmem>>, vector<1x48x192xbf16>
    %179 = vector.shape_cast %178 : vector<1x48x192xbf16> to vector<48x192xbf16>
    %180 = arith.truncf %177 : vector<16x48xf32> to vector<16x48xbf16>
    %cst_77 = arith.constant dense<0.000000e+00> : vector<16x192xf32>
    %181 = tpu.matmul %180, %179, %cst_77 {dimension_numbers = #tpu.dot_dimension_numbers<[1], [0], [0], [1], [0, 0, 1, 1], [], []>} : vector<16x48xbf16>, vector<48x192xbf16>, vector<16x192xf32> -> vector<16x192xf32>
    %c0_78 = arith.constant 0 : index
    %c0_79 = arith.constant 0 : index
    %c0_80 = arith.constant 0 : index
    %182 = vector.load %arg14[%c0_78, %c0_79, %c0_80] : memref<2x1x192xf32, #tpu.memory_space<vmem>>, vector<1x1x192xf32>
    %183 = vector.shape_cast %182 : vector<1x1x192xf32> to vector<1x192xf32>
    %184 = vector.broadcast %183 : vector<1x192xf32> to vector<16x192xf32>
    %185 = arith.addf %181, %184 : vector<16x192xf32>
    %cst_81 = arith.constant 5.000000e-01 : f32
    %186 = vector.broadcast %cst_81 : f32 to vector<16x192xf32>
    %187 = arith.mulf %186, %185 : vector<16x192xf32>
    %cst_82 = arith.constant 4.471500e-02 : f32
    %188 = vector.broadcast %cst_82 : f32 to vector<16x192xf32>
    %189 = arith.mulf %188, %185 : vector<16x192xf32>
    %190 = arith.mulf %189, %185 : vector<16x192xf32>
    %191 = arith.mulf %190, %185 : vector<16x192xf32>
    %192 = arith.addf %185, %191 : vector<16x192xf32>
    %cst_83 = arith.constant 0.797884583 : f32
    %193 = vector.broadcast %cst_83 : f32 to vector<16x192xf32>
    %194 = arith.mulf %193, %192 : vector<16x192xf32>
    %195 = math.tanh %194 : vector<16x192xf32>
    %cst_84 = arith.constant 1.000000e+00 : f32
    %196 = vector.broadcast %cst_84 : f32 to vector<16x192xf32>
    %197 = arith.addf %196, %195 : vector<16x192xf32>
    %198 = arith.mulf %187, %197 : vector<16x192xf32>
    %c0_85 = arith.constant 0 : index
    %c0_86 = arith.constant 0 : index
    %c0_87 = arith.constant 0 : index
    %199 = vector.load %arg15[%c0_85, %c0_86, %c0_87] : memref<2x192x48xbf16, #tpu.memory_space<vmem>>, vector<1x192x48xbf16>
    %200 = vector.shape_cast %199 : vector<1x192x48xbf16> to vector<192x48xbf16>
    %201 = arith.truncf %198 : vector<16x192xf32> to vector<16x192xbf16>
    %cst_88 = arith.constant dense<0.000000e+00> : vector<16x48xf32>
    %202 = tpu.matmul %201, %200, %cst_88 {dimension_numbers = #tpu.dot_dimension_numbers<[1], [0], [0], [1], [0, 0, 1, 1], [], []>} : vector<16x192xbf16>, vector<192x48xbf16>, vector<16x48xf32> -> vector<16x48xf32>
    %203 = arith.addf %153, %202 : vector<16x48xf32>
    %c0_89 = arith.constant 0 : index
    %c0_90 = arith.constant 0 : index
    %c0_91 = arith.constant 0 : index
    %204 = vector.load %arg16[%c0_89, %c0_90, %c0_91] : memref<2x1x48xf32, #tpu.memory_space<vmem>>, vector<1x1x48xf32>
    %205 = vector.shape_cast %204 : vector<1x1x48xf32> to vector<1x48xf32>
    %206 = vector.broadcast %205 : vector<1x48xf32> to vector<16x48xf32>
    %207 = arith.addf %203, %206 : vector<16x48xf32>
    %c1 = arith.constant 1 : index
    %c0_92 = arith.constant 0 : index
    %c0_93 = arith.constant 0 : index
    %208 = vector.load %arg5[%c1, %c0_92, %c0_93] : memref<2x1x48xf32, #tpu.memory_space<vmem>>, vector<1x1x48xf32>
    %209 = vector.shape_cast %208 : vector<1x1x48xf32> to vector<1x48xf32>
    %c1_94 = arith.constant 1 : index
    %c0_95 = arith.constant 0 : index
    %c0_96 = arith.constant 0 : index
    %210 = vector.load %arg6[%c1_94, %c0_95, %c0_96] : memref<2x1x48xf32, #tpu.memory_space<vmem>>, vector<1x1x48xf32>
    %211 = vector.shape_cast %210 : vector<1x1x48xf32> to vector<1x48xf32>
    %cst_97 = arith.constant dense<0.000000e+00> : vector<16xf32>
    %212 = vector.multi_reduction <add>, %207, %cst_97 [1] : vector<16x48xf32> to vector<16xf32>
    %213 = vector.shape_cast %212 : vector<16xf32> to vector<16x1xf32>
    %cst_98 = arith.constant 4.800000e+01 : f32
    %214 = vector.broadcast %cst_98 : f32 to vector<16x1xf32>
    %215 = arith.divf %213, %214 : vector<16x1xf32>
    %216 = vector.broadcast %215 : vector<16x1xf32> to vector<16x48xf32>
    %217 = arith.subf %207, %216 : vector<16x48xf32>
    %218 = arith.mulf %217, %217 : vector<16x48xf32>
    %cst_99 = arith.constant dense<0.000000e+00> : vector<16xf32>
    %219 = vector.multi_reduction <add>, %218, %cst_99 [1] : vector<16x48xf32> to vector<16xf32>
    %220 = vector.shape_cast %219 : vector<16xf32> to vector<16x1xf32>
    %cst_100 = arith.constant 4.800000e+01 : f32
    %221 = vector.broadcast %cst_100 : f32 to vector<16x1xf32>
    %222 = arith.divf %220, %221 : vector<16x1xf32>
    %cst_101 = arith.constant 9.99999974E-6 : f32
    %223 = vector.broadcast %cst_101 : f32 to vector<16x1xf32>
    %224 = arith.addf %222, %223 : vector<16x1xf32>
    %225 = math.rsqrt %224 : vector<16x1xf32>
    %226 = vector.broadcast %225 : vector<16x1xf32> to vector<16x48xf32>
    %227 = arith.mulf %217, %226 : vector<16x48xf32>
    %228 = vector.broadcast %209 : vector<1x48xf32> to vector<16x48xf32>
    %229 = arith.mulf %227, %228 : vector<16x48xf32>
    %230 = vector.broadcast %211 : vector<1x48xf32> to vector<16x48xf32>
    %231 = arith.addf %229, %230 : vector<16x48xf32>
    %c1_102 = arith.constant 1 : index
    %c0_103 = arith.constant 0 : index
    %c0_104 = arith.constant 0 : index
    %232 = vector.load %arg7[%c1_102, %c0_103, %c0_104] : memref<2x48x144xbf16, #tpu.memory_space<vmem>>, vector<1x48x144xbf16>
    %233 = vector.shape_cast %232 : vector<1x48x144xbf16> to vector<48x144xbf16>
    %234 = arith.truncf %231 : vector<16x48xf32> to vector<16x48xbf16>
    %cst_105 = arith.constant dense<0.000000e+00> : vector<16x144xf32>
    %235 = tpu.matmul %234, %233, %cst_105 {dimension_numbers = #tpu.dot_dimension_numbers<[1], [0], [0], [1], [0, 0, 1, 1], [], []>} : vector<16x48xbf16>, vector<48x144xbf16>, vector<16x144xf32> -> vector<16x144xf32>
    %c1_106 = arith.constant 1 : index
    %c0_107 = arith.constant 0 : index
    %c0_108 = arith.constant 0 : index
    %236 = vector.load %arg8[%c1_106, %c0_107, %c0_108] : memref<2x1x144xf32, #tpu.memory_space<vmem>>, vector<1x1x144xf32>
    %237 = vector.shape_cast %236 : vector<1x1x144xf32> to vector<1x144xf32>
    %238 = vector.broadcast %237 : vector<1x144xf32> to vector<16x144xf32>
    %239 = arith.addf %235, %238 : vector<16x144xf32>
    %cst_109 = arith.constant 0.000000e+00 : f32
    %240 = vector.broadcast %cst_109 : f32 to vector<16x48xf32>
    %241 = vector.extract_strided_slice %239 {offsets = [0, 0], sizes = [16, 12], strides = [1, 1]} : vector<16x144xf32> to vector<16x12xf32>
    %242 = arith.truncf %241 : vector<16x12xf32> to vector<16x12xbf16>
    %243 = vector.extract_strided_slice %239 {offsets = [0, 48], sizes = [16, 12], strides = [1, 1]} : vector<16x144xf32> to vector<16x12xf32>
    %244 = arith.truncf %243 : vector<16x12xf32> to vector<16x12xbf16>
    %245 = vector.extract_strided_slice %239 {offsets = [0, 96], sizes = [16, 12], strides = [1, 1]} : vector<16x144xf32> to vector<16x12xf32>
    %246 = arith.truncf %245 : vector<16x12xf32> to vector<16x12xbf16>
    %cst_110 = arith.constant dense<0.000000e+00> : vector<16x16xf32>
    %247 = tpu.matmul %242, %244, %cst_110 {dimension_numbers = #tpu.dot_dimension_numbers<[1], [1], [0], [0], [0, 0, 1, 0], [], []>} : vector<16x12xbf16>, vector<16x12xbf16>, vector<16x16xf32> -> vector<16x16xf32>
    %cst_111 = arith.constant 0.288675129 : f32
    %248 = vector.broadcast %cst_111 : f32 to vector<16x16xf32>
    %249 = arith.mulf %247, %248 : vector<16x16xf32>
    %cst_112 = arith.constant dense<0xFF800000> : vector<16xf32>
    %250 = vector.multi_reduction <maximumf>, %249, %cst_112 [1] : vector<16x16xf32> to vector<16xf32>
    %251 = vector.shape_cast %250 : vector<16xf32> to vector<16x1xf32>
    %252 = vector.broadcast %251 : vector<16x1xf32> to vector<16x16xf32>
    %253 = arith.subf %249, %252 : vector<16x16xf32>
    %254 = math.exp %253 : vector<16x16xf32>
    %cst_113 = arith.constant dense<0.000000e+00> : vector<16xf32>
    %255 = vector.multi_reduction <add>, %254, %cst_113 [1] : vector<16x16xf32> to vector<16xf32>
    %256 = vector.shape_cast %255 : vector<16xf32> to vector<16x1xf32>
    %257 = tpu.reciprocal %256 {approx = true} : vector<16x1xf32> -> vector<16x1xf32>
    %258 = vector.broadcast %257 : vector<16x1xf32> to vector<16x16xf32>
    %259 = arith.mulf %254, %258 : vector<16x16xf32>
    %260 = arith.truncf %259 : vector<16x16xf32> to vector<16x16xbf16>
    %cst_114 = arith.constant dense<0.000000e+00> : vector<16x12xf32>
    %261 = tpu.matmul %260, %246, %cst_114 {dimension_numbers = #tpu.dot_dimension_numbers<[1], [0], [0], [1], [0, 0, 1, 1], [], []>} : vector<16x16xbf16>, vector<16x12xbf16>, vector<16x12xf32> -> vector<16x12xf32>
    %262 = arith.truncf %261 : vector<16x12xf32> to vector<16x12xbf16>
    %c1_115 = arith.constant 1 : index
    %c0_116 = arith.constant 0 : index
    %c0_117 = arith.constant 0 : index
    %263 = vector.load %arg9[%c1_115, %c0_116, %c0_117] : memref<2x48x48xbf16, #tpu.memory_space<vmem>>, vector<1x12x48xbf16>
    %264 = vector.shape_cast %263 : vector<1x12x48xbf16> to vector<12x48xbf16>
    %cst_118 = arith.constant dense<0.000000e+00> : vector<16x48xf32>
    %265 = tpu.matmul %262, %264, %cst_118 {dimension_numbers = #tpu.dot_dimension_numbers<[1], [0], [0], [1], [0, 0, 1, 1], [], []>} : vector<16x12xbf16>, vector<12x48xbf16>, vector<16x48xf32> -> vector<16x48xf32>
    %266 = arith.addf %240, %265 : vector<16x48xf32>
    %267 = vector.extract_strided_slice %239 {offsets = [0, 12], sizes = [16, 12], strides = [1, 1]} : vector<16x144xf32> to vector<16x12xf32>
    %268 = arith.truncf %267 : vector<16x12xf32> to vector<16x12xbf16>
    %269 = vector.extract_strided_slice %239 {offsets = [0, 60], sizes = [16, 12], strides = [1, 1]} : vector<16x144xf32> to vector<16x12xf32>
    %270 = arith.truncf %269 : vector<16x12xf32> to vector<16x12xbf16>
    %271 = vector.extract_strided_slice %239 {offsets = [0, 108], sizes = [16, 12], strides = [1, 1]} : vector<16x144xf32> to vector<16x12xf32>
    %272 = arith.truncf %271 : vector<16x12xf32> to vector<16x12xbf16>
    %cst_119 = arith.constant dense<0.000000e+00> : vector<16x16xf32>
    %273 = tpu.matmul %268, %270, %cst_119 {dimension_numbers = #tpu.dot_dimension_numbers<[1], [1], [0], [0], [0, 0, 1, 0], [], []>} : vector<16x12xbf16>, vector<16x12xbf16>, vector<16x16xf32> -> vector<16x16xf32>
    %cst_120 = arith.constant 0.288675129 : f32
    %274 = vector.broadcast %cst_120 : f32 to vector<16x16xf32>
    %275 = arith.mulf %273, %274 : vector<16x16xf32>
    %cst_121 = arith.constant dense<0xFF800000> : vector<16xf32>
    %276 = vector.multi_reduction <maximumf>, %275, %cst_121 [1] : vector<16x16xf32> to vector<16xf32>
    %277 = vector.shape_cast %276 : vector<16xf32> to vector<16x1xf32>
    %278 = vector.broadcast %277 : vector<16x1xf32> to vector<16x16xf32>
    %279 = arith.subf %275, %278 : vector<16x16xf32>
    %280 = math.exp %279 : vector<16x16xf32>
    %cst_122 = arith.constant dense<0.000000e+00> : vector<16xf32>
    %281 = vector.multi_reduction <add>, %280, %cst_122 [1] : vector<16x16xf32> to vector<16xf32>
    %282 = vector.shape_cast %281 : vector<16xf32> to vector<16x1xf32>
    %283 = tpu.reciprocal %282 {approx = true} : vector<16x1xf32> -> vector<16x1xf32>
    %284 = vector.broadcast %283 : vector<16x1xf32> to vector<16x16xf32>
    %285 = arith.mulf %280, %284 : vector<16x16xf32>
    %286 = arith.truncf %285 : vector<16x16xf32> to vector<16x16xbf16>
    %cst_123 = arith.constant dense<0.000000e+00> : vector<16x12xf32>
    %287 = tpu.matmul %286, %272, %cst_123 {dimension_numbers = #tpu.dot_dimension_numbers<[1], [0], [0], [1], [0, 0, 1, 1], [], []>} : vector<16x16xbf16>, vector<16x12xbf16>, vector<16x12xf32> -> vector<16x12xf32>
    %288 = arith.truncf %287 : vector<16x12xf32> to vector<16x12xbf16>
    %c1_124 = arith.constant 1 : index
    %c12_125 = arith.constant 12 : index
    %c0_126 = arith.constant 0 : index
    %289 = vector.load %arg9[%c1_124, %c12_125, %c0_126] : memref<2x48x48xbf16, #tpu.memory_space<vmem>>, vector<1x12x48xbf16>
    %290 = vector.shape_cast %289 : vector<1x12x48xbf16> to vector<12x48xbf16>
    %cst_127 = arith.constant dense<0.000000e+00> : vector<16x48xf32>
    %291 = tpu.matmul %288, %290, %cst_127 {dimension_numbers = #tpu.dot_dimension_numbers<[1], [0], [0], [1], [0, 0, 1, 1], [], []>} : vector<16x12xbf16>, vector<12x48xbf16>, vector<16x48xf32> -> vector<16x48xf32>
    %292 = arith.addf %266, %291 : vector<16x48xf32>
    %293 = vector.extract_strided_slice %239 {offsets = [0, 24], sizes = [16, 12], strides = [1, 1]} : vector<16x144xf32> to vector<16x12xf32>
    %294 = arith.truncf %293 : vector<16x12xf32> to vector<16x12xbf16>
    %295 = vector.extract_strided_slice %239 {offsets = [0, 72], sizes = [16, 12], strides = [1, 1]} : vector<16x144xf32> to vector<16x12xf32>
    %296 = arith.truncf %295 : vector<16x12xf32> to vector<16x12xbf16>
    %297 = vector.extract_strided_slice %239 {offsets = [0, 120], sizes = [16, 12], strides = [1, 1]} : vector<16x144xf32> to vector<16x12xf32>
    %298 = arith.truncf %297 : vector<16x12xf32> to vector<16x12xbf16>
    %cst_128 = arith.constant dense<0.000000e+00> : vector<16x16xf32>
    %299 = tpu.matmul %294, %296, %cst_128 {dimension_numbers = #tpu.dot_dimension_numbers<[1], [1], [0], [0], [0, 0, 1, 0], [], []>} : vector<16x12xbf16>, vector<16x12xbf16>, vector<16x16xf32> -> vector<16x16xf32>
    %cst_129 = arith.constant 0.288675129 : f32
    %300 = vector.broadcast %cst_129 : f32 to vector<16x16xf32>
    %301 = arith.mulf %299, %300 : vector<16x16xf32>
    %cst_130 = arith.constant dense<0xFF800000> : vector<16xf32>
    %302 = vector.multi_reduction <maximumf>, %301, %cst_130 [1] : vector<16x16xf32> to vector<16xf32>
    %303 = vector.shape_cast %302 : vector<16xf32> to vector<16x1xf32>
    %304 = vector.broadcast %303 : vector<16x1xf32> to vector<16x16xf32>
    %305 = arith.subf %301, %304 : vector<16x16xf32>
    %306 = math.exp %305 : vector<16x16xf32>
    %cst_131 = arith.constant dense<0.000000e+00> : vector<16xf32>
    %307 = vector.multi_reduction <add>, %306, %cst_131 [1] : vector<16x16xf32> to vector<16xf32>
    %308 = vector.shape_cast %307 : vector<16xf32> to vector<16x1xf32>
    %309 = tpu.reciprocal %308 {approx = true} : vector<16x1xf32> -> vector<16x1xf32>
    %310 = vector.broadcast %309 : vector<16x1xf32> to vector<16x16xf32>
    %311 = arith.mulf %306, %310 : vector<16x16xf32>
    %312 = arith.truncf %311 : vector<16x16xf32> to vector<16x16xbf16>
    %cst_132 = arith.constant dense<0.000000e+00> : vector<16x12xf32>
    %313 = tpu.matmul %312, %298, %cst_132 {dimension_numbers = #tpu.dot_dimension_numbers<[1], [0], [0], [1], [0, 0, 1, 1], [], []>} : vector<16x16xbf16>, vector<16x12xbf16>, vector<16x12xf32> -> vector<16x12xf32>
    %314 = arith.truncf %313 : vector<16x12xf32> to vector<16x12xbf16>
    %c1_133 = arith.constant 1 : index
    %c24_134 = arith.constant 24 : index
    %c0_135 = arith.constant 0 : index
    %315 = vector.load %arg9[%c1_133, %c24_134, %c0_135] : memref<2x48x48xbf16, #tpu.memory_space<vmem>>, vector<1x12x48xbf16>
    %316 = vector.shape_cast %315 : vector<1x12x48xbf16> to vector<12x48xbf16>
    %cst_136 = arith.constant dense<0.000000e+00> : vector<16x48xf32>
    %317 = tpu.matmul %314, %316, %cst_136 {dimension_numbers = #tpu.dot_dimension_numbers<[1], [0], [0], [1], [0, 0, 1, 1], [], []>} : vector<16x12xbf16>, vector<12x48xbf16>, vector<16x48xf32> -> vector<16x48xf32>
    %318 = arith.addf %292, %317 : vector<16x48xf32>
    %319 = vector.extract_strided_slice %239 {offsets = [0, 36], sizes = [16, 12], strides = [1, 1]} : vector<16x144xf32> to vector<16x12xf32>
    %320 = arith.truncf %319 : vector<16x12xf32> to vector<16x12xbf16>
    %321 = vector.extract_strided_slice %239 {offsets = [0, 84], sizes = [16, 12], strides = [1, 1]} : vector<16x144xf32> to vector<16x12xf32>
    %322 = arith.truncf %321 : vector<16x12xf32> to vector<16x12xbf16>
    %323 = vector.extract_strided_slice %239 {offsets = [0, 132], sizes = [16, 12], strides = [1, 1]} : vector<16x144xf32> to vector<16x12xf32>
    %324 = arith.truncf %323 : vector<16x12xf32> to vector<16x12xbf16>
    %cst_137 = arith.constant dense<0.000000e+00> : vector<16x16xf32>
    %325 = tpu.matmul %320, %322, %cst_137 {dimension_numbers = #tpu.dot_dimension_numbers<[1], [1], [0], [0], [0, 0, 1, 0], [], []>} : vector<16x12xbf16>, vector<16x12xbf16>, vector<16x16xf32> -> vector<16x16xf32>
    %cst_138 = arith.constant 0.288675129 : f32
    %326 = vector.broadcast %cst_138 : f32 to vector<16x16xf32>
    %327 = arith.mulf %325, %326 : vector<16x16xf32>
    %cst_139 = arith.constant dense<0xFF800000> : vector<16xf32>
    %328 = vector.multi_reduction <maximumf>, %327, %cst_139 [1] : vector<16x16xf32> to vector<16xf32>
    %329 = vector.shape_cast %328 : vector<16xf32> to vector<16x1xf32>
    %330 = vector.broadcast %329 : vector<16x1xf32> to vector<16x16xf32>
    %331 = arith.subf %327, %330 : vector<16x16xf32>
    %332 = math.exp %331 : vector<16x16xf32>
    %cst_140 = arith.constant dense<0.000000e+00> : vector<16xf32>
    %333 = vector.multi_reduction <add>, %332, %cst_140 [1] : vector<16x16xf32> to vector<16xf32>
    %334 = vector.shape_cast %333 : vector<16xf32> to vector<16x1xf32>
    %335 = tpu.reciprocal %334 {approx = true} : vector<16x1xf32> -> vector<16x1xf32>
    %336 = vector.broadcast %335 : vector<16x1xf32> to vector<16x16xf32>
    %337 = arith.mulf %332, %336 : vector<16x16xf32>
    %338 = arith.truncf %337 : vector<16x16xf32> to vector<16x16xbf16>
    %cst_141 = arith.constant dense<0.000000e+00> : vector<16x12xf32>
    %339 = tpu.matmul %338, %324, %cst_141 {dimension_numbers = #tpu.dot_dimension_numbers<[1], [0], [0], [1], [0, 0, 1, 1], [], []>} : vector<16x16xbf16>, vector<16x12xbf16>, vector<16x12xf32> -> vector<16x12xf32>
    %340 = arith.truncf %339 : vector<16x12xf32> to vector<16x12xbf16>
    %c1_142 = arith.constant 1 : index
    %c36_143 = arith.constant 36 : index
    %c0_144 = arith.constant 0 : index
    %341 = vector.load %arg9[%c1_142, %c36_143, %c0_144] : memref<2x48x48xbf16, #tpu.memory_space<vmem>>, vector<1x12x48xbf16>
    %342 = vector.shape_cast %341 : vector<1x12x48xbf16> to vector<12x48xbf16>
    %cst_145 = arith.constant dense<0.000000e+00> : vector<16x48xf32>
    %343 = tpu.matmul %340, %342, %cst_145 {dimension_numbers = #tpu.dot_dimension_numbers<[1], [0], [0], [1], [0, 0, 1, 1], [], []>} : vector<16x12xbf16>, vector<12x48xbf16>, vector<16x48xf32> -> vector<16x48xf32>
    %344 = arith.addf %318, %343 : vector<16x48xf32>
    %345 = arith.addf %207, %344 : vector<16x48xf32>
    %c1_146 = arith.constant 1 : index
    %c0_147 = arith.constant 0 : index
    %c0_148 = arith.constant 0 : index
    %346 = vector.load %arg10[%c1_146, %c0_147, %c0_148] : memref<2x1x48xf32, #tpu.memory_space<vmem>>, vector<1x1x48xf32>
    %347 = vector.shape_cast %346 : vector<1x1x48xf32> to vector<1x48xf32>
    %348 = vector.broadcast %347 : vector<1x48xf32> to vector<16x48xf32>
    %349 = arith.addf %345, %348 : vector<16x48xf32>
    %c1_149 = arith.constant 1 : index
    %c0_150 = arith.constant 0 : index
    %c0_151 = arith.constant 0 : index
    %350 = vector.load %arg11[%c1_149, %c0_150, %c0_151] : memref<2x1x48xf32, #tpu.memory_space<vmem>>, vector<1x1x48xf32>
    %351 = vector.shape_cast %350 : vector<1x1x48xf32> to vector<1x48xf32>
    %c1_152 = arith.constant 1 : index
    %c0_153 = arith.constant 0 : index
    %c0_154 = arith.constant 0 : index
    %352 = vector.load %arg12[%c1_152, %c0_153, %c0_154] : memref<2x1x48xf32, #tpu.memory_space<vmem>>, vector<1x1x48xf32>
    %353 = vector.shape_cast %352 : vector<1x1x48xf32> to vector<1x48xf32>
    %cst_155 = arith.constant dense<0.000000e+00> : vector<16xf32>
    %354 = vector.multi_reduction <add>, %349, %cst_155 [1] : vector<16x48xf32> to vector<16xf32>
    %355 = vector.shape_cast %354 : vector<16xf32> to vector<16x1xf32>
    %cst_156 = arith.constant 4.800000e+01 : f32
    %356 = vector.broadcast %cst_156 : f32 to vector<16x1xf32>
    %357 = arith.divf %355, %356 : vector<16x1xf32>
    %358 = vector.broadcast %357 : vector<16x1xf32> to vector<16x48xf32>
    %359 = arith.subf %349, %358 : vector<16x48xf32>
    %360 = arith.mulf %359, %359 : vector<16x48xf32>
    %cst_157 = arith.constant dense<0.000000e+00> : vector<16xf32>
    %361 = vector.multi_reduction <add>, %360, %cst_157 [1] : vector<16x48xf32> to vector<16xf32>
    %362 = vector.shape_cast %361 : vector<16xf32> to vector<16x1xf32>
    %cst_158 = arith.constant 4.800000e+01 : f32
    %363 = vector.broadcast %cst_158 : f32 to vector<16x1xf32>
    %364 = arith.divf %362, %363 : vector<16x1xf32>
    %cst_159 = arith.constant 9.99999974E-6 : f32
    %365 = vector.broadcast %cst_159 : f32 to vector<16x1xf32>
    %366 = arith.addf %364, %365 : vector<16x1xf32>
    %367 = math.rsqrt %366 : vector<16x1xf32>
    %368 = vector.broadcast %367 : vector<16x1xf32> to vector<16x48xf32>
    %369 = arith.mulf %359, %368 : vector<16x48xf32>
    %370 = vector.broadcast %351 : vector<1x48xf32> to vector<16x48xf32>
    %371 = arith.mulf %369, %370 : vector<16x48xf32>
    %372 = vector.broadcast %353 : vector<1x48xf32> to vector<16x48xf32>
    %373 = arith.addf %371, %372 : vector<16x48xf32>
    %c1_160 = arith.constant 1 : index
    %c0_161 = arith.constant 0 : index
    %c0_162 = arith.constant 0 : index
    %374 = vector.load %arg13[%c1_160, %c0_161, %c0_162] : memref<2x48x192xbf16, #tpu.memory_space<vmem>>, vector<1x48x192xbf16>
    %375 = vector.shape_cast %374 : vector<1x48x192xbf16> to vector<48x192xbf16>
    %376 = arith.truncf %373 : vector<16x48xf32> to vector<16x48xbf16>
    %cst_163 = arith.constant dense<0.000000e+00> : vector<16x192xf32>
    %377 = tpu.matmul %376, %375, %cst_163 {dimension_numbers = #tpu.dot_dimension_numbers<[1], [0], [0], [1], [0, 0, 1, 1], [], []>} : vector<16x48xbf16>, vector<48x192xbf16>, vector<16x192xf32> -> vector<16x192xf32>
    %c1_164 = arith.constant 1 : index
    %c0_165 = arith.constant 0 : index
    %c0_166 = arith.constant 0 : index
    %378 = vector.load %arg14[%c1_164, %c0_165, %c0_166] : memref<2x1x192xf32, #tpu.memory_space<vmem>>, vector<1x1x192xf32>
    %379 = vector.shape_cast %378 : vector<1x1x192xf32> to vector<1x192xf32>
    %380 = vector.broadcast %379 : vector<1x192xf32> to vector<16x192xf32>
    %381 = arith.addf %377, %380 : vector<16x192xf32>
    %cst_167 = arith.constant 5.000000e-01 : f32
    %382 = vector.broadcast %cst_167 : f32 to vector<16x192xf32>
    %383 = arith.mulf %382, %381 : vector<16x192xf32>
    %cst_168 = arith.constant 4.471500e-02 : f32
    %384 = vector.broadcast %cst_168 : f32 to vector<16x192xf32>
    %385 = arith.mulf %384, %381 : vector<16x192xf32>
    %386 = arith.mulf %385, %381 : vector<16x192xf32>
    %387 = arith.mulf %386, %381 : vector<16x192xf32>
    %388 = arith.addf %381, %387 : vector<16x192xf32>
    %cst_169 = arith.constant 0.797884583 : f32
    %389 = vector.broadcast %cst_169 : f32 to vector<16x192xf32>
    %390 = arith.mulf %389, %388 : vector<16x192xf32>
    %391 = math.tanh %390 : vector<16x192xf32>
    %cst_170 = arith.constant 1.000000e+00 : f32
    %392 = vector.broadcast %cst_170 : f32 to vector<16x192xf32>
    %393 = arith.addf %392, %391 : vector<16x192xf32>
    %394 = arith.mulf %383, %393 : vector<16x192xf32>
    %c1_171 = arith.constant 1 : index
    %c0_172 = arith.constant 0 : index
    %c0_173 = arith.constant 0 : index
    %395 = vector.load %arg15[%c1_171, %c0_172, %c0_173] : memref<2x192x48xbf16, #tpu.memory_space<vmem>>, vector<1x192x48xbf16>
    %396 = vector.shape_cast %395 : vector<1x192x48xbf16> to vector<192x48xbf16>
    %397 = arith.truncf %394 : vector<16x192xf32> to vector<16x192xbf16>
    %cst_174 = arith.constant dense<0.000000e+00> : vector<16x48xf32>
    %398 = tpu.matmul %397, %396, %cst_174 {dimension_numbers = #tpu.dot_dimension_numbers<[1], [0], [0], [1], [0, 0, 1, 1], [], []>} : vector<16x192xbf16>, vector<192x48xbf16>, vector<16x48xf32> -> vector<16x48xf32>
    %399 = arith.addf %349, %398 : vector<16x48xf32>
    %c1_175 = arith.constant 1 : index
    %c0_176 = arith.constant 0 : index
    %c0_177 = arith.constant 0 : index
    %400 = vector.load %arg16[%c1_175, %c0_176, %c0_177] : memref<2x1x48xf32, #tpu.memory_space<vmem>>, vector<1x1x48xf32>
    %401 = vector.shape_cast %400 : vector<1x1x48xf32> to vector<1x48xf32>
    %402 = vector.broadcast %401 : vector<1x48xf32> to vector<16x48xf32>
    %403 = arith.addf %399, %402 : vector<16x48xf32>
    %c0_178 = arith.constant 0 : index
    %c0_179 = arith.constant 0 : index
    %404 = vector.load %arg17[%c0_178, %c0_179] : memref<1x48xf32, #tpu.memory_space<vmem>>, vector<1x48xf32>
    %c0_180 = arith.constant 0 : index
    %c0_181 = arith.constant 0 : index
    %405 = vector.load %arg18[%c0_180, %c0_181] : memref<1x48xf32, #tpu.memory_space<vmem>>, vector<1x48xf32>
    %cst_182 = arith.constant dense<0.000000e+00> : vector<16xf32>
    %406 = vector.multi_reduction <add>, %403, %cst_182 [1] : vector<16x48xf32> to vector<16xf32>
    %407 = vector.shape_cast %406 : vector<16xf32> to vector<16x1xf32>
    %cst_183 = arith.constant 4.800000e+01 : f32
    %408 = vector.broadcast %cst_183 : f32 to vector<16x1xf32>
    %409 = arith.divf %407, %408 : vector<16x1xf32>
    %410 = vector.broadcast %409 : vector<16x1xf32> to vector<16x48xf32>
    %411 = arith.subf %403, %410 : vector<16x48xf32>
    %412 = arith.mulf %411, %411 : vector<16x48xf32>
    %cst_184 = arith.constant dense<0.000000e+00> : vector<16xf32>
    %413 = vector.multi_reduction <add>, %412, %cst_184 [1] : vector<16x48xf32> to vector<16xf32>
    %414 = vector.shape_cast %413 : vector<16xf32> to vector<16x1xf32>
    %cst_185 = arith.constant 4.800000e+01 : f32
    %415 = vector.broadcast %cst_185 : f32 to vector<16x1xf32>
    %416 = arith.divf %414, %415 : vector<16x1xf32>
    %cst_186 = arith.constant 9.99999974E-6 : f32
    %417 = vector.broadcast %cst_186 : f32 to vector<16x1xf32>
    %418 = arith.addf %416, %417 : vector<16x1xf32>
    %419 = math.rsqrt %418 : vector<16x1xf32>
    %420 = vector.broadcast %419 : vector<16x1xf32> to vector<16x48xf32>
    %421 = arith.mulf %411, %420 : vector<16x48xf32>
    %422 = vector.broadcast %404 : vector<1x48xf32> to vector<16x48xf32>
    %423 = arith.mulf %421, %422 : vector<16x48xf32>
    %424 = vector.broadcast %405 : vector<1x48xf32> to vector<16x48xf32>
    %425 = arith.addf %423, %424 : vector<16x48xf32>
    %c0_187 = arith.constant 0 : index
    %c0_188 = arith.constant 0 : index
    %c0_189 = arith.constant 0 : index
    %426 = vector.load %arg19[%c0_187, %c0_188, %c0_189] : memref<1x16x48xf32, #tpu.memory_space<vmem>>, vector<1x16x48xf32>
    %427 = vector.shape_cast %426 : vector<1x16x48xf32> to vector<16x48xf32>
    %428 = vector.shape_cast %425 : vector<16x48xf32> to vector<1x16x48xf32>
    tpu.vector_store %arg19[%c0_187, %c0_188, %c0_189], %428 {strides = array<i32>} : memref<1x16x48xf32, #tpu.memory_space<vmem>>, vector<1x16x48xf32>,
    return
  }
  func.func @transform_0(%arg0: i32) -> (i32, i32, i32) {
    %c0_i32 = arith.constant 0 : i32
    %c0_i32_0 = arith.constant 0 : i32
    %c0_i32_1 = arith.constant 0 : i32
    return %arg0, %c0_i32, %c0_i32_0 : i32, i32, i32
  }
  func.func @transform_1(%arg0: i32) -> (i32, i32, i32) {
    %c0_i32 = arith.constant 0 : i32
    %c0_i32_0 = arith.constant 0 : i32
    %c0_i32_1 = arith.constant 0 : i32
    return %arg0, %c0_i32, %c0_i32_0 : i32, i32, i32
  }
  func.func @transform_2(%arg0: i32) -> (i32, i32) {
    %c0_i32 = arith.constant 0 : i32
    %c0_i32_0 = arith.constant 0 : i32
    %c0_i32_1 = arith.constant 0 : i32
    return %c0_i32, %c0_i32_0 : i32, i32
  }
  func.func @transform_3(%arg0: i32) -> (i32, i32) {
    %c0_i32 = arith.constant 0 : i32
    %c0_i32_0 = arith.constant 0 : i32
    %c0_i32_1 = arith.constant 0 : i32
    return %c0_i32, %c0_i32_0 : i32, i32
  }
  func.func @transform_4(%arg0: i32) -> (i32, i32, i32) {
    %c0_i32 = arith.constant 0 : i32
    %c0_i32_0 = arith.constant 0 : i32
    %c0_i32_1 = arith.constant 0 : i32
    %c0_i32_2 = arith.constant 0 : i32
    return %c0_i32, %c0_i32_0, %c0_i32_1 : i32, i32, i32
  }
  func.func @transform_5(%arg0: i32) -> (i32, i32, i32) {
    %c0_i32 = arith.constant 0 : i32
    %c0_i32_0 = arith.constant 0 : i32
    %c0_i32_1 = arith.constant 0 : i32
    %c0_i32_2 = arith.constant 0 : i32
    return %c0_i32, %c0_i32_0, %c0_i32_1 : i32, i32, i32
  }
  func.func @transform_6(%arg0: i32) -> (i32, i32, i32) {
    %c0_i32 = arith.constant 0 : i32
    %c0_i32_0 = arith.constant 0 : i32
    %c0_i32_1 = arith.constant 0 : i32
    %c0_i32_2 = arith.constant 0 : i32
    return %c0_i32, %c0_i32_0, %c0_i32_1 : i32, i32, i32
  }
  func.func @transform_7(%arg0: i32) -> (i32, i32, i32) {
    %c0_i32 = arith.constant 0 : i32
    %c0_i32_0 = arith.constant 0 : i32
    %c0_i32_1 = arith.constant 0 : i32
    %c0_i32_2 = arith.constant 0 : i32
    return %c0_i32, %c0_i32_0, %c0_i32_1 : i32, i32, i32
  }
  func.func @transform_8(%arg0: i32) -> (i32, i32, i32) {
    %c0_i32 = arith.constant 0 : i32
    %c0_i32_0 = arith.constant 0 : i32
    %c0_i32_1 = arith.constant 0 : i32
    %c0_i32_2 = arith.constant 0 : i32
    return %c0_i32, %c0_i32_0, %c0_i32_1 : i32, i32, i32
  }
  func.func @transform_9(%arg0: i32) -> (i32, i32, i32) {
    %c0_i32 = arith.constant 0 : i32
    %c0_i32_0 = arith.constant 0 : i32
    %c0_i32_1 = arith.constant 0 : i32
    %c0_i32_2 = arith.constant 0 : i32
    return %c0_i32, %c0_i32_0, %c0_i32_1 : i32, i32, i32
  }
  func.func @transform_10(%arg0: i32) -> (i32, i32, i32) {
    %c0_i32 = arith.constant 0 : i32
    %c0_i32_0 = arith.constant 0 : i32
    %c0_i32_1 = arith.constant 0 : i32
    %c0_i32_2 = arith.constant 0 : i32
    return %c0_i32, %c0_i32_0, %c0_i32_1 : i32, i32, i32
  }
  func.func @transform_11(%arg0: i32) -> (i32, i32, i32) {
    %c0_i32 = arith.constant 0 : i32
    %c0_i32_0 = arith.constant 0 : i32
    %c0_i32_1 = arith.constant 0 : i32
    %c0_i32_2 = arith.constant 0 : i32
    return %c0_i32, %c0_i32_0, %c0_i32_1 : i32, i32, i32
  }
  func.func @transform_12(%arg0: i32) -> (i32, i32, i32) {
    %c0_i32 = arith.constant 0 : i32
    %c0_i32_0 = arith.constant 0 : i32
    %c0_i32_1 = arith.constant 0 : i32
    %c0_i32_2 = arith.constant 0 : i32
    return %c0_i32, %c0_i32_0, %c0_i32_1 : i32, i32, i32
  }
  func.func @transform_13(%arg0: i32) -> (i32, i32, i32) {
    %c0_i32 = arith.constant 0 : i32
    %c0_i32_0 = arith.constant 0 : i32
    %c0_i32_1 = arith.constant 0 : i32
    %c0_i32_2 = arith.constant 0 : i32
    return %c0_i32, %c0_i32_0, %c0_i32_1 : i32, i32, i32
  }
  func.func @transform_14(%arg0: i32) -> (i32, i32, i32) {
    %c0_i32 = arith.constant 0 : i32
    %c0_i32_0 = arith.constant 0 : i32
    %c0_i32_1 = arith.constant 0 : i32
    %c0_i32_2 = arith.constant 0 : i32
    return %c0_i32, %c0_i32_0, %c0_i32_1 : i32, i32, i32
  }
  func.func @transform_15(%arg0: i32) -> (i32, i32, i32) {
    %c0_i32 = arith.constant 0 : i32
    %c0_i32_0 = arith.constant 0 : i32
    %c0_i32_1 = arith.constant 0 : i32
    %c0_i32_2 = arith.constant 0 : i32
    return %c0_i32, %c0_i32_0, %c0_i32_1 : i32, i32, i32
  }
  func.func @transform_16(%arg0: i32) -> (i32, i32) {
    %c0_i32 = arith.constant 0 : i32
    %c0_i32_0 = arith.constant 0 : i32
    %c0_i32_1 = arith.constant 0 : i32
    return %c0_i32, %c0_i32_0 : i32, i32
  }
  func.func @transform_17(%arg0: i32) -> (i32, i32) {
    %c0_i32 = arith.constant 0 : i32
    %c0_i32_0 = arith.constant 0 : i32
    %c0_i32_1 = arith.constant 0 : i32
    return %c0_i32, %c0_i32_0 : i32, i32
  }
  func.func @transform_18(%arg0: i32) -> (i32, i32, i32) {
    %c0_i32 = arith.constant 0 : i32
    %c0_i32_0 = arith.constant 0 : i32
    %c0_i32_1 = arith.constant 0 : i32
    return %arg0, %c0_i32, %c0_i32_0 : i32, i32, i32
  }
}

</mosaic_0001>

<bundles_post_ra>
// kernel: _lambda_.1
= control target key start
LH: loop header
LB: loop body
LE: loop exit
PB: predicated region body
PF: predicated region fallthrough
CT: control target
= control target key end

     0   :  { %s5169_s0 = inlined_call_operand.hbm [shape: f32[2,16,48], index: 0, kind: input, shape index: {}]   ;;  %s5170_s1 = inlined_call_operand.vmem [shape: f32[2,16,48], index: 1, kind: input, shape index: {}]   ;;  %s5171_s2 = inlined_call_operand.vmem [shape: f32[1,48], index: 2, kind: input, shape index: {}]   ;;  %s5172_s3 = inlined_call_operand.vmem [shape: f32[1,48], index: 3, kind: input, shape index: {}]   ;;  %s5173_s4 = inlined_call_operand.vmem [shape: f32[2,1,48], index: 4, kind: input, shape index: {}, may-alias: {4,10}]   ;;  %s5174_s5 = inlined_call_operand.vmem [shape: f32[2,1,48], index: 5, kind: input, shape index: {}, may-alias: {5,11}]   ;;  %s5175_s6 = inlined_call_operand.hbm [shape: bf16[2,48,144], index: 6, kind: input, shape index: {}]   ;;  %s5176_s7 = inlined_call_operand.vmem [shape: f32[2,1,144], index: 7, kind: input, shape index: {}]   ;;  %s5177_s8 = inlined_call_operand.vmem [shape: bf16[2,48,48], index: 8, kind: input, shape index: {}]   ;;  %s5178_s9 = inlined_call_operand.vmem [shape: f32[2,1,48], index: 9, kind: input, shape index: {}]   ;;  %s5179_s10 = inlined_call_operand.vmem [shape: f32[2,1,48], index: 10, kind: input, shape index: {}, may-alias: {4,10}]   ;;  %s5180_s11 = inlined_call_operand.vmem [shape: f32[2,1,48], index: 11, kind: input, shape index: {}, may-alias: {5,11}]   ;;  %s5181_s12 = inlined_call_operand.hbm [shape: bf16[2,48,192], index: 12, kind: input, shape index: {}]   ;;  %s5182_s13 = inlined_call_operand.vmem [shape: f32[2,1,192], index: 13, kind: input, shape index: {}]   ;;  %s5183_s14 = inlined_call_operand.vmem [shape: bf16[2,192,48], index: 14, kind: input, shape index: {}]   ;;  %s5184_s15 = inlined_call_operand.vmem [shape: f32[2,1,48], index: 15, kind: input, shape index: {}]   ;;  %s5185_s16 = inlined_call_operand.vmem [shape: f32[1,48], index: 16, kind: input, shape index: {}]   ;;  %s5186_s17 = inlined_call_operand.vmem [shape: f32[1,48], index: 17, kind: input, shape index: {}]   ;;  %s5187_s18 = inlined_call_operand.hbm [shape: f32[2,16,48], index: 18, kind: output, shape index: {}]  }
   0x1   :  { %5211 = sst [smem:[#allocation19_spill]] %s5169_s0 }
   0x2   :  { %5212 = sst [smem:[#allocation20_spill]] %s5170_s1 }
   0x3   :  { %5213 = sst [smem:[#allocation21_spill]] %s5171_s2 }
   0x4   :  { %5214 = sst [smem:[#allocation22_spill]] %s5175_s6 }
   0x5   :  { %5215 = sst [smem:[#allocation23_spill]] %s5181_s12 }
   0x6   :  { %5216 = sst [smem:[#allocation24_spill]] %s5187_s18 }
   0x7   :  { %23 = vsyncpa [#allocation3], 0 }
   0x8   :  { %25 = vsyncpa [#allocation3 + $0x1], 0 }
   0x9   :  { %26 = vsyncpa [#allocation6], 0 }
   0xa   :  { %27 = vsyncpa [#allocation4], 0 }
   0xb   :  { %29 = vsyncpa [#allocation4 + $0x1], 0  ;;  %s4372_s27 = smov 0   ;;  %s4374_s28 = smov 0  }
   0xc   :  { %s4376_s29 = smov 0   ;;  %s4378_s30 = smov 0  }
   0xd LB: > { %5217 = sst [smem:[#allocation12_spill]] %s4236_s27  ;;  %s4393_s0 = sadd.s32 4294967295, %s4248_s30   ;;  %s4248_s30 = sphi %s4378_s30, %s5258_s30   ;;  %s4244_s29 = sphi %s4376_s29, %s5260_s29   ;;  %s4240_s28 = sphi %s4374_s28, %s5262_s28   ;;  %s4236_s27 = sphi %s4372_s27, %s5261_s27  }
   0xe   : > { %5218 = sst [smem:[#allocation13_spill]] %s4244_s29  ;;  %s3461_s19 = sadd.s32 4294967294, %s4248_s30  }
   0xf   : > { %5219 = sst [smem:[#allocation14_spill]] %s4248_s30  ;;  %p55_p0 = scmp.ne.s32.totalorder %s4240_s28, %s4236_s27 }
  0x10   : > { %p5198_p1 = scmp.eq.s32.totalorder %s4393_s0, 0  ;;  %p441_p2 = scmp.eq.s32.totalorder %s4393_s0, 1 }
  0x11   : > { %p447_p3 = scmp.eq.s32.totalorder %s3461_s19, 1  ;;  %p3462_p5 = scmp.ge.s32.totalorder %s4248_s30, 1 }
  0x12   : > { %p4402_p4 = por %p5198_p1, %p55_p0  ;;  %p454_p7 = scmp.lt.s32.totalorder %s4248_s30, 3 }
  0x13   : > { %p4407_p6 = por %p447_p3, %p55_p0  ;;  %s4250_s22 = smov [#allocation5]  }
  0x14   : > { %s5220_s1 = scalar_select %p4402_p4, 1, 0 }
  0x15   : > { %s5221_s20 = scalar_select %p4407_p6, 1, 0 }
  0x16   : > { %p4412_p8 = pnand %p3462_p5, %p454_p7  ;;  %s478_s2 = sshll.u32 %s4250_s22, 4  ;;  %s479_s2 = int_to_ptr.vmem [resolvable:$true] %s478_s2 }
  0x17   : > { %5222 = sst [smem:[#allocation15_spill]] %s5221_s20  ;;  %s4251_s24 = smov [#allocation7]  }
  0x18   : > { %s5223_s21 = scalar_select %p4412_p8, 1, 0 }
  0x19   : > { %p3846_p9 = pneg %p4412_p8  ;;  %s506_s25 = sshll.u32 %s4251_s24, 4  ;;  %s507_s25 = int_to_ptr.vmem [resolvable:$true] %s506_s25 }
  0x1a   : > { %s4111_s26 = scalar_lea.vmem %s479_s2, 1536  ;;  %p4119_p5 = scmp.lt.s32.totalorder %s479_s2, %s479_s2 }
  0x1b   : > { %p4421_p11 = pnand %p3846_p9, %p5198_p1  ;;  %p4112_p13 = scmp.ne.s32.totalorder %s479_s2, %s4111_s26 }
  0x1c   : > { %p4120_p7 = scmp.lt.s32.totalorder %s4111_s26, %s4111_s26 }
  0x1d   : > { %p4102_p12 = pneg %p4421_p11 }
  0x1e   : > { %p4121_p10 = por %p4120_p7, %p4119_p5 }
  0x1f   : > { %p4114_p0 = pnand %p4112_p13, %p4102_p12 }
  0x21   : > { %p4115_p3 = pneg %p4114_p0 }
  0x23   : > { %p4122_p9 = pnand %p4121_p10, %p4115_p3 }
  0x25   : > { %4125 = shalt.err (!%p4122_p9)
}
  0x26   : > { %s5192_s19 = smov 128   ;;  %s5193_s22 = smov 8  }
  0x27   : > { %s5225_s6 = sld [smem:[#allocation22_spill]]  ;;  %s4137_s27 = scalar_lea.vmem %s507_s25, 1536 }
  0x28   : > { %p4138_p13 = scmp.ne.s32.totalorder %s507_s25, %s4137_s27  ;;  %p4145_p10 = scmp.lt.s32.totalorder %s507_s25, %s507_s25 }
  0x29   : > { %p4146_p3 = scmp.lt.s32.totalorder %s4137_s27, %s4137_s27 }
  0x2a   : > { %p4140_p0 = pnand %p4138_p13, %p4102_p12 }
  0x2b   : > { %p4147_p7 = por %p4146_p3, %p4145_p10 }
  0x2c   : > { %p4141_p5 = pneg %p4140_p0 }
  0x2d   : > { %3849 = dma.hbm_to_vmem [thread:$0]  (!%p4421_p11), %s5225_s6, 1536, %s479_s2, [#allocation6], %s5192_s19, %s5192_s19, %s5193_s22  }
  0x2e   : > { %p4148_p9 = pnand %p4147_p7, %p4141_p5 }
  0x30   : > { %4151 = shalt.err (!%p4148_p9)
}
  0x31   : > { %s5226_s12 = sld [smem:[#allocation23_spill]]  ;;  %s4450_s27 = sadd.s32 1, %s4248_s30  }
  0x32   : > { %5227 = sst [smem:[#allocation16_spill]] %s4450_s27  ;;  %s42_s20 = sadd.s32 1, %s4244_s29 }
  0x33   : > { %s39_s2 = ssub.s32 %s4248_s30, %s4450_s27  ;;  %p49_p12 = scmp.ne.s32.totalorder %s4244_s29, %s4240_s28 }
  0x34   : > { %p40_p13 = scmp.eq.s32.totalorder %s39_s2, 0  ;;  %p50_p0 = scmp.eq.s32.totalorder %s4248_s30, 0 }
  0x35   : > { %p4460_p5 = por %p441_p2, %p49_p12  ;;  %p3863_p10 = scmp.lt.s32.totalorder %s4248_s30, 2 }
  0x36   : > { %s4466_s23 = scalar_select %p40_p13, %s4244_s29, %s42_s20  }
  0x37   : > { %3852 = dma.hbm_to_vmem [thread:$0]  (!%p4421_p11), %s5226_s12, 1536, %s507_s25, [#allocation6], %s5192_s19, %s5192_s19, %s5193_s22  }
  0x38   : > { %s5228_s18 = scalar_select %p4460_p5, 1, 0 }
  0x39   : > { %5230 = sst [smem:[#allocation18_spill]] %s4466_s23  ;;  %p51_p3 = por %p50_p0, %p49_p12 }
  0x3a   : > { %5229 = sst [smem:[#allocation17_spill]] %s5228_s18  ;;  %s535_s24 = sand.u32 1, %s4244_s29  }
  0x3b   : > { %s3466_s26 = sshll.u32 %s535_s24, 4  ;;  %s3631_s25 = sshll.u32 %s4248_s30, 8 }
  0x3c   : > { %s5231_s6 = sld [smem:[#allocation19_spill]]  ;;  %s539_s2 = scalar_lea.vmem [#allocation2], %s3466_s26 }
  0x3d   : > { %s546_s27 = sshll.u32 %s539_s2, 4  ;;  %p4477_p2 = pnand %p3863_p10, %p51_p3  ;;  %s4475_s27 = int_to_ptr.vmem [resolvable:$true] %s546_s27 }
  0x3e   : > { %s4481_s20 = scalar_lea.sflag [#allocation3], %s535_s24 }
  0x3f   : > { %p4154_p7 = pneg %p4477_p2 }
  0x42   : > { %s4473_s12 = scalar_lea.hbm %s5231_s6, %s3631_s25  ;;  %s4157_s26 = scalar_lea.hbm %s5231_s6, 512 }
  0x43   : > { %s4152_s23 = scalar_lea.hbm %s4473_s12, 256  ;;  %p4158_p13 = scmp.lt.s32.totalorder %s4473_s12, %s5231_s6 }
  0x44   : > { %p4153_p11 = scmp.ne.s32.totalorder %s4473_s12, %s4152_s23  ;;  %p4159_p0 = scmp.lt.s32.totalorder %s4157_s26, %s4152_s23 }
  0x46   : > { %p4155_p9 = pnand %p4154_p7, %p4153_p11  ;;  %p4160_p10 = por %p4159_p0, %p4158_p13 }
  0x48   : > { %p4156_p12 = pneg %p4155_p9 }
  0x4a   : > { %p4161_p3 = pnand %p4160_p10, %p4156_p12 }
  0x4c   : > { %4164 = shalt.err (!%p4161_p3)
}
  0x4d   : > { %s4165_s24 = scalar_lea.vmem %s4475_s27, 256  ;;  %s4254_s29 = smov [#allocation2]  }
  0x4e   : > { %p4166_p1 = scmp.ne.s32.totalorder %s4475_s27, %s4165_s24  ;;  %s4170_s30 = sshll.u32 %s4254_s29, 4  ;;  %s4171_s30 = int_to_ptr.vmem [resolvable:$false] %s4170_s30 }
  0x4f   : > { %s4172_s19 = scalar_lea.vmem %s4171_s30, 512  ;;  %p4173_p9 = scmp.lt.s32.totalorder %s4475_s27, %s4171_s30 }
  0x50   : > { %p4168_p6 = pnand %p4166_p1, %p4154_p7  ;;  %p4174_p5 = scmp.lt.s32.totalorder %s4172_s19, %s4165_s24 }
  0x52   : > { %p4169_p11 = pneg %p4168_p6  ;;  %p4175_p4 = por %p4174_p5, %p4173_p9 }
  0x54   : > { %p4176_p8 = pnand %p4175_p4, %p4169_p11 }
  0x56   : > { %4179 = shalt.err (!%p4176_p8)
}
  0x57   : > { %s5233_s23 = smov 8   ;;  %s5234_s22 = smov 128  }
  0x58   : > { %3856 = dma.hbm_to_vmem [thread:$0]  (!%p4477_p2), %s4473_s12, 256, %s4475_s27, %s4481_s20, %s5234_s22, %s5234_s22, %s5233_s23  }
  0x59   : > { %p5235_p1 = scmp.ne.s32.totalorder %s5223_s21, 0 }
  0x5a   : > { %s4508_s29 = sand.u32 (!%p5235_p1), 1, %s4240_s28   ;;  %p5236_p4 = scmp.ne.s32.totalorder (!%p5235_p1), %s5220_s1, 0 }
  0x5b   : > { %566 = sbr.rel (%p5235_p1) target bundleno = 8637 (0x21bd), region = 92  ;;  %s5204_s30 = sshll.u32 (!%p5235_p1), %s4508_s29, 4 }
  0x5c   : > { %s569_s26 = scalar_lea.sflag (!%p5235_p1), [#allocation3], %s4508_s29  ;;  %s4514_s18 = scalar_lea.vmem (!%p5235_p1), [#allocation2], %s5204_s30 }
  0x60   : > { %4223 = dma.done.wait (%p5236_p4), %s569_s26, 256  }
  0x61   : > { %4225 = vsyncadd (%p5236_p4), %s569_s26, 4294967040  ;;  %p5237_p6 = scmp.eq.s32.totalorder %s4393_s0, 0 }
  0x63   : > { %4227 = dma.done.wait (%p5237_p6), [#allocation6], 3072   ;;  %p5238_p8 = pmov %p5237_p6 }
  0x64   : > { %p638_p5 = scmp.lt.s32.totalorder %s4393_s0, 1  ;;  %s5239_s25 = sld [smem:[#allocation20_spill]]  ;;  %v3477_v1 = vld [vmem:[%s5172_s3] ss:$0 sm:$0xff]  ;;  %v4255_v30 = vmov 683565275  }
  0x65   : > { %4229 = vsyncadd (%p5238_p8), [#allocation6], 4294964224  ;;  %s5240_s22 = sld [smem:[#allocation21_spill]]  ;;  %v4256_v32 = vmov 2475754826   ;;  %s4266_s24 = smov 116  }
  0x66   : > { %s639_s12 = scalar_select %p638_p5, %s4393_s0, 1  ;;  %v4257_v34 = vmov 2131351028   ;;  %v4258_v36 = vmov 2102212464  }
  0x67   : > { %v4259_v38 = vmov 920167782   ;;  %v4260_v46 = vmov 1326507024   ;;  %s4267_s19 = smov 32   ;;  %s4268_s1 = smov 56  }
  0x68   : > { %s3632_s21 = sshll.u32 %s639_s12, 4  ;;  %s5210_s23 = smov 104  }
  0x69   : > { %s5208_s27 = smov 8   ;;  %s5207_s20 = smov 44  }
  0x6a   : > { %s642_s2 = scalar_lea.vmem %s5239_s25, %s3632_s21  ;;  %s4264_s25 = smov 80  }
  0x6b   : > { %v647_v0 = vld [vmem:[%s642_s2] sm:$0xff]  ;;  %v648_v3 = vld [vmem:[%s642_s2 + $0x8] sm:$0xff]  ;;  %s4265_s2 = smov 68   ;;  %s5206_s26 = smov 92  }
  0x6c   : > { %v3476_v2 = vld [vmem:[%s5240_s22] ss:$0 sm:$0xff]  ;;  %s4270_s22 = smov 20   ;;  %s5205_s21 = smov 124  }
  0x6d   : > { %v656_v4 = vmul.f32 %v3476_v2, %v647_v0  ;;  %v657_v5 = vmul.f32 %v3476_v2, %v648_v3  ;;  %s3633_s12 = sshll.u32 %s4393_s0, 8  ;;  %s3344_s0 = scalar_lea.sflag [#allocation4], %s4508_s29 }
  0x6f   : > { %v4535_v6 = vadd.f32 %v3477_v1, %v656_v4  ;;  %v4537_v7 = vadd.f32 %v3477_v1, %v657_v5 }
  0x71   : > { %v666_v8 = vand.u32 2147483647, %v4535_v6  ;;  %v669_v9 = vand.u32 2139095040, %v4535_v6  ;;  %v770_v10 = vand.u32 2147483647, %v4537_v7  ;;  %v773_v11 = vand.u32 2139095040, %v4537_v7 }
  0x72   : > { %vm668_vm14 = vcmp.lt.s32.totalorder %v4535_v6, 0 }
  0x73   : > { %v670_v12 = vshrl.u32 %v669_v9, 23  ;;  %v673_v13 = vand.u32 8388607, %v666_v8  ;;  %v774_v14 = vshrl.u32 %v773_v11, 23  ;;  %v777_v15 = vand.u32 8388607, %v770_v10 }
  0x74   : > { %vm4598_vm15 = vcmp.le.f32.partialorder %v666_v8, 0.7853982 }
  0x75   : > { %v3478_v16 = vadd.s32 4294967169, %v670_v12  ;;  %v674_v17 = vor.u32 8388608, %v673_v13  ;;  %v3482_v18 = vadd.s32 4294967169, %v774_v14  ;;  %v778_v20 = vor.u32 8388608, %v777_v15 }
  0x77   : > { %v676_v19 = vadd.s32 1, %v3478_v16  ;;  %v4547_v21 = vshll.u32 %v674_v17, 8  ;;  %v780_v22 = vadd.s32 1, %v3482_v18  ;;  %v4549_v28 = vshll.u32 %v778_v20, 8 }
  0x79   : > { %vm677_vm0 = vcmp.gt.s32.totalorder %v676_v19, 0  ;;  %vm781_vm1 = vcmp.gt.s32.totalorder %v780_v22, 0 }
  0x7a   : > { %v678_v23 = vsel %vm677_vm0, %v676_v19, 0  ;;  %v782_v26 = vsel %vm781_vm1, %v780_v22, 0  ;;  %vm772_vm0 = vcmp.lt.s32.totalorder %v4537_v7, 0  ;;  %vm771_vm1 = vcmp.le.f32.partialorder %v770_v10, 0.7853982 }
  0x7b   : > { %v679_v24 = vshrl.u32 %v678_v23, 5  ;;  %v680_v25 = vand.u32 31, %v678_v23  ;;  %v784_v27 = vand.u32 31, %v782_v26  ;;  %v4551_v40 = vshrl.u32 %v782_v26, 5 }
  0x7d   : > { %v681_v29 = vsub.s32 32, %v680_v25  ;;  %v683_v31 = vshll.u32 %v4255_v30, %v680_v25  ;;  %v686_v33 = vshll.u32 %v4256_v32, %v680_v25  ;;  %v689_v35 = vshll.u32 %v4257_v34, %v680_v25 }
  0x7e   : > { %v692_v37 = vshll.u32 %v4258_v36, %v680_v25  ;;  %v695_v39 = vshll.u32 %v4259_v38, %v680_v25  ;;  %vm698_vm2 = vcmp.lt.s32.totalorder %v679_v24, 1  ;;  %vm699_vm3 = vcmp.lt.s32.totalorder %v679_v24, 2 }
  0x7f   : > { %v682_v41 = vshrl.u32 %v4255_v30, %v681_v29  ;;  %v684_v42 = vshrl.u32 %v4256_v32, %v681_v29  ;;  %v687_v43 = vshrl.u32 %v4257_v34, %v681_v29  ;;  %v690_v44 = vshrl.u32 %v4258_v36, %v681_v29 }
  0x80   : > { %v693_v45 = vshrl.u32 %v4259_v38, %v681_v29  ;;  %v696_v47 = vshrl.u32 %v4260_v46, %v681_v29  ;;  %vm701_vm4 = vcmp.lt.s32.totalorder %v679_v24, 4  ;;  %v785_v51 = vsub.s32 32, %v784_v27 }
  0x81   : > { %v685_v48 = vor.u32 %v684_v42, %v683_v31  ;;  %v688_v49 = vor.u32 %v687_v43, %v686_v33  ;;  %v691_v50 = vor.u32 %v690_v44, %v689_v35  ;;  %vm700_vm5 = vcmp.lt.s32.totalorder %v679_v24, 3 }
  0x82   : > { %v694_v52 = vor.u32 %v693_v45, %v692_v37  ;;  %v697_v53 = vor.u32 %v696_v47, %v695_v39  ;;  %v787_v54 = vshll.u32 %v4255_v30, %v784_v27  ;;  %v790_v62 = vshll.u32 %v4256_v32, %v784_v27 }
  0x83   : > { %v702_v55 = vsel %vm698_vm2, %v682_v41, %v685_v48  ;;  %v703_v56 = vsel %vm701_vm4, %v691_v50, 2102212464  ;;  %v706_v57 = vsel %vm698_vm2, %v685_v48, %v688_v49  ;;  %v710_v58 = vsel %vm698_vm2, %v688_v49, %v691_v50 }
  0x84   : > { %v704_v59 = vsel %vm700_vm5, %v688_v49, %v703_v56  ;;  %v707_v60 = vsel %vm701_vm4, %v694_v52, 920167782  ;;  %v711_v61 = vsel %vm701_vm4, %v697_v53, 1326507024  ;;  %v786_v1 = vshrl.u32 %v4255_v30, %v785_v51 }
  0x85   : > { %v708_v63 = vsel %vm700_vm5, %v691_v50, %v707_v60  ;;  %v712_v0 = vsel %vm700_vm5, %v694_v52, %v711_v61  ;;  %v788_v2 = vshrl.u32 %v4256_v32, %v785_v51  ;;  %v705_v3 = vsel %vm699_vm3, %v702_v55, %v704_v59 }
  0x86   : > { %v709_v4 = vsel %vm699_vm3, %v706_v57, %v708_v63  ;;  %v713_v5 = vsel %vm699_vm3, %v710_v58, %v712_v0  ;;  %v791_v9 = vshrl.u32 %v4257_v34, %v785_v51  ;;  %v793_v17 = vshll.u32 %v4257_v34, %v784_v27 }
  0x87   : > { %v4560_v11 = vmul.u32.u64.low %v4547_v21, %v713_v5  ;;  %v4561_v12 = vmul.u32.u64.high %v4547_v21, %v713_v5, %v4560_v11  ;;  %v4564_v13 = vmul.u32.u64.low %v4547_v21, %v709_v4  ;;  %v4565_v14 = vmul.u32.u64.high %v4547_v21, %v709_v4, %v4564_v13 }
  0x88   : > { %v789_v15 = vor.u32 %v788_v2, %v787_v54  ;;  %v792_v16 = vor.u32 %v791_v9, %v790_v62  ;;  %v794_v18 = vshrl.u32 %v4258_v36, %v785_v51  ;;  %v796_v19 = vshll.u32 %v4258_v36, %v784_v27 }
  0x89   : > { %v797_v20 = vshrl.u32 %v4259_v38, %v785_v51  ;;  %v799_v22 = vshll.u32 %v4259_v38, %v784_v27  ;;  %v800_v23 = vshrl.u32 %v4260_v46, %v785_v51  ;;  %v721_v24 = vmul.u32 %v4547_v21, %v705_v3 }
  0x8a   : > { %v795_v25 = vor.u32 %v794_v18, %v793_v17  ;;  %vm802_vm6 = vcmp.lt.s32.totalorder %v4551_v40, 1  ;;  %vm803_vm7 = vcmp.lt.s32.totalorder %v4551_v40, 2  ;;  %vm723_vm8 = vc.u32 %v4561_v12, %v4564_v13 }
  0x8b   : > { %v724_v26 = vadd.s32 1, %v4565_v14  ;;  %v798_v29 = vor.u32 %v797_v20, %v796_v19  ;;  %vm804_vm9 = vcmp.lt.s32.totalorder %v4551_v40, 3  ;;  %v801_v30 = vor.u32 %v800_v23, %v799_v22 }
  0x8c   : > { %vm805_vm10 = vcmp.lt.s32.totalorder %v4551_v40, 4  ;;  %v806_v31 = vsel %vm802_vm6, %v786_v1, %v789_v15  ;;  %v810_v27 = vsel %vm802_vm6, %v789_v15, %v792_v16  ;;  %v814_v34 = vsel %vm802_vm6, %v792_v16, %v795_v25 }
  0x8d   : > { %v725_v32 = vsel %vm723_vm8, %v724_v26, %v4565_v14  ;;  %v807_v21 = vsel %vm805_vm10, %v795_v25, 2102212464  ;;  %v811_v33 = vsel %vm805_vm10, %v798_v29, 920167782  ;;  %v815_v38 = vsel %vm805_vm10, %v801_v30, 1326507024 }
  0x8e   : > { %v726_v35 = vadd.s32 %v725_v32, %v721_v24  ;;  %v808_v36 = vsel %vm804_vm9, %v792_v16, %v807_v21  ;;  %v812_v37 = vsel %vm804_vm9, %v795_v25, %v811_v33  ;;  %v816_v42 = vsel %vm804_vm9, %v798_v29, %v815_v38 }
  0x8f   : > { %v809_v39 = vsel %vm803_vm7, %v806_v31, %v808_v36  ;;  %v813_v41 = vsel %vm803_vm7, %v810_v27, %v812_v37  ;;  %v817_v44 = vsel %vm803_vm7, %v814_v34, %v816_v42  ;;  %v722_v63 = vadd.s32 %v4564_v13, %v4561_v12 }
  0x90   : > { %v727_v43 = vadd.s32 536870912, %v726_v35  ;;  %v4582_v45 = vmul.u32.u64.low %v4549_v28, %v813_v41  ;;  %v4583_v46 = vmul.u32.u64.high %v4549_v28, %v813_v41, %v4582_v45  ;;  %v825_v50 = vmul.u32 %v4549_v28, %v809_v39 }
  0x91   : > { %v4586_v47 = vmul.u32.u64.low %v4549_v28, %v817_v44  ;;  %v4587_v48 = vmul.u32.u64.high %v4549_v28, %v817_v44, %v4586_v47  ;;  %vm758_vm5 = vweird.f32 %v4535_v6  ;;  %vm878_vm6 = vcmask 392192  }
  0x92   : > { %v728_v49 = vshrl.u32 %v727_v43, 30  ;;  %v828_v52 = vadd.s32 1, %v4583_v46  ;;  %vm862_vm10 = vweird.f32 %v4537_v7 }
  0x93   : > { %vm827_vm11 = vc.u32 %v4587_v48, %v4582_v45  ;;  %v826_v19 = vadd.s32 %v4582_v45, %v4587_v48 }
  0x94   : > { %v729_v51 = vshll.u32 %v728_v49, 30  ;;  %v829_v40 = vsel %vm827_vm11, %v828_v52, %v4583_v46  ;;  %v752_v25 = vsub.s32 4, %v728_v49  ;;  %vm4263_vm11 = vmmov 0  }
  0x95   : > { %v830_v54 = vadd.s32 %v829_v40, %v825_v50 }
  0x96   : > { %v730_v53 = vsub.s32 %v726_v35, %v729_v51  ;;  %v753_v33 = vsel %vm668_vm14, %v752_v25, %v728_v49 }
  0x97   : > { %v831_v56 = vadd.s32 536870912, %v830_v54  ;;  %v755_v8 = vsel %vm4598_vm15, 0, %v753_v33  ;;  %v3486_v33 = vld [vmem:[%s5173_s4] ss:$0 sm:$0xff] }
  0x98   : > { %v732_v55 = vsub.s32 0, %v730_v53  ;;  %v759_v41 = vadd.s32 3, %v755_v8 }
  0x99   : > { %v832_v58 = vshrl.u32 %v831_v56, 30 }
  0x9a   : > { %v3479_v57 = vmin.u32 %v732_v55, %v730_v53  ;;  %v760_v46 = vand.u32 3, %v759_v41 }
  0x9b   : > { %v833_v60 = vshll.u32 %v832_v58, 30  ;;  %v856_v39 = vsub.s32 4, %v832_v58 }
  0x9c   : > { %v734_v59 = vclz %v3479_v57  ;;  %vm765_vm2 = vcmp.eq.s32.totalorder %v760_v46, 2  ;;  %vm762_vm3 = vcmp.eq.s32.totalorder %v760_v46, 0  ;;  %vm761_vm4 = vcmp.lt.s32.totalorder %v760_v46, 2  ;;  %v4645_v46 = vld [vmem:[%s5176_s7] sm:$0x3] }
  0x9d   : > { %v834_v62 = vsub.s32 %v830_v54, %v833_v60  ;;  %v857_v44 = vsel %vm772_vm0, %v856_v39, %v832_v58 }
  0x9e   : > { %v3480_v61 = vadd.s32 4294967294, %v734_v59  ;;  %v859_v47 = vsel %vm771_vm1, 0, %v857_v44  ;;  %v4262_v44 = vmov 0.0  }
  0x9f   : > { %v836_v0 = vsub.s32 0, %v834_v62  ;;  %v863_v51 = vadd.s32 3, %v859_v47  ;;  %3706 = vmatprep.subr.bf16.mxu0 %v4262_v44  ;;  %3708 = vmatprep.mubr.msk.bf16.mxu0 %vm4263_vm11, %v4262_v44 }
  0xa0   : > { %vm3481_vm12 = vcmp.lt.s32.totalorder %v3480_v61, 0 }
  0xa1   : > { %v737_v28 = vsel %vm3481_vm12, 0, %v3480_v61  ;;  %v3483_v4 = vmin.u32 %v836_v0, %v834_v62  ;;  %v864_v55 = vand.u32 3, %v863_v51  ;;  %vm1021_vm12 = vcmask 97280  }
  0xa2   : > { %v738_v1 = vsub.s32 32, %v737_v28  ;;  %v739_v2 = vshll.u32 %v730_v53, %v737_v28  ;;  %v742_v3 = vsub.s32 4294967266, %v737_v28  ;;  %v644_v53 = vld [vmem:[%s4514_s18] sm:$0xff] }
  0xa3   : > { %v838_v11 = vclz %v3483_v4  ;;  %vm869_vm7 = vcmp.eq.s32.totalorder %v864_v55, 2  ;;  %vm866_vm8 = vcmp.eq.s32.totalorder %v864_v55, 0  ;;  %vm865_vm9 = vcmp.lt.s32.totalorder %v864_v55, 2 }
  0xa4   : > { %v740_v5 = vshrl.u32 %v722_v63, %v738_v1  ;;  %v743_v9 = vadd.s32 127, %v742_v3  ;;  %v645_v63 = vld [vmem:[%s4514_s18 + $0x8] sm:$0xff]  ;;  %s5248_s18 = sld [smem:[#allocation17_spill]] }
  0xa5   : > { %v3484_v16 = vadd.s32 4294967294, %v838_v11 }
  0xa6   : > { %v741_v14 = vor.u32 %v740_v5, %v739_v2  ;;  %v744_v15 = vshll.u32 %v743_v9, 23 }
  0xa7   : > { %vm3485_vm13 = vcmp.lt.s32.totalorder %v3484_v16, 0 }
  0xa8   : > { %v745_v17 = vor.u32 4788187, %v744_v15  ;;  %v748_v18 = vcvt.s32.f32 %v741_v14  ;;  %v841_v12 = vsel %vm3485_vm13, 0, %v3484_v16  ;;  %vm1071_vm13 = vcmask 130048  }
  0xa9   : > { %v842_v13 = vsub.s32 32, %v841_v12  ;;  %v843_v22 = vshll.u32 %v834_v62, %v841_v12  ;;  %v846_v23 = vsub.s32 4294967266, %v841_v12  ;;  %v3927_v12 = vld [vmem:[#allocation5 + $0x14] ss:$8 sps:$4 sm:$0xff]  }
  0xaa   : > { %v746_v20 = vand.u32 2147483647, %v745_v17  ;;  %p5252_p7 = scmp.ne.s32.totalorder %s5248_s18, 0 }
  0xab   : > { %v844_v26 = vshrl.u32 %v826_v19, %v842_v13  ;;  %v847_v29 = vadd.s32 127, %v846_v23  ;;  %v3924_v19 = vld [vmem:[#allocation5 + $0x24] ss:$8 sps:$4 sm:$0xff]   ;;  %v3929_v13 = vld [vmem:[#allocation5 + $0x10] ss:$8 sps:$4 sm:$0xff]  }
  0xac   : > { %v749_v24 = vmul.f32 %v748_v18, %v746_v20  ;;  %v3926_v20 = vld [vmem:[#allocation5 + $0x20] ss:$8 sps:$4 sm:$0xff]   ;;  %984 = vmatprep.subr.bf16.mxu1 %v3924_v19  ;;  %v3930_v23 = vld [vmem:[#allocation5 + $0x4] ss:$8 sps:$4 sm:$0xff]  }
  0xad   : > { %v845_v27 = vor.u32 %v844_v26, %v843_v22  ;;  %v848_v32 = vshll.u32 %v847_v29, 23  ;;  %985 = vmatpush1.bf16.msra.mxu1 %v3926_v20  ;;  %v4261_v22 = vmov 0  }
  0xae   : > { %v750_v31 = vxor.u32 2147483648, %v749_v24  ;;  %1006 = vmatprep.mubr.bf16.mxu1 %v4261_v22  ;;  %986 = vmatprep.subr.bf16.mxu1 %v3927_v12 }
  0xaf   : > { %v849_v35 = vor.u32 4788187, %v848_v32  ;;  %v852_v36 = vcvt.s32.f32 %v845_v27 }
  0xb0   : > { %v751_v21 = vsel %vm668_vm14, %v750_v31, %v749_v24  ;;  %v3932_v24 = vld [vmem:[#allocation5] ss:$8 sps:$4 sm:$0xff]   ;;  %vm1280_vm14 = vcmask 1045504  }
  0xb1   : > { %v754_v34 = vsel %vm4598_vm15, %v4535_v6, %v751_v21  ;;  %v850_v37 = vand.u32 2147483647, %v849_v35  ;;  %987 = vmatpush1.bf16.msra.mxu1 %v3929_v13  ;;  %vm1459_vm15 = vcmask 64512  }
  0xb2   : > { %3992 = vcosq.f32 %v754_v34  ;;  %988 = vmatprep.subr.bf16.mxu1 %v3930_v23 }
  0xb3   : > { %3994 = vsinq.f32 %v754_v34  ;;  %v853_v38 = vmul.f32 %v852_v36, %v850_v37  ;;  %v3487_v37 = vld [vmem:[%s5174_s5] ss:$0 sm:$0xff] }
  0xb5   : > { %v854_v42 = vxor.u32 2147483648, %v853_v38  ;;  %989 = vmatpush1.bf16.msra.mxu1 %v3932_v24 }
  0xb6   : > { %3682 = vmatprep.subr.bf16.mxu1 %v4262_v44 }
  0xb7   : > { %v855_v43 = vsel %vm772_vm0, %v854_v42, %v853_v38  ;;  %v931_v42 = vlaneseq  ;;  %vm2028_vm0 = vcmask 523264  }
  0xb8   : > { %v858_v45 = vsel %vm771_vm1, %v4537_v7, %v855_v43 }
  0xb9   : > { %3996 = vcosq.f32 %v858_v45  ;;  %v4635_v43 = vshrl.u32 %v931_v42, 7 }
  0xba   : > { %3998 = vsinq.f32 %v858_v45 }
  0xbb   : > { %v4640_v45 = vsub.s32 0, %v4635_v43 }
  0xbf   : > { %v3993_v48 = vpop.eup %3992 }
  0xc0   : > { %v3995_v49 = vpop.eup %3994  ;;  %v766_v50 = vxor.u32 2147483648, %v3993_v48 }
  0xc1   : > { %v763_v52 = vxor.u32 2147483648, %v3995_v49 }
  0xc2   : > { %v767_v10 = vsel %vm765_vm2, %v766_v50, %v3995_v49 }
  0xc3   : > { %v764_v40 = vsel %vm762_vm3, %v3993_v48, %v763_v52  ;;  %v934_v48 = vrot.slane %v4645_v46, %v4640_v45 }
  0xc4   : > { %v768_v54 = vsel %vm761_vm4, %v764_v40, %v767_v10 }
  0xc5   : > { %v769_v56 = vsel %vm758_vm5, nan, %v768_v54 }
  0xc6   : > { %v4613_v57 = vadd.f32 %v769_v56, %v644_v53  ;;  %v3997_v58 = vpop.eup %3996 }
  0xc7   : > { %v3999_v60 = vpop.eup %3998  ;;  %v870_v61 = vxor.u32 2147483648, %v3997_v58 }
  0xc8   : > { %v879_v59 = vsel %vm878_vm6, %v4613_v57, 0.0  ;;  %v867_v6 = vxor.u32 2147483648, %v3999_v60 }
  0xc9   : > { %880 = vadd.xlane.f32.xlu0 %v879_v59  ;;  %v871_v62 = vsel %vm869_vm7, %v870_v61, %v3999_v60 }
  0xca   : > { %v868_v28 = vsel %vm866_vm8, %v3997_v58, %v867_v6 }
  0xcb   : > { %v872_v0 = vsel %vm865_vm9, %v868_v28, %v871_v62 }
  0xcc   : > { %v873_v1 = vsel %vm862_vm10, nan, %v872_v0 }
  0xcd   : > { %v4619_v2 = vadd.f32 %v873_v1, %v645_v63 }
  0xcf   : > { %v882_v3 = vsel %vm878_vm6, %v4619_v2, 0.0 }
  0xd0   : > { %883 = vadd.xlane.f32.xlu0 %v882_v3 }
 0x152   : > { %v881_v4 = vpop.xlane.xlu0 %880 }
 0x153   : > { %v886_v5 = vmul.f32 0.020833334, %v881_v4 }
 0x155   : > { %v888_v9 = vsub.f32 %v4613_v57, %v886_v5 }
 0x157   : > { %v890_v11 = vmul.f32 %v888_v9, %v888_v9 }
 0x159   : > { %v892_v14 = vsel %vm878_vm6, %v890_v11, 0.0  ;;  %v884_v7 = vpop.xlane.xlu0 %883 }
 0x15a   : > { %893 = vadd.xlane.f32.xlu1 %v892_v14  ;;  %v887_v15 = vmul.f32 0.020833334, %v884_v7 }
 0x15c   : > { %v889_v16 = vsub.f32 %v4619_v2, %v887_v15 }
 0x15e   : > { %v891_v17 = vmul.f32 %v889_v16, %v889_v16 }
 0x160   : > { %v895_v18 = vsel %vm878_vm6, %v891_v17, 0.0 }
 0x161   : > { %896 = vadd.xlane.f32.xlu1 %v895_v18 }
 0x1e3   : > { %v894_v25 = vpop.xlane.xlu1 %893 }
 0x1e4   : > { %v898_v26 = vmul.f32 0.020833334, %v894_v25 }
 0x1e6   : > { %v900_v29 = vadd.f32 1e-05, %v898_v26 }
 0x1e8   : > { %4000 = vrsqrt.f32 %v900_v29 }
 0x1ea   : > { %v897_v30 = vpop.xlane.xlu1 %896 }
 0x1eb   : > { %v899_v31 = vmul.f32 0.020833334, %v897_v30 }
 0x1ed   : > { %v901_v27 = vadd.f32 1e-05, %v899_v31 }
 0x1ef   : > { %4002 = vrsqrt.f32 %v901_v27 }
 0x1f5   : > { %v4001_v32 = vpop.eup %4000 }
 0x1f6   : > { %v904_v21 = vmul.f32 %v4001_v32, %v888_v9 }
 0x1f8   : > { %v912_v36 = vmul.f32 %v3486_v33, %v904_v21 }
 0x1fa   : > { %v920_v38 = vadd.f32 %v3487_v37, %v912_v36 }
 0x1fc   : > { %v4003_v34 = vpop.eup %4002 }
 0x1fd   : > { %v905_v35 = vmul.f32 %v4003_v34, %v889_v16 }
 0x1ff   : > { %v913_v8 = vmul.f32 %v3486_v33, %v905_v35 }
 0x201   : > { %v921_v39 = vadd.f32 %v3487_v37, %v913_v8 }
 0x203   : > { %v928_v41 = vpack.c.bf16 %v921_v39, %v920_v38 }
 0x205   : > { %3494 = vmatmul.mubr.msk.bf16.vlgmr.msra.gmra.mxu1 %vm878_vm6, %v928_v41 }
 0x206   : > { %3684 = vmatprep.mubr.msk.bf16.mxu1 %vm4263_vm11, %v4262_v44 }
 0x2c5   : > { %v1008_v47 = vpop.f32.mrf.mxu1 }
 0x2c6   : > { %v1009_v51 = vadd.f32 %v1008_v47, %v934_v48 }
 0x2c7   : > { %v4653_v49 = vpop.f32.mrf.mxu1 }
 0x2c9   : > { %v1012_v50 = vpop.f32.mrf.mxu1 }
 0x2ca   : > { %v1013_v52 = vadd.f32 %v1012_v50, %v934_v48 }
 0x2cb   : > { %v4669_v54 = vpop.f32.mrf.mxu1 }
 0x2cc   : > { %v4655_v10 = vpack.c.bf16 %v1013_v52, %v1009_v51 }
 0x2ce   : > { %1019 = vrot.lane.b32.xlu0 %v4655_v10, %s4264_s25 }
 0x2d2   : > { %1147 = vrot.lane.b32.xlu0 %v4655_v10, %s4265_s2 }
 0x2d6   : > { %1145 = vrot.lane.b32.xlu0 %v4655_v10, %s4266_s24 }
 0x340   : > { %v1020_v53 = vpop.permute.xlu0 %1019 }
 0x341   : > { %v1026_v40 = vsel %vm1021_vm12, %v1020_v53, 0 }
 0x342   : > { %3683 = vmatpush3.bf16.xpose.msra.mxu1 %v1026_v40 }
 0x343   : > { %3688 = vmatprep.subr.bf16.mxu1 %v4262_v44 }
 0x344   : > { %v1148_v12 = vpop.permute.xlu0 %1147 }
 0x345   : > { %v1153_v23 = vsel %vm1021_vm12, %v1148_v12, 0 }
 0x348   : > { %v1146_v24 = vpop.permute.xlu0 %1145 }
 0x349   : > { %3685 = vmatmul.mubr.msk.bf16.vlgmr.msra.gmra.mxu1 %vm1021_vm12, %v4655_v10 }
 0x34a   : > { %3690 = vmatprep.mubr.msk.bf16.mxu1 %vm4263_vm11, %v4262_v44 }
 0x409   : > { %v1062_v55 = vpop.f32.mrf.mxu1 }
 0x40a   : > { %v1069_v56 = vmul.f32 0.28867513, %v1062_v55 }
 0x40b   : > { %v3686_v58 = vpop.f32.mrf.mxu1 }
 0x40c   : > { %v1072_v59 = vsel %vm1071_vm13, %v1069_v56, -inf  ;;  %v3933_v58 = vld [vmem:[%s5177_s8] sm:$0x3f]  }
 0x40d   : > { %1073 = vmax.xlane.f32.xlu1 %v1072_v59  ;;  %v1065_v60 = vpop.f32.mrf.mxu1 }
 0x40e   : > { %v1070_v61 = vmul.f32 0.28867513, %v1065_v60 }
 0x40f   : > { %v3687_v6 = vpop.f32.mrf.mxu1 }
 0x410   : > { %v1075_v62 = vsel %vm1071_vm13, %v1070_v61, -inf }
 0x411   : > { %1076 = vmax.xlane.f32.xlu1 %v1075_v62  ;;  %v1334_v62 = vsel %vm1280_vm14, %v3933_v58, 0 }
 0x496   : > { %v1074_v63 = vpop.xlane.xlu1 %1073 }
 0x497   : > { %v1078_v28 = vsub.f32 %v1069_v56, %v1074_v63  ;;  %v3934_v63 = vld [vmem:[%s5177_s8 + $0x4] sm:$0xfc]  }
 0x499   : > { %v1080_v0 = vmul.f32 1.442695, %v1078_v28  ;;  %v1276_v28 = vrot.slane %v3934_v63, 2 }
 0x49a   : > { %v1077_v1 = vpop.xlane.xlu1 %1076 }
 0x49b   : > { %4004 = vpow2.f32 %v1080_v0  ;;  %v1079_v3 = vsub.f32 %v1070_v61, %v1077_v1  ;;  %v1282_v0 = vsel %vm1280_vm14, %v1276_v28, 0 }
 0x49c   : > { %3707 = vmatpush3.bf16.msra.mxu0 %v1282_v0 }
 0x49d   : > { %v1082_v4 = vmul.f32 1.442695, %v1079_v3  ;;  %3718 = vmatprep.subr.bf16.mxu0 %v4262_v44 }
 0x49f   : > { %4006 = vpow2.f32 %v1082_v4 }
 0x4a8   : > { %v4005_v5 = vpop.eup %4004 }
 0x4a9   : > { %v1084_v9 = vsel %vm1071_vm13, %v4005_v5, 0.0 }
 0x4aa   : > { %1085 = vadd.xlane.f32.xlu1 %v1084_v9 }
 0x4ac   : > { %v4007_v11 = vpop.eup %4006 }
 0x4ad   : > { %v1087_v14 = vsel %vm1071_vm13, %v4007_v11, 0.0 }
 0x4ae   : > { %1088 = vadd.xlane.f32.xlu1 %v1087_v14 }
 0x4bf   : > { %1095 = vrot.lane.b32.xlu1 %v4655_v10, %s4267_s19 }
 0x533   : > { %v1086_v7 = vpop.xlane.xlu1 %1085 }
 0x534   : > { %4008 = vrcp.f32 %v1086_v7 }
 0x537   : > { %v1089_v15 = vpop.xlane.xlu1 %1088 }
 0x538   : > { %4010 = vrcp.f32 %v1089_v15 }
 0x53b   : > { %v1096_v16 = vpop.permute.xlu1 %1095 }
 0x53c   : > { %3689 = vmatpush3.bf16.msra.mxu1 %v1096_v16 }
 0x53d   : > { %3694 = vmatprep.subr.bf16.mxu1 %v4262_v44 }
 0x541   : > { %v4009_v17 = vpop.eup %4008 }
 0x542   : > { %v1092_v19 = vmul.f32 %v4009_v17, %v4005_v5 }
 0x545   : > { %v4011_v18 = vpop.eup %4010 }
 0x546   : > { %v1093_v20 = vmul.f32 %v4011_v18, %v4007_v11 }
 0x548   : > { %v1094_v13 = vpack.c.bf16 %v1093_v20, %v1092_v19 }
 0x54a   : > { %3691 = vmatmul.mubr.msk.bf16.vlgmr.msra.gmra.mxu1 %vm1071_vm13, %v1094_v13 }
 0x54b   : > { %3695 = vmatpush3.bf16.xpose.msra.mxu1 %v1153_v23  ;;  %3696 = vmatprep.mubr.msk.bf16.mxu1 %vm4263_vm11, %v4262_v44 }
 0x54c   : > { %3700 = vmatprep.subr.bf16.mxu1 %v4262_v44 }
 0x552   : > { %3697 = vmatmul.mubr.msk.bf16.vlgmr.msra.gmra.mxu1 %vm1021_vm12, %v1146_v24 }
 0x553   : > { %3702 = vmatprep.mubr.msk.bf16.mxu1 %vm4263_vm11, %v4262_v44 }
 0x60a   : > { %v1135_v25 = vpop.f32.mrf.mxu1 }
 0x60c   : > { %v3692_v26 = vpop.f32.mrf.mxu1 }
 0x60e   : > { %v1138_v29 = vpop.f32.mrf.mxu1 }
 0x60f   : > { %v1142_v30 = vpack.c.bf16 %v1138_v29, %v1135_v25 }
 0x610   : > { %v3693_v31 = vpop.f32.mrf.mxu1 }
 0x612   : > { %v1189_v27 = vpop.f32.mrf.mxu1 }
 0x613   : > { %v1196_v32 = vmul.f32 0.28867513, %v1189_v27 }
 0x614   : > { %v3698_v21 = vpop.f32.mrf.mxu1 }
 0x615   : > { %v1198_v33 = vsel %vm1071_vm13, %v1196_v32, -inf }
 0x616   : > { %1199 = vmax.xlane.f32.xlu0 %v1198_v33  ;;  %v1192_v34 = vpop.f32.mrf.mxu1 }
 0x617   : > { %v1197_v35 = vmul.f32 0.28867513, %v1192_v34 }
 0x618   : > { %v3699_v36 = vpop.f32.mrf.mxu1 }
 0x619   : > { %v1201_v37 = vsel %vm1071_vm13, %v1197_v35, -inf }
 0x61a   : > { %1202 = vmax.xlane.f32.xlu1 %v1201_v37 }
 0x62b   : > { %1380 = vrot.lane.b32.xlu1 %v4655_v10, %s4268_s1 }
 0x62f   : > { %1378 = vrot.lane.b32.xlu1 %v4655_v10, %s5210_s23 }
 0x69f   : > { %v1200_v8 = vpop.xlane.xlu0 %1199 }
 0x6a0   : > { %v1204_v38 = vsub.f32 %v1196_v32, %v1200_v8 }
 0x6a2   : > { %v1206_v39 = vmul.f32 1.442695, %v1204_v38 }
 0x6a3   : > { %v1203_v41 = vpop.xlane.xlu1 %1202 }
 0x6a4   : > { %4012 = vpow2.f32 %v1206_v39  ;;  %v1205_v42 = vsub.f32 %v1197_v35, %v1203_v41  ;;  %v4740_v41 = vsub.s32 1, %v4635_v43 }
 0x6a6   : > { %v1208_v47 = vmul.f32 1.442695, %v1205_v42 }
 0x6a7   : > { %v1381_v4 = vpop.permute.xlu1 %1380 }
 0x6a8   : > { %4014 = vpow2.f32 %v1208_v47  ;;  %v1386_v14 = vsel %vm1021_vm12, %v1381_v4, 0 }
 0x6ab   : > { %v1379_v17 = vpop.permute.xlu1 %1378 }
 0x6b1   : > { %v4013_v48 = vpop.eup %4012 }
 0x6b2   : > { %v1210_v50 = vsel %vm1071_vm13, %v4013_v48, 0.0 }
 0x6b3   : > { %1211 = vadd.xlane.f32.xlu0 %v1210_v50 }
 0x6b5   : > { %v4015_v51 = vpop.eup %4014 }
 0x6b6   : > { %v1213_v52 = vsel %vm1071_vm13, %v4015_v51, 0.0 }
 0x6b7   : > { %1214 = vadd.xlane.f32.xlu0 %v1213_v52 }
 0x6cd   : > { %1221 = vrot.lane.b32.xlu0 %v4655_v10, %s4270_s22 }
 0x73c   : > { %v1212_v53 = vpop.xlane.xlu0 %1211 }
 0x73d   : > { %4016 = vrcp.f32 %v1212_v53 }
 0x740   : > { %v1215_v40 = vpop.xlane.xlu0 %1214 }
 0x741   : > { %4018 = vrcp.f32 %v1215_v40 }
 0x744   : > { %v1222_v55 = vpop.permute.xlu0 %1221 }
 0x745   : > { %3701 = vmatpush3.bf16.msra.mxu1 %v1222_v55 }
 0x746   : > { %3712 = vmatprep.subr.bf16.mxu1 %v4262_v44 }
 0x74a   : > { %v4017_v56 = vpop.eup %4016 }
 0x74b   : > { %v1218_v60 = vmul.f32 %v4017_v56, %v4013_v48 }
 0x74e   : > { %v4019_v59 = vpop.eup %4018 }
 0x74f   : > { %v1219_v61 = vmul.f32 %v4019_v59, %v4015_v51 }
 0x751   : > { %v1220_v6 = vpack.c.bf16 %v1219_v61, %v1218_v60  ;;  %v3935_v60 = vld [vmem:[%s5177_s8 + $0xc] sm:$0x3f]  }
 0x752   : > { %v1518_v61 = vsel %vm1280_vm14, %v3935_v60, 0 }
 0x753   : > { %3703 = vmatmul.mubr.msk.bf16.vlgmr.msra.gmra.mxu1 %vm1071_vm13, %v1220_v6 }
 0x754   : > { %3713 = vmatpush3.bf16.msra.mxu1 %v1334_v62  ;;  %3714 = vmatprep.mubr.msk.bf16.mxu1 %vm4263_vm11, %v4262_v44 }
 0x755   : > { %3724 = vmatprep.subr.bf16.mxu1 %v4262_v44 }
 0x75b   : > { %3715 = vmatmul.mubr.msk.bf16.vlgmr.msra.gmra.mxu1 %vm1021_vm12, %v1142_v30 }
 0x75c   : > { %3726 = vmatprep.mubr.msk.bf16.mxu1 %vm4263_vm11, %v4262_v44 }
 0x813   : > { %v1261_v1 = vpop.f32.mrf.mxu1 }
 0x815   : > { %v3704_v3 = vpop.f32.mrf.mxu1 }
 0x817   : > { %v1264_v5 = vpop.f32.mrf.mxu1 }
 0x818   : > { %v1268_v9 = vpack.c.bf16 %v1264_v5, %v1261_v1 }
 0x819   : > { %v3705_v11 = vpop.f32.mrf.mxu1 }
 0x81a   : > { %3709 = vmatmul.mubr.msk.bf16.vlgmr.msra.gmra.mxu0 %vm1021_vm12, %v1268_v9 }
 0x81b   : > { %3719 = vmatpush3.bf16.xpose.msra.mxu0 %v1386_v14  ;;  %v4715_v7 = vpop.f32.mrf.mxu1  ;;  %3720 = vmatprep.mubr.msk.bf16.mxu0 %vm4263_vm11, %v4262_v44 }
 0x81c   : > { %3730 = vmatprep.subr.bf16.mxu0 %v4262_v44 }
 0x81d   : > { %v3716_v15 = vpop.f32.mrf.mxu1 }
 0x81f   : > { %v4720_v16 = vpop.f32.mrf.mxu1 }
 0x821   : > { %v3717_v18 = vpop.f32.mrf.mxu1 }
 0x822   : > { %3721 = vmatmul.mubr.msk.bf16.vlgmr.msra.gmra.mxu0 %vm1021_vm12, %v1379_v17 }
 0x823   : > { %3732 = vmatprep.mubr.msk.bf16.mxu0 %vm4263_vm11, %v4262_v44  ;;  %3731 = vmatpush3.bf16.msra.mxu0 %v1518_v61 }
 0x824   : > { %3742 = vmatprep.subr.bf16.mxu0 %v4262_v44 }
 0x8da   : > { %v4725_v19 = vpop.f32.mrf.mxu0 }
 0x8dc   : > { %v3710_v20 = vpop.f32.mrf.mxu0 }
 0x8de   : > { %v4727_v12 = vpop.f32.mrf.mxu0 }
 0x8e0   : > { %v3711_v13 = vpop.f32.mrf.mxu0 }
 0x8e2   : > { %v1422_v23 = vpop.f32.mrf.mxu0 }
 0x8e3   : > { %v1429_v24 = vmul.f32 0.28867513, %v1422_v23 }
 0x8e4   : > { %v3722_v25 = vpop.f32.mrf.mxu0 }
 0x8e5   : > { %v1431_v26 = vsel %vm1071_vm13, %v1429_v24, -inf }
 0x8e6   : > { %1432 = vmax.xlane.f32.xlu1 %v1431_v26  ;;  %v1425_v29 = vpop.f32.mrf.mxu0 }
 0x8e7   : > { %v1430_v30 = vmul.f32 0.28867513, %v1425_v29 }
 0x8e8   : > { %v3723_v31 = vpop.f32.mrf.mxu0 }
 0x8e9   : > { %v1434_v27 = vsel %vm1071_vm13, %v1430_v30, -inf }
 0x8ea   : > { %1435 = vmax.xlane.f32.xlu0 %v1434_v27  ;;  %v1371_v27 = vadd.f32 %v4715_v7, %v4725_v19  ;;  %v3936_v7 = vld [vmem:[%s5177_s8 + $0x10] sm:$0xfc]  }
 0x8f7   : > { %1455 = vrot.lane.b32.xlu1 %v4655_v10, %s5208_s27 }
 0x8fb   : > { %1565 = vrot.lane.b32.xlu1 %v4655_v10, %s5207_s20  ;;  %s5246_s20 = smov 92  }
 0x8ff   : > { %1563 = vrot.lane.b32.xlu1 %v4655_v10, %s5206_s26  ;;  %v938_v10 = vrot.slane %v4645_v46, %v4740_v41 }
 0x901   : > { %v1015_v42 = vadd.f32 %v4669_v54, %v938_v10  ;;  %v1011_v47 = vadd.f32 %v4653_v49, %v938_v10 }
 0x903   : > { %v1377_v48 = vpack.c.bf16 %v1015_v42, %v1011_v47 }
 0x96f   : > { %v1433_v32 = vpop.xlane.xlu1 %1432 }
 0x970   : > { %v1437_v21 = vsub.f32 %v1429_v24, %v1433_v32 }
 0x972   : > { %v1439_v33 = vmul.f32 1.442695, %v1437_v21 }
 0x973   : > { %v1436_v34 = vpop.xlane.xlu0 %1435  ;;  %v1456_v52 = vpop.permute.xlu1 %1455 }
 0x974   : > { %4020 = vpow2.f32 %v1439_v33  ;;  %v1438_v35 = vsub.f32 %v1430_v30, %v1436_v34  ;;  %v1374_v34 = vadd.f32 %v4720_v16, %v4727_v12  ;;  %v1694_v16 = vrot.slane %v3936_v7, 2  ;;  %v3952_v7 = vld [vmem:[%s5183_s14 + $0x8] sm:$0xff]  }
 0x976   : > { %v1441_v36 = vmul.f32 1.442695, %v1438_v35  ;;  %v1699_v19 = vsel %vm1280_vm14, %v1694_v16, 0  ;;  %v3953_v16 = vld [vmem:[%s5183_s14] sm:$0xff]  }
 0x977   : > { %v1566_v49 = vpop.permute.xlu1 %1565 }
 0x978   : > { %4022 = vpow2.f32 %v1441_v36  ;;  %v1571_v58 = vsel %vm1021_vm12, %v1566_v49, 0 }
 0x97b   : > { %v1564_v59 = vpop.permute.xlu1 %1563 }
 0x981   : > { %v4021_v37 = vpop.eup %4020 }
 0x982   : > { %v1443_v8 = vsel %vm1071_vm13, %v4021_v37, 0.0 }
 0x983   : > { %1444 = vadd.xlane.f32.xlu0 %v1443_v8 }
 0x985   : > { %v4023_v38 = vpop.eup %4022 }
 0x986   : > { %v1446_v39 = vsel %vm1071_vm13, %v4023_v38, 0.0 }
 0x987   : > { %1447 = vadd.xlane.f32.xlu0 %v1446_v39 }
 0x99d   : > { %1457 = vrot.lane.b32.xlu0 %v1377_v48, %s5208_s27  ;;  %s5245_s27 = smov 44  }
 0xa0c   : > { %v1445_v50 = vpop.xlane.xlu0 %1444 }
 0xa0d   : > { %4024 = vrcp.f32 %v1445_v50 }
 0xa10   : > { %v1448_v51 = vpop.xlane.xlu0 %1447 }
 0xa11   : > { %4026 = vrcp.f32 %v1448_v51 }
 0xa14   : > { %v1458_v53 = vpop.permute.xlu0 %1457 }
 0xa15   : > { %v1460_v43 = vsel %vm1459_vm15, %v1456_v52, %v1458_v53 }
 0xa16   : > { %3725 = vmatpush3.bf16.msra.mxu1 %v1460_v43 }
 0xa17   : > { %3736 = vmatprep.subr.bf16.mxu1 %v4262_v44 }
 0xa1a   : > { %v4025_v46 = vpop.eup %4024 }
 0xa1b   : > { %v1451_v54 = vmul.f32 %v4025_v46, %v4021_v37 }
 0xa1e   : > { %v4027_v40 = vpop.eup %4026 }
 0xa1f   : > { %v1452_v55 = vmul.f32 %v4027_v40, %v4023_v38  ;;  %v3511_v40 = vld [vmem:[%s5178_s9] ss:$0 sm:$0xff] }
 0xa21   : > { %v1453_v56 = vpack.c.bf16 %v1452_v55, %v1451_v54 }
 0xa23   : > { %3727 = vmatmul.mubr.msk.bf16.vlgmr.msra.gmra.mxu1 %vm1071_vm13, %v1453_v56 }
 0xa24   : > { %3737 = vmatpush3.bf16.xpose.msra.mxu1 %v1571_v58  ;;  %3738 = vmatprep.mubr.msk.bf16.mxu1 %vm4263_vm11, %v4262_v44 }
 0xa25   : > { %3748 = vmatprep.subr.bf16.mxu1 %v4262_v44 }
 0xa2b   : > { %3739 = vmatmul.mubr.msk.bf16.vlgmr.msra.gmra.mxu1 %vm1021_vm12, %v1564_v59 }
 0xa2c   : > { %3750 = vmatprep.mubr.msk.bf16.mxu1 %vm4263_vm11, %v4262_v44  ;;  %3749 = vmatpush3.bf16.msra.mxu1 %v1699_v19  ;;  %v3954_v19 = vld [vmem:[%s5183_s14 + $0x58] sm:$0xff]  }
 0xa2d   : > { %2032 = vmatprep.subr.bf16.mxu1 %v4261_v22 }
 0xae3   : > { %v1499_v6 = vpop.f32.mrf.mxu1 }
 0xae5   : > { %v3728_v62 = vpop.f32.mrf.mxu1 }
 0xae7   : > { %v1502_v63 = vpop.f32.mrf.mxu1 }
 0xae8   : > { %v1506_v28 = vpack.c.bf16 %v1502_v63, %v1499_v6 }
 0xae9   : > { %v3729_v0 = vpop.f32.mrf.mxu1 }
 0xaea   : > { %3733 = vmatmul.mubr.msk.bf16.vlgmr.msra.gmra.mxu0 %vm1021_vm12, %v1506_v28 }
 0xaeb   : > { %v1607_v1 = vpop.f32.mrf.mxu1  ;;  %3744 = vmatprep.mubr.msk.bf16.mxu0 %vm4263_vm11, %v4262_v44 }
 0xaec   : > { %v1614_v3 = vmul.f32 0.28867513, %v1607_v1 }
 0xaed   : > { %v3740_v4 = vpop.f32.mrf.mxu1 }
 0xaee   : > { %v1616_v5 = vsel %vm1071_vm13, %v1614_v3, -inf }
 0xaef   : > { %1617 = vmax.xlane.f32.xlu1 %v1616_v5  ;;  %v1610_v9 = vpop.f32.mrf.mxu1 }
 0xaf0   : > { %v1615_v11 = vmul.f32 0.28867513, %v1610_v9 }
 0xaf1   : > { %v3741_v14 = vpop.f32.mrf.mxu1 }
 0xaf2   : > { %v1619_v15 = vsel %vm1071_vm13, %v1615_v11, -inf  ;;  %v3937_v14 = vld [vmem:[#allocation7 + $0x20] ss:$8 sps:$4 sm:$0xff]  }
 0xaf3   : > { %1620 = vmax.xlane.f32.xlu0 %v1619_v15  ;;  %v3942_v15 = vld [vmem:[#allocation7 + $0x14] ss:$8 sps:$4 sm:$0xff]  }
 0xb00   : > { %1639 = vrot.lane.b32.xlu1 %v1377_v48, %s5205_s21  ;;  %s5247_s21 = smov 124  }
 0xb78   : > { %v1618_v17 = vpop.xlane.xlu1 %1617 }
 0xb79   : > { %v1622_v18 = vsub.f32 %v1614_v3, %v1618_v17  ;;  %v3940_v17 = vld [vmem:[#allocation7 + $0x10] ss:$8 sps:$4 sm:$0xff]  }
 0xb7b   : > { %v1624_v20 = vmul.f32 1.442695, %v1622_v18  ;;  %v3945_v18 = vld [vmem:[#allocation7 + $0x4] ss:$8 sps:$4 sm:$0xff]  }
 0xb7c   : > { %v1640_v13 = vpop.permute.xlu1 %1639  ;;  %v1621_v23 = vpop.xlane.xlu0 %1620 }
 0xb7d   : > { %4028 = vpow2.f32 %v1624_v20  ;;  %v1623_v24 = vsub.f32 %v1615_v11, %v1621_v23  ;;  %3743 = vmatpush3.bf16.msra.mxu0 %v1640_v13  ;;  %v3939_v11 = vld [vmem:[#allocation7 + $0x24] ss:$8 sps:$4 sm:$0xff]   ;;  %v3943_v20 = vld [vmem:[#allocation7] ss:$8 sps:$4 sm:$0xff]   ;;  %v3946_v13 = vld [vmem:[%s5183_s14 + $0x38] sm:$0xff]  }
 0xb7e   : > { %1861 = vmatprep.subr.bf16.mxu0 %v3939_v11  ;;  %v3947_v23 = vld [vmem:[%s5183_s14 + $0x30] sm:$0xff]  }
 0xb7f   : > { %v1626_v25 = vmul.f32 1.442695, %v1623_v24 }
 0xb81   : > { %4030 = vpow2.f32 %v1626_v25 }
 0xb8a   : > { %v4029_v26 = vpop.eup %4028 }
 0xb8b   : > { %v1628_v29 = vsel %vm1071_vm13, %v4029_v26, 0.0 }
 0xb8c   : > { %1629 = vadd.xlane.f32.xlu0 %v1628_v29 }
 0xb8e   : > { %v4031_v30 = vpop.eup %4030 }
 0xb8f   : > { %v1631_v31 = vsel %vm1071_vm13, %v4031_v30, 0.0 }
 0xb90   : > { %1632 = vadd.xlane.f32.xlu0 %v1631_v31 }
 0xbaa   : > { %v1554_v32 = vpop.f32.mrf.mxu0 }
 0xbab   : > { %v1561_v21 = vadd.f32 %v1554_v32, %v1371_v27 }
 0xbac   : > { %v3734_v33 = vpop.f32.mrf.mxu0 }
 0xbae   : > { %v1557_v35 = vpop.f32.mrf.mxu0 }
 0xbaf   : > { %v1562_v36 = vadd.f32 %v1557_v35, %v1374_v34 }
 0xbb0   : > { %v3735_v37 = vpop.f32.mrf.mxu0 }
 0xc15   : > { %v1630_v8 = vpop.xlane.xlu0 %1629 }
 0xc16   : > { %4032 = vrcp.f32 %v1630_v8 }
 0xc19   : > { %v1633_v38 = vpop.xlane.xlu0 %1632 }
 0xc1a   : > { %4034 = vrcp.f32 %v1633_v38 }
 0xc23   : > { %v4033_v39 = vpop.eup %4032 }
 0xc24   : > { %v1636_v42 = vmul.f32 %v4033_v39, %v4029_v26 }
 0xc27   : > { %v4035_v10 = vpop.eup %4034 }
 0xc28   : > { %v1637_v47 = vmul.f32 %v4035_v10, %v4031_v30  ;;  %v3948_v10 = vld [vmem:[%s5183_s14 + $0x28] sm:$0xff]  }
 0xc2a   : > { %v1638_v48 = vpack.c.bf16 %v1637_v47, %v1636_v42  ;;  %v3949_v42 = vld [vmem:[%s5183_s14 + $0x20] sm:$0xff]   ;;  %v3950_v47 = vld [vmem:[%s5183_s14 + $0x18] sm:$0xff]  }
 0xc2c   : > { %3745 = vmatmul.mubr.msk.bf16.vlgmr.msra.gmra.mxu0 %vm1071_vm13, %v1638_v48  ;;  %v3951_v48 = vld [vmem:[%s5183_s14 + $0x10] sm:$0xff]  }
 0xc2d   : > { %1883 = vmatprep.mubr.bf16.mxu0 %v4261_v22  ;;  %1862 = vmatpush1.bf16.msra.mxu0 %v3937_v14 }
 0xc2e   : > { %1863 = vmatprep.subr.bf16.mxu0 %v3942_v15 }
 0xc31   : > { %1864 = vmatpush1.bf16.msra.mxu0 %v3940_v17 }
 0xc32   : > { %1865 = vmatprep.subr.bf16.mxu0 %v3945_v18 }
 0xc35   : > { %1866 = vmatpush1.bf16.msra.mxu0 %v3943_v20 }
 0xcec   : > { %v1679_v12 = vpop.f32.mrf.mxu0 }
 0xcee   : > { %v3746_v50 = vpop.f32.mrf.mxu0 }
 0xcef   : > { %v3956_v50 = vld [vmem:[%s5183_s14 + $0x48] sm:$0xff]  }
 0xcf0   : > { %v1682_v51 = vpop.f32.mrf.mxu0 }
 0xcf1   : > { %v1686_v52 = vpack.c.bf16 %v1682_v51, %v1679_v12  ;;  %v3955_v12 = vld [vmem:[%s5183_s14 + $0x50] sm:$0xff]   ;;  %v3957_v51 = vld [vmem:[%s5183_s14 + $0x40] sm:$0xff]  }
 0xcf2   : > { %v3747_v53 = vpop.f32.mrf.mxu0 }
 0xcf3   : > { %3751 = vmatmul.mubr.msk.bf16.vlgmr.msra.gmra.mxu1 %vm1021_vm12, %v1686_v52  ;;  %v1806_v52 = vld [vmem:[%s5182_s13] sm:$0x3] }
 0xcf4   : > { %2033 = vmatpush1.bf16.msra.mxu1 %v3946_v13  ;;  %v1811_v53 = vrot.slane %v1806_v52, %v4640_v45 }
 0xcf5   : > { %2034 = vmatprep.subr.bf16.mxu1 %v4261_v22 }
 0xcf8   : > { %2035 = vmatpush1.bf16.msra.mxu1 %v3947_v23 }
 0xcf9   : > { %2036 = vmatprep.subr.bf16.mxu1 %v4261_v22 }
 0xcfc   : > { %2037 = vmatpush1.bf16.msra.mxu1 %v3948_v10 }
 0xcfd   : > { %2038 = vmatprep.subr.bf16.mxu1 %v4261_v22 }
 0xd00   : > { %2039 = vmatpush1.bf16.msra.mxu1 %v3949_v42 }
 0xd01   : > { %2040 = vmatprep.subr.bf16.mxu1 %v4261_v22 }
 0xd04   : > { %2041 = vmatpush1.bf16.msra.mxu1 %v3950_v47  ;;  %v3534_v47 = vld [vmem:[%s5184_s15] ss:$0 sm:$0xff] }
 0xd05   : > { %2042 = vmatprep.subr.bf16.mxu1 %v4261_v22 }
 0xd08   : > { %2043 = vmatpush1.bf16.msra.mxu1 %v3951_v48 }
 0xd09   : > { %2044 = vmatprep.subr.bf16.mxu1 %v4261_v22 }
 0xd0c   : > { %2045 = vmatpush1.bf16.msra.mxu1 %v3952_v7 }
 0xd0d   : > { %2046 = vmatprep.subr.bf16.mxu1 %v4261_v22 }
 0xd10   : > { %2047 = vmatpush1.bf16.msra.mxu1 %v3953_v16 }
 0xd11   : > { %2056 = vmatprep.subr.bf16.mxu1 %v4261_v22 }
 0xd14   : > { %2057 = vmatpush2.bf16.msra.mxu1 %v3954_v19 }
 0xd15   : > { %2058 = vmatprep.subr.bf16.mxu1 %v4261_v22 }
 0xd18   : > { %2059 = vmatpush2.bf16.msra.mxu1 %v3955_v12 }
 0xd19   : > { %2060 = vmatprep.subr.bf16.mxu1 %v4261_v22 }
 0xd1c   : > { %2061 = vmatpush2.bf16.msra.mxu1 %v3956_v50 }
 0xd1d   : > { %2062 = vmatprep.subr.bf16.mxu1 %v4261_v22 }
 0xd20   : > { %2063 = vmatpush2.bf16.msra.mxu1 %v3957_v51 }
 0xd21   : > { %3778 = vmatprep.subr.bf16.mxu1 %v4262_v44 }
 0xdb3   : > { %v1735_v43 = vpop.f32.mrf.mxu1 }
 0xdb4   : > { %v1742_v46 = vadd.f32 %v1735_v43, %v1561_v21  ;;  %v3512_v21 = vld [vmem:[%s5179_s10] ss:$0 sm:$0xff]  ;;  %v1815_v43 = vrot.slane %v1806_v52, %v4740_v41 }
 0xdb5   : > { %v3752_v54 = vpop.f32.mrf.mxu1 }
 0xdb6   : > { %v1744_v55 = vadd.f32 %v1742_v46, %v4613_v57 }
 0xdb7   : > { %v1738_v49 = vpop.f32.mrf.mxu1 }
 0xdb8   : > { %v4786_v56 = vadd.f32 %v3511_v40, %v1744_v55  ;;  %v1743_v58 = vadd.f32 %v1738_v49, %v1562_v36  ;;  %v3513_v36 = vld [vmem:[%s5180_s11] ss:$0 sm:$0xff] }
 0xdb9   : > { %v3753_v59 = vpop.f32.mrf.mxu1 }
 0xdba   : > { %v1745_v60 = vadd.f32 %v1743_v58, %v4619_v2  ;;  %v1757_v61 = vsel %vm878_vm6, %v4786_v56, 0.0 }
 0xdbb   : > { %1758 = vadd.xlane.f32.xlu0 %v1757_v61 }
 0xdbc   : > { %v4791_v6 = vadd.f32 %v3511_v40, %v1745_v60 }
 0xdbe   : > { %v1760_v62 = vsel %vm878_vm6, %v4791_v6, 0.0 }
 0xdbf   : > { %1761 = vadd.xlane.f32.xlu0 %v1760_v62 }
 0xe44   : > { %v1759_v63 = vpop.xlane.xlu0 %1758 }
 0xe45   : > { %v1763_v28 = vmul.f32 0.020833334, %v1759_v63 }
 0xe47   : > { %v1765_v57 = vsub.f32 %v4786_v56, %v1763_v28 }
 0xe48   : > { %v1762_v0 = vpop.xlane.xlu0 %1761 }
 0xe49   : > { %v1764_v1 = vmul.f32 0.020833334, %v1762_v0  ;;  %v1767_v3 = vmul.f32 %v1765_v57, %v1765_v57 }
 0xe4b   : > { %v1766_v4 = vsub.f32 %v4791_v6, %v1764_v1  ;;  %v1769_v2 = vsel %vm878_vm6, %v1767_v3, 0.0 }
 0xe4c   : > { %1770 = vadd.xlane.f32.xlu0 %v1769_v2 }
 0xe4d   : > { %v1768_v5 = vmul.f32 %v1766_v4, %v1766_v4 }
 0xe4f   : > { %v1772_v9 = vsel %vm878_vm6, %v1768_v5, 0.0 }
 0xe50   : > { %1773 = vadd.xlane.f32.xlu0 %v1772_v9 }
 0xed5   : > { %v1771_v24 = vpop.xlane.xlu0 %1770 }
 0xed6   : > { %v1775_v25 = vmul.f32 0.020833334, %v1771_v24 }
 0xed8   : > { %v1777_v26 = vadd.f32 1e-05, %v1775_v25 }
 0xed9   : > { %v1774_v29 = vpop.xlane.xlu0 %1773 }
 0xeda   : > { %4036 = vrsqrt.f32 %v1777_v26  ;;  %v1776_v30 = vmul.f32 0.020833334, %v1774_v29 }
 0xedc   : > { %v1778_v31 = vadd.f32 1e-05, %v1776_v30 }
 0xede   : > { %4038 = vrsqrt.f32 %v1778_v31 }
 0xee7   : > { %v4037_v27 = vpop.eup %4036 }
 0xee8   : > { %v1781_v32 = vmul.f32 %v4037_v27, %v1765_v57 }
 0xeea   : > { %v1789_v35 = vmul.f32 %v3512_v21, %v1781_v32 }
 0xeeb   : > { %v4039_v33 = vpop.eup %4038 }
 0xeec   : > { %v1782_v34 = vmul.f32 %v4039_v33, %v1766_v4  ;;  %v1797_v8 = vadd.f32 %v3513_v36, %v1789_v35 }
 0xeee   : > { %v1790_v37 = vmul.f32 %v3512_v21, %v1782_v34 }
 0xef0   : > { %v1798_v38 = vadd.f32 %v3513_v36, %v1790_v37 }
 0xef2   : > { %v1805_v39 = vpack.c.bf16 %v1798_v38, %v1797_v8 }
 0xef4   : > { %3520 = vmatmul.mubr.msk.bf16.vlgmr.msra.gmra.mxu0 %vm878_vm6, %v1805_v39 }
 0xef5   : > { %2216 = vmatprep.mubr.bf16.mxu0 %v4261_v22 }
 0xfb4   : > { %v1885_v46 = vpop.f32.mrf.mxu0 }
 0xfb5   : > { %v1886_v40 = vadd.f32 %v1885_v46, %v1811_v53 }
 0xfb6   : > { %v1887_v54 = vpop.f32.mrf.mxu0 }
 0xfb7   : > { %v1898_v55 = vmul.f32 0.044715, %v1886_v40  ;;  %v1888_v49 = vadd.f32 %v1887_v54, %v1815_v43  ;;  %v1894_v35 = vmul.f32 0.5, %v1886_v40 }
 0xfb8   : > { %v1889_v58 = vpop.f32.mrf.mxu0 }
 0xfb9   : > { %v1902_v59 = vmul.f32 %v1898_v55, %v1886_v40  ;;  %v1899_v60 = vmul.f32 0.044715, %v1888_v49  ;;  %v1890_v61 = vadd.f32 %v1889_v58, %v1811_v53  ;;  %v1895_v21 = vmul.f32 0.5, %v1888_v49 }
 0xfba   : > { %v1891_v62 = vpop.f32.mrf.mxu0 }
 0xfbb   : > { %v1906_v63 = vmul.f32 %v1902_v59, %v1886_v40  ;;  %v1903_v28 = vmul.f32 %v1899_v60, %v1888_v49  ;;  %v1900_v57 = vmul.f32 0.044715, %v1890_v61  ;;  %v1892_v0 = vadd.f32 %v1891_v62, %v1815_v43  ;;  %v3960_v60 = vld [vmem:[#allocation5 + $0x54] ss:$8 sps:$4 sm:$0xff]   ;;  %v3963_v62 = vld [vmem:[#allocation5 + $0x44] ss:$8 sps:$4 sm:$0xff]  }
 0xfbc   : > { %v1896_v27 = vmul.f32 0.5, %v1890_v61  ;;  %2194 = vmatprep.subr.bf16.mxu0 %v3960_v60 }
 0xfbd   : > { %v1910_v1 = vadd.f32 %v1906_v63, %v1886_v40  ;;  %v1907_v3 = vmul.f32 %v1903_v28, %v1888_v49  ;;  %v1904_v4 = vmul.f32 %v1900_v57, %v1890_v61  ;;  %v1901_v2 = vmul.f32 0.044715, %v1892_v0  ;;  %v3961_v63 = vld [vmem:[#allocation5 + $0x40] ss:$8 sps:$4 sm:$0xff]   ;;  %v3966_v28 = vld [vmem:[#allocation5 + $0x34] ss:$8 sps:$4 sm:$0xff]  }
 0xfbe   : > { %v1897_v33 = vmul.f32 0.5, %v1892_v0  ;;  %v3964_v57 = vld [vmem:[#allocation5 + $0x30] ss:$8 sps:$4 sm:$0xff]  }
 0xfbf   : > { %v1911_v5 = vadd.f32 %v1907_v3, %v1888_v49  ;;  %v1908_v9 = vmul.f32 %v1904_v4, %v1890_v61  ;;  %v1905_v11 = vmul.f32 %v1901_v2, %v1892_v0  ;;  %v1914_v14 = vmul.f32 0.7978846, %v1910_v1 }
 0xfc1   : > { %v1915_v15 = vmul.f32 0.7978846, %v1911_v5  ;;  %v1912_v17 = vadd.f32 %v1908_v9, %v1890_v61  ;;  %v1909_v18 = vmul.f32 %v1905_v11, %v1892_v0  ;;  %v3958_v61 = vld [vmem:[#allocation5 + $0x50] ss:$8 sps:$4 sm:$0xff]  }
 0xfc2   : > { %2195 = vmatpush1.bf16.msra.mxu0 %v3958_v61 }
 0xfc3   : > { %4040 = vtanh.f32 %v1915_v15  ;;  %v1916_v20 = vmul.f32 0.7978846, %v1912_v17  ;;  %v1913_v13 = vadd.f32 %v1909_v18, %v1892_v0  ;;  %2196 = vmatprep.subr.bf16.mxu0 %v3963_v62 }
 0xfc4   : > { %4042 = vtanh.f32 %v1914_v14  ;;  %v3537_v14 = vld [vmem:[%s5173_s4 + $0x1] ss:$0 sm:$0xff] }
 0xfc5   : > { %4044 = vtanh.f32 %v1916_v20  ;;  %v1917_v23 = vmul.f32 0.7978846, %v1913_v13  ;;  %v3538_v20 = vld [vmem:[%s5174_s5 + $0x1] ss:$0 sm:$0xff] }
 0xfc6   : > { %2197 = vmatpush1.bf16.msra.mxu0 %v3961_v63 }
 0xfc7   : > { %4046 = vtanh.f32 %v1917_v23  ;;  %2198 = vmatprep.subr.bf16.mxu0 %v3966_v28 }
 0xfca   : > { %2199 = vmatpush1.bf16.msra.mxu0 %v3964_v57 }
 0xfcb   : > { %3754 = vmatprep.subr.bf16.mxu0 %v4262_v44 }
 0xfd0   : > { %v4041_v24 = vpop.eup %4040 }
 0xfd1   : > { %v4043_v25 = vpop.eup %4042  ;;  %v1923_v29 = vadd.f32 1.0, %v4041_v24 }
 0xfd2   : > { %v4045_v26 = vpop.eup %4044  ;;  %v1922_v32 = vadd.f32 1.0, %v4043_v25 }
 0xfd3   : > { %v1924_v30 = vadd.f32 1.0, %v4045_v26  ;;  %v1927_v37 = vmul.f32 %v1923_v29, %v1895_v21  ;;  %v4893_v26 = vld [vmem:[%s5176_s7 + $0x2] sm:$0x3] }
 0xfd4   : > { %v4047_v31 = vpop.eup %4046  ;;  %v1926_v38 = vmul.f32 %v1922_v32, %v1894_v35 }
 0xfd5   : > { %v1925_v34 = vadd.f32 1.0, %v4047_v31  ;;  %v1928_v36 = vmul.f32 %v1924_v30, %v1896_v27  ;;  %v2144_v30 = vrot.slane %v4893_v26, %v4640_v45 }
 0xfd7   : > { %v1929_v8 = vmul.f32 %v1925_v34, %v1897_v33  ;;  %v1954_v10 = vpack.c.bf16 %v1928_v36, %v1926_v38 }
 0xfd9   : > { %v1955_v39 = vpack.c.bf16 %v1929_v8, %v1927_v37 }
 0xfdb   : > { %3533 = vmatprep.mubr.msk.bf16.mxu1 %vm2028_vm0, %v1955_v39 }
 0xfdc   : > { %2065 = vmatmul.mubr.bf16.vlgmr.msra.gmra.mxu1 %v1954_v10 }
 0xfdd   : > { %3780 = vmatprep.mubr.msk.bf16.mxu1 %vm4263_vm11, %v4262_v44 }
0x109c   : > { %v2066_v42 = vpop.f32.mrf.mxu1 }
0x109d   : > { %v2073_v48 = vadd.f32 %v2066_v42, %v4786_v56 }
0x109e   : > { %v2068_v7 = vpop.f32.mrf.mxu1 }
0x109f   : > { %v4867_v16 = vadd.f32 %v3534_v47, %v2073_v48 }
0x10a0   : > { %v2069_v19 = vpop.f32.mrf.mxu1 }
0x10a1   : > { %v2074_v12 = vadd.f32 %v2069_v19, %v4791_v6  ;;  %v2088_v50 = vsel %vm878_vm6, %v4867_v16, 0.0 }
0x10a2   : > { %2089 = vadd.xlane.f32.xlu1 %v2088_v50  ;;  %v2071_v51 = vpop.f32.mrf.mxu1 }
0x10a3   : > { %v4872_v52 = vadd.f32 %v3534_v47, %v2074_v12 }
0x10a5   : > { %v2091_v53 = vsel %vm878_vm6, %v4872_v52, 0.0 }
0x10a6   : > { %2092 = vadd.xlane.f32.xlu0 %v2091_v53 }
0x112b   : > { %v2090_v43 = vpop.xlane.xlu1 %2089 }
0x112c   : > { %v2094_v46 = vmul.f32 0.020833334, %v2090_v43 }
0x112e   : > { %v2096_v56 = vsub.f32 %v4867_v16, %v2094_v46 }
0x112f   : > { %v2093_v40 = vpop.xlane.xlu0 %2092 }
0x1130   : > { %v2095_v54 = vmul.f32 0.020833334, %v2093_v40  ;;  %v2098_v55 = vmul.f32 %v2096_v56, %v2096_v56 }
0x1132   : > { %v2097_v6 = vsub.f32 %v4872_v52, %v2095_v54  ;;  %v2100_v49 = vsel %vm878_vm6, %v2098_v55, 0.0 }
0x1133   : > { %2101 = vadd.xlane.f32.xlu0 %v2100_v49 }
0x1134   : > { %v2099_v58 = vmul.f32 %v2097_v6, %v2097_v6 }
0x1136   : > { %v2103_v59 = vsel %vm878_vm6, %v2099_v58, 0.0 }
0x1137   : > { %2104 = vadd.xlane.f32.xlu0 %v2103_v59 }
0x11bc   : > { %v2102_v0 = vpop.xlane.xlu0 %2101 }
0x11bd   : > { %v2106_v1 = vmul.f32 0.020833334, %v2102_v0 }
0x11bf   : > { %v2108_v3 = vadd.f32 1e-05, %v2106_v1 }
0x11c0   : > { %v2105_v4 = vpop.xlane.xlu0 %2104 }
0x11c1   : > { %4048 = vrsqrt.f32 %v2108_v3  ;;  %v2107_v2 = vmul.f32 0.020833334, %v2105_v4 }
0x11c3   : > { %v2109_v5 = vadd.f32 1e-05, %v2107_v2 }
0x11c5   : > { %4050 = vrsqrt.f32 %v2109_v5 }
0x11ce   : > { %v4049_v9 = vpop.eup %4048 }
0x11cf   : > { %v2112_v11 = vmul.f32 %v4049_v9, %v2096_v56 }
0x11d1   : > { %v2120_v18 = vmul.f32 %v3537_v14, %v2112_v11 }
0x11d2   : > { %v4051_v15 = vpop.eup %4050 }
0x11d3   : > { %v2113_v17 = vmul.f32 %v4051_v15, %v2097_v6  ;;  %v2128_v23 = vadd.f32 %v3538_v20, %v2120_v18 }
0x11d5   : > { %v2121_v13 = vmul.f32 %v3537_v14, %v2113_v17 }
0x11d7   : > { %v2129_v24 = vadd.f32 %v3538_v20, %v2121_v13 }
0x11d9   : > { %v2137_v25 = vpack.c.bf16 %v2129_v24, %v2128_v23 }
0x11db   : > { %3546 = vmatmul.mubr.msk.bf16.vlgmr.msra.gmra.mxu0 %vm878_vm6, %v2137_v25 }
0x11dc   : > { %3756 = vmatprep.mubr.msk.bf16.mxu0 %vm4263_vm11, %v4262_v44 }
0x129b   : > { %v2218_v29 = vpop.f32.mrf.mxu0 }
0x129c   : > { %v2219_v32 = vadd.f32 %v2218_v29, %v2144_v30 }
0x129d   : > { %v4897_v31 = vpop.f32.mrf.mxu0 }
0x129f   : > { %v2222_v27 = vpop.f32.mrf.mxu0 }
0x12a0   : > { %v2223_v21 = vadd.f32 %v2222_v27, %v2144_v30 }
0x12a1   : > { %v4909_v36 = vpop.f32.mrf.mxu0 }
0x12a2   : > { %v4899_v33 = vpack.c.bf16 %v2223_v21, %v2219_v32 }
0x12a4   : > { %2229 = vrot.lane.b32.xlu0 %v4899_v33, %s4264_s25  ;;  %s5243_s25 = smov 104  }
0x1316   : > { %v2230_v34 = vpop.permute.xlu0 %2229 }
0x1317   : > { %v2235_v35 = vsel %vm1021_vm12, %v2230_v34, 0 }
0x1318   : > { %3755 = vmatpush3.bf16.xpose.msra.mxu0 %v2235_v35 }
0x1319   : > { %3760 = vmatprep.subr.bf16.mxu0 %v4262_v44 }
0x131f   : > { %3757 = vmatmul.mubr.msk.bf16.vlgmr.msra.gmra.mxu0 %vm1021_vm12, %v4899_v33 }
0x1320   : > { %3762 = vmatprep.mubr.msk.bf16.mxu0 %vm4263_vm11, %v4262_v44 }
0x13df   : > { %v2271_v37 = vpop.f32.mrf.mxu0 }
0x13e0   : > { %v2278_v8 = vmul.f32 0.28867513, %v2271_v37 }
0x13e1   : > { %v3758_v38 = vpop.f32.mrf.mxu0 }
0x13e2   : > { %v2280_v39 = vsel %vm1071_vm13, %v2278_v8, -inf  ;;  %v3967_v38 = vld [vmem:[%s5177_s8 + $0x18] sm:$0x3f]  }
0x13e3   : > { %2281 = vmax.xlane.f32.xlu1 %v2280_v39  ;;  %v2274_v10 = vpop.f32.mrf.mxu0 }
0x13e4   : > { %v2279_v42 = vmul.f32 0.28867513, %v2274_v10 }
0x13e5   : > { %v3759_v47 = vpop.f32.mrf.mxu0 }
0x13e6   : > { %v2283_v48 = vsel %vm1071_vm13, %v2279_v42, -inf }
0x13e7   : > { %2284 = vmax.xlane.f32.xlu0 %v2283_v48  ;;  %v2542_v48 = vsel %vm1280_vm14, %v3967_v38, 0 }
0x13f4   : > { %2303 = vrot.lane.b32.xlu1 %v4899_v33, %s4267_s19 }
0x13fd   : > { %2354 = vrot.lane.b32.xlu0 %v4899_v33, %s4266_s24 }
0x146c   : > { %v2282_v7 = vpop.xlane.xlu1 %2281 }
0x146d   : > { %v2286_v19 = vsub.f32 %v2278_v8, %v2282_v7  ;;  %v3968_v7 = vld [vmem:[%s5177_s8 + $0x1c] sm:$0xfc]  }
0x146f   : > { %v2288_v12 = vmul.f32 1.442695, %v2286_v19  ;;  %v2485_v19 = vrot.slane %v3968_v7, 2 }
0x1470   : > { %v2304_v50 = vpop.permute.xlu1 %2303  ;;  %v2285_v51 = vpop.xlane.xlu0 %2284 }
0x1471   : > { %4052 = vpow2.f32 %v2288_v12  ;;  %v2287_v53 = vsub.f32 %v2279_v42, %v2285_v51  ;;  %3761 = vmatpush3.bf16.msra.mxu0 %v2304_v50  ;;  %v2490_v12 = vsel %vm1280_vm14, %v2485_v19, 0 }
0x1472   : > { %3766 = vmatprep.subr.bf16.mxu0 %v4262_v44  ;;  %3779 = vmatpush3.bf16.msra.mxu1 %v2490_v12 }
0x1473   : > { %v2290_v43 = vmul.f32 1.442695, %v2287_v53  ;;  %3790 = vmatprep.subr.bf16.mxu1 %v4262_v44 }
0x1474   : > { %v2355_v28 = vpop.permute.xlu0 %2354 }
0x1475   : > { %4054 = vpow2.f32 %v2290_v43 }
0x147e   : > { %v4053_v46 = vpop.eup %4052 }
0x147f   : > { %v2292_v56 = vsel %vm1071_vm13, %v4053_v46, 0.0 }
0x1480   : > { %2293 = vadd.xlane.f32.xlu1 %v2292_v56 }
0x1482   : > { %v4055_v40 = vpop.eup %4054 }
0x1483   : > { %v2295_v54 = vsel %vm1071_vm13, %v4055_v40, 0.0 }
0x1484   : > { %2296 = vadd.xlane.f32.xlu1 %v2295_v54 }
0x1495   : > { %2356 = vrot.lane.b32.xlu1 %v4899_v33, %s4265_s2 }
0x1509   : > { %v2294_v55 = vpop.xlane.xlu1 %2293 }
0x150a   : > { %4056 = vrcp.f32 %v2294_v55 }
0x150d   : > { %v2297_v6 = vpop.xlane.xlu1 %2296 }
0x150e   : > { %4058 = vrcp.f32 %v2297_v6 }
0x1511   : > { %v2357_v61 = vpop.permute.xlu1 %2356 }
0x1512   : > { %v2362_v63 = vsel %vm1021_vm12, %v2357_v61, 0 }
0x1517   : > { %v4057_v49 = vpop.eup %4056 }
0x1518   : > { %v2300_v59 = vmul.f32 %v4057_v49, %v4053_v46 }
0x151b   : > { %v4059_v58 = vpop.eup %4058 }
0x151c   : > { %v2301_v60 = vmul.f32 %v4059_v58, %v4055_v40 }
0x151e   : > { %v2302_v62 = vpack.c.bf16 %v2301_v60, %v2300_v59 }
0x1520   : > { %3763 = vmatmul.mubr.msk.bf16.vlgmr.msra.gmra.mxu0 %vm1071_vm13, %v2302_v62 }
0x1521   : > { %3767 = vmatpush3.bf16.xpose.msra.mxu0 %v2362_v63  ;;  %3768 = vmatprep.mubr.msk.bf16.mxu0 %vm4263_vm11, %v4262_v44 }
0x1522   : > { %3772 = vmatprep.subr.bf16.mxu0 %v4262_v44 }
0x1528   : > { %3769 = vmatmul.mubr.msk.bf16.vlgmr.msra.gmra.mxu0 %vm1021_vm12, %v2355_v28 }
0x1529   : > { %3774 = vmatprep.mubr.msk.bf16.mxu0 %vm4263_vm11, %v4262_v44 }
0x15e0   : > { %v2343_v57 = vpop.f32.mrf.mxu0 }
0x15e2   : > { %v3764_v0 = vpop.f32.mrf.mxu0 }
0x15e4   : > { %v2346_v1 = vpop.f32.mrf.mxu0 }
0x15e5   : > { %v2350_v3 = vpack.c.bf16 %v2346_v1, %v2343_v57 }
0x15e6   : > { %v3765_v4 = vpop.f32.mrf.mxu0 }
0x15e8   : > { %v2398_v2 = vpop.f32.mrf.mxu0 }
0x15e9   : > { %v2405_v5 = vmul.f32 0.28867513, %v2398_v2 }
0x15ea   : > { %v3770_v9 = vpop.f32.mrf.mxu0 }
0x15eb   : > { %v2407_v11 = vsel %vm1071_vm13, %v2405_v5, -inf }
0x15ec   : > { %2408 = vmax.xlane.f32.xlu1 %v2407_v11  ;;  %v2401_v14 = vpop.f32.mrf.mxu0 }
0x15ed   : > { %v2406_v15 = vmul.f32 0.28867513, %v2401_v14 }
0x15ee   : > { %v3771_v17 = vpop.f32.mrf.mxu0 }
0x15ef   : > { %v2410_v18 = vsel %vm1071_vm13, %v2406_v15, -inf }
0x15f0   : > { %2411 = vmax.xlane.f32.xlu0 %v2410_v18 }
0x1606   : > { %2588 = vrot.lane.b32.xlu0 %v4899_v33, %s4268_s1 }
0x1675   : > { %v2409_v20 = vpop.xlane.xlu1 %2408 }
0x1676   : > { %v2413_v13 = vsub.f32 %v2405_v5, %v2409_v20 }
0x1678   : > { %v2415_v23 = vmul.f32 1.442695, %v2413_v13 }
0x1679   : > { %v2412_v24 = vpop.xlane.xlu0 %2411 }
0x167a   : > { %4060 = vpow2.f32 %v2415_v23  ;;  %v2414_v25 = vsub.f32 %v2406_v15, %v2412_v24  ;;  %v2148_v24 = vrot.slane %v4893_v26, %v4740_v41 }
0x167c   : > { %v2417_v29 = vmul.f32 1.442695, %v2414_v25  ;;  %v2225_v25 = vadd.f32 %v4909_v36, %v2148_v24 }
0x167d   : > { %v2589_v53 = vpop.permute.xlu0 %2588 }
0x167e   : > { %4062 = vpow2.f32 %v2417_v29  ;;  %v2594_v40 = vsel %vm1021_vm12, %v2589_v53, 0  ;;  %v2221_v29 = vadd.f32 %v4897_v31, %v2148_v24 }
0x1687   : > { %v4061_v30 = vpop.eup %4060 }
0x1688   : > { %v2419_v27 = vsel %vm1071_vm13, %v4061_v30, 0.0 }
0x1689   : > { %2420 = vadd.xlane.f32.xlu1 %v2419_v27 }
0x168b   : > { %v4063_v32 = vpop.eup %4062 }
0x168c   : > { %v2422_v21 = vsel %vm1071_vm13, %v4063_v32, 0.0 }
0x168d   : > { %2423 = vadd.xlane.f32.xlu1 %v2422_v21 }
0x169e   : > { %2430 = vrot.lane.b32.xlu1 %v4899_v33, %s4270_s22  ;;  %s5244_s22 = smov 8  }
0x16a2   : > { %2586 = vrot.lane.b32.xlu1 %v4899_v33, %s5243_s25  ;;  %s5249_s25 = sshll.u32 %s4508_s29, 4 }
0x16a3   : > { %s637_s2 = scalar_lea.vmem [#allocation8], %s5249_s25 }
0x16a4   : > { %s3357_s24 = sshll.u32 %s637_s2, 4  ;;  %s5124_s24 = int_to_ptr.vmem [resolvable:$true] %s3357_s24 }
0x16a5   : > { %s4180_s30 = scalar_lea.vmem %s5124_s24, 256 }
0x16a6   : > { %p4181_p2 = scmp.ne.s32.totalorder %s5124_s24, %s4180_s30 }
0x16a8   : > { %p4182_p12 = pnand %p4181_p2, %p5252_p7 }
0x16aa   : > { %p4183_p13 = pneg %p4182_p12 }
0x1712   : > { %v2421_v34 = vpop.xlane.xlu1 %2420 }
0x1713   : > { %4064 = vrcp.f32 %v2421_v34 }
0x1716   : > { %v2424_v35 = vpop.xlane.xlu1 %2423 }
0x1717   : > { %4066 = vrcp.f32 %v2424_v35 }
0x171a   : > { %v2431_v37 = vpop.permute.xlu1 %2430 }
0x171b   : > { %3773 = vmatpush3.bf16.msra.mxu0 %v2431_v37 }
0x171c   : > { %3784 = vmatprep.subr.bf16.mxu0 %v4262_v44 }
0x171e   : > { %v2587_v49 = vpop.permute.xlu1 %2586 }
0x1720   : > { %v4065_v8 = vpop.eup %4064 }
0x1721   : > { %v2427_v10 = vmul.f32 %v4065_v8, %v4061_v30  ;;  %v2585_v30 = vpack.c.bf16 %v2225_v25, %v2221_v29 }
0x1724   : > { %v4067_v39 = vpop.eup %4066 }
0x1725   : > { %v2428_v42 = vmul.f32 %v4067_v39, %v4063_v32 }
0x1727   : > { %v2429_v47 = vpack.c.bf16 %v2428_v42, %v2427_v10  ;;  %v3969_v10 = vld [vmem:[%s5177_s8 + $0x24] sm:$0x3f]  }
0x1728   : > { %v2725_v42 = vsel %vm1280_vm14, %v3969_v10, 0 }
0x1729   : > { %3775 = vmatmul.mubr.msk.bf16.vlgmr.msra.gmra.mxu0 %vm1071_vm13, %v2429_v47 }
0x172a   : > { %3785 = vmatpush3.bf16.msra.mxu0 %v2542_v48  ;;  %3786 = vmatprep.mubr.msk.bf16.mxu0 %vm4263_vm11, %v4262_v44 }
0x172b   : > { %3796 = vmatprep.subr.bf16.mxu0 %v4262_v44 }
0x1731   : > { %3787 = vmatmul.mubr.msk.bf16.vlgmr.msra.gmra.mxu0 %vm1021_vm12, %v2350_v3 }
0x1732   : > { %3798 = vmatprep.mubr.msk.bf16.mxu0 %vm4263_vm11, %v4262_v44 }
0x17e9   : > { %v2470_v50 = vpop.f32.mrf.mxu0 }
0x17eb   : > { %v3776_v51 = vpop.f32.mrf.mxu0 }
0x17ed   : > { %v2473_v43 = vpop.f32.mrf.mxu0 }
0x17ee   : > { %v2477_v46 = vpack.c.bf16 %v2473_v43, %v2470_v50 }
0x17ef   : > { %v3777_v56 = vpop.f32.mrf.mxu0 }
0x17f0   : > { %3781 = vmatmul.mubr.msk.bf16.vlgmr.msra.gmra.mxu1 %vm1021_vm12, %v2477_v46 }
0x17f1   : > { %3791 = vmatpush3.bf16.xpose.msra.mxu1 %v2594_v40  ;;  %v4959_v54 = vpop.f32.mrf.mxu0  ;;  %3792 = vmatprep.mubr.msk.bf16.mxu1 %vm4263_vm11, %v4262_v44 }
0x17f2   : > { %3802 = vmatprep.subr.bf16.mxu1 %v4262_v44 }
0x17f3   : > { %v3788_v55 = vpop.f32.mrf.mxu0 }
0x17f5   : > { %v4964_v6 = vpop.f32.mrf.mxu0 }
0x17f7   : > { %v3789_v58 = vpop.f32.mrf.mxu0 }
0x17f8   : > { %3793 = vmatmul.mubr.msk.bf16.vlgmr.msra.gmra.mxu1 %vm1021_vm12, %v2587_v49 }
0x17f9   : > { %3804 = vmatprep.mubr.msk.bf16.mxu1 %vm4263_vm11, %v4262_v44  ;;  %3803 = vmatpush3.bf16.msra.mxu1 %v2725_v42 }
0x17fa   : > { %3814 = vmatprep.subr.bf16.mxu1 %v4262_v44 }
0x18b0   : > { %v4969_v59 = vpop.f32.mrf.mxu1 }
0x18b2   : > { %v3782_v60 = vpop.f32.mrf.mxu1 }
0x18b4   : > { %v4971_v61 = vpop.f32.mrf.mxu1 }
0x18b6   : > { %v3783_v62 = vpop.f32.mrf.mxu1 }
0x18b8   : > { %v2630_v63 = vpop.f32.mrf.mxu1 }
0x18b9   : > { %v2637_v28 = vmul.f32 0.28867513, %v2630_v63 }
0x18ba   : > { %v3794_v57 = vpop.f32.mrf.mxu1 }
0x18bb   : > { %v2639_v0 = vsel %vm1071_vm13, %v2637_v28, -inf }
0x18bc   : > { %2640 = vmax.xlane.f32.xlu1 %v2639_v0  ;;  %v2633_v1 = vpop.f32.mrf.mxu1 }
0x18bd   : > { %v2638_v3 = vmul.f32 0.28867513, %v2633_v1 }
0x18be   : > { %v3795_v4 = vpop.f32.mrf.mxu1 }
0x18bf   : > { %v2642_v2 = vsel %vm1071_vm13, %v2638_v3, -inf  ;;  %v2579_v4 = vadd.f32 %v4959_v54, %v4969_v59  ;;  %v3970_v54 = vld [vmem:[%s5177_s8 + $0x28] sm:$0xfc]  }
0x18c0   : > { %2643 = vmax.xlane.f32.xlu0 %v2642_v2 }
0x18cd   : > { %2663 = vrot.lane.b32.xlu1 %v4899_v33, %s5244_s22 }
0x1945   : > { %v2641_v5 = vpop.xlane.xlu1 %2640 }
0x1946   : > { %v2645_v9 = vsub.f32 %v2637_v28, %v2641_v5 }
0x1948   : > { %v2647_v11 = vmul.f32 1.442695, %v2645_v9 }
0x1949   : > { %v2644_v14 = vpop.xlane.xlu0 %2643  ;;  %v2664_v27 = vpop.permute.xlu1 %2663 }
0x194a   : > { %4068 = vpow2.f32 %v2647_v11  ;;  %v2646_v15 = vsub.f32 %v2638_v3, %v2644_v14  ;;  %v2582_v11 = vadd.f32 %v4964_v6, %v4971_v61  ;;  %v2901_v6 = vrot.slane %v3970_v54, 2  ;;  %v3987_v54 = vld [vmem:[%s5183_s14 + $0x60] sm:$0xff]  }
0x194c   : > { %v2649_v17 = vmul.f32 1.442695, %v2646_v15  ;;  %v2906_v59 = vsel %vm1280_vm14, %v2901_v6, 0  ;;  %v3988_v6 = vld [vmem:[%s5183_s14 + $0xb8] sm:$0xff]  }
0x194e   : > { %4070 = vpow2.f32 %v2649_v17 }
0x1957   : > { %v4069_v18 = vpop.eup %4068 }
0x1958   : > { %v2651_v20 = vsel %vm1071_vm13, %v4069_v18, 0.0 }
0x1959   : > { %2652 = vadd.xlane.f32.xlu1 %v2651_v20 }
0x195b   : > { %v4071_v13 = vpop.eup %4070 }
0x195c   : > { %v2654_v23 = vsel %vm1071_vm13, %v4071_v13, 0.0 }
0x195d   : > { %2655 = vadd.xlane.f32.xlu0 %v2654_v23 }
0x196a   : > { %2772 = vrot.lane.b32.xlu1 %v4899_v33, %s5245_s27  ;;  %s5250_s27 = sld [smem:[#allocation24_spill]] }
0x196e   : > { %2770 = vrot.lane.b32.xlu1 %v4899_v33, %s5246_s20 }
0x1970   : > { %s5251_s20 = smov %s5250_s27  ;;  %s5122_s26 = scalar_lea.hbm %s5250_s27, %s3633_s12 }
0x1973   : > { %2665 = vrot.lane.b32.xlu0 %v2585_v30, %s5244_s22 }
0x19e2   : > { %v2653_v32 = vpop.xlane.xlu1 %2652 }
0x19e3   : > { %4072 = vrcp.f32 %v2653_v32 }
0x19e6   : > { %v2656_v21 = vpop.xlane.xlu0 %2655  ;;  %v2773_v8 = vpop.permute.xlu1 %2772 }
0x19e7   : > { %4074 = vrcp.f32 %v2656_v21  ;;  %v2778_v38 = vsel %vm1021_vm12, %v2773_v8, 0 }
0x19ea   : > { %v2666_v34 = vpop.permute.xlu0 %2665  ;;  %v2771_v39 = vpop.permute.xlu1 %2770 }
0x19eb   : > { %v2667_v35 = vsel %vm1459_vm15, %v2664_v27, %v2666_v34 }
0x19ec   : > { %3797 = vmatpush3.bf16.msra.mxu0 %v2667_v35 }
0x19ed   : > { %3808 = vmatprep.subr.bf16.mxu0 %v4262_v44 }
0x19f0   : > { %v4073_v26 = vpop.eup %4072 }
0x19f1   : > { %v2659_v37 = vmul.f32 %v4073_v26, %v4069_v18  ;;  %v3572_v26 = vld [vmem:[%s5178_s9 + $0x1] ss:$0 sm:$0xff] }
0x19f4   : > { %v4075_v36 = vpop.eup %4074 }
0x19f5   : > { %v2660_v33 = vmul.f32 %v4075_v36, %v4071_v13 }
0x19f7   : > { %v2661_v31 = vpack.c.bf16 %v2660_v33, %v2659_v37 }
0x19f9   : > { %3799 = vmatmul.mubr.msk.bf16.vlgmr.msra.gmra.mxu0 %vm1071_vm13, %v2661_v31 }
0x19fa   : > { %3809 = vmatpush3.bf16.xpose.msra.mxu0 %v2778_v38  ;;  %3810 = vmatprep.mubr.msk.bf16.mxu0 %vm4263_vm11, %v4262_v44 }
0x19fb   : > { %3820 = vmatprep.subr.bf16.mxu0 %v4262_v44 }
0x1a01   : > { %3811 = vmatmul.mubr.msk.bf16.vlgmr.msra.gmra.mxu0 %vm1021_vm12, %v2771_v39 }
0x1a02   : > { %3822 = vmatprep.mubr.msk.bf16.mxu0 %vm4263_vm11, %v4262_v44  ;;  %3821 = vmatpush3.bf16.msra.mxu0 %v2906_v59  ;;  %v3989_v59 = vld [vmem:[%s5183_s14 + $0xb0] sm:$0xff]  }
0x1a03   : > { %3244 = vmatprep.subr.bf16.mxu0 %v4261_v22 }
0x1ab9   : > { %v2706_v47 = vpop.f32.mrf.mxu0 }
0x1abb   : > { %v3800_v48 = vpop.f32.mrf.mxu0 }
0x1abd   : > { %v2709_v7 = vpop.f32.mrf.mxu0 }
0x1abe   : > { %v2713_v19 = vpack.c.bf16 %v2709_v7, %v2706_v47 }
0x1abf   : > { %v3801_v12 = vpop.f32.mrf.mxu0 }
0x1ac0   : > { %3805 = vmatmul.mubr.msk.bf16.vlgmr.msra.gmra.mxu1 %vm1021_vm12, %v2713_v19 }
0x1ac1   : > { %v2814_v50 = vpop.f32.mrf.mxu0  ;;  %3816 = vmatprep.mubr.msk.bf16.mxu1 %vm4263_vm11, %v4262_v44 }
0x1ac2   : > { %v2821_v51 = vmul.f32 0.28867513, %v2814_v50 }
0x1ac3   : > { %v3812_v53 = vpop.f32.mrf.mxu0 }
0x1ac4   : > { %v2823_v43 = vsel %vm1071_vm13, %v2821_v51, -inf }
0x1ac5   : > { %2824 = vmax.xlane.f32.xlu1 %v2823_v43  ;;  %v2817_v46 = vpop.f32.mrf.mxu0 }
0x1ac6   : > { %v2822_v56 = vmul.f32 0.28867513, %v2817_v46  ;;  %v3973_v46 = vld [vmem:[#allocation7 + $0x54] ss:$8 sps:$4 sm:$0xff]  }
0x1ac7   : > { %v3813_v40 = vpop.f32.mrf.mxu0 }
0x1ac8   : > { %v2826_v55 = vsel %vm1071_vm13, %v2822_v56, -inf  ;;  %v3976_v40 = vld [vmem:[#allocation7 + $0x44] ss:$8 sps:$4 sm:$0xff]  }
0x1ac9   : > { %2827 = vmax.xlane.f32.xlu0 %v2826_v55  ;;  %v3974_v55 = vld [vmem:[#allocation7 + $0x40] ss:$8 sps:$4 sm:$0xff]  }
0x1ad6   : > { %2846 = vrot.lane.b32.xlu1 %v2585_v30, %s5247_s21  ;;  %s4275_s21 = smov [#allocation8]  }
0x1ad7   : > { %s4184_s23 = sshll.u32 %s4275_s21, 4  ;;  %s4185_s23 = int_to_ptr.vmem [resolvable:$false] %s4184_s23 }
0x1ad8   : > { %s4186_s25 = scalar_lea.vmem %s4185_s23, 512  ;;  %p4187_p0 = scmp.lt.s32.totalorder %s5124_s24, %s4185_s23 }
0x1ad9   : > { %p4188_p10 = scmp.lt.s32.totalorder %s4186_s25, %s4180_s30 }
0x1adb   : > { %p4189_p3 = por %p4188_p10, %p4187_p0 }
0x1add   : > { %p4190_p11 = pnand %p4189_p3, %p4183_p13 }
0x1b4e   : > { %v2825_v49 = vpop.xlane.xlu1 %2824 }
0x1b4f   : > { %v2829_v58 = vsub.f32 %v2821_v51, %v2825_v49  ;;  %v3979_v49 = vld [vmem:[#allocation7 + $0x34] ss:$8 sps:$4 sm:$0xff]  }
0x1b51   : > { %v2831_v60 = vmul.f32 1.442695, %v2829_v58  ;;  %v3977_v58 = vld [vmem:[#allocation7 + $0x30] ss:$8 sps:$4 sm:$0xff]  }
0x1b52   : > { %v2847_v62 = vpop.permute.xlu1 %2846  ;;  %v2828_v63 = vpop.xlane.xlu0 %2827 }
0x1b53   : > { %4076 = vpow2.f32 %v2831_v60  ;;  %v2830_v44 = vsub.f32 %v2822_v56, %v2828_v63  ;;  %3815 = vmatpush3.bf16.msra.mxu1 %v2847_v62  ;;  %v3971_v56 = vld [vmem:[#allocation7 + $0x50] ss:$8 sps:$4 sm:$0xff]  }
0x1b54   : > { %3073 = vmatprep.subr.bf16.mxu1 %v3973_v46  ;;  %v3980_v60 = vld [vmem:[%s5183_s14 + $0x98] sm:$0xff]   ;;  %v3981_v62 = vld [vmem:[%s5183_s14 + $0x90] sm:$0xff]  }
0x1b55   : > { %v2833_v28 = vmul.f32 1.442695, %v2830_v44 }
0x1b57   : > { %4078 = vpow2.f32 %v2833_v28 }
0x1b60   : > { %v4077_v57 = vpop.eup %4076 }
0x1b61   : > { %v2835_v0 = vsel %vm1071_vm13, %v4077_v57, 0.0 }
0x1b62   : > { %2836 = vadd.xlane.f32.xlu0 %v2835_v0 }
0x1b64   : > { %v4079_v1 = vpop.eup %4078 }
0x1b65   : > { %v2838_v3 = vsel %vm1071_vm13, %v4079_v1, 0.0 }
0x1b66   : > { %2839 = vadd.xlane.f32.xlu0 %v2838_v3 }
0x1b80   : > { %v2761_v2 = vpop.f32.mrf.mxu1 }
0x1b81   : > { %v2768_v5 = vadd.f32 %v2761_v2, %v2579_v4  ;;  %v3575_v2 = vld [vmem:[%s5179_s10 + $0x1] ss:$0 sm:$0xff] }
0x1b82   : > { %v3806_v9 = vpop.f32.mrf.mxu1 }
0x1b84   : > { %v2764_v14 = vpop.f32.mrf.mxu1 }
0x1b85   : > { %v2769_v15 = vadd.f32 %v2764_v14, %v2582_v11  ;;  %v3576_v14 = vld [vmem:[%s5180_s11 + $0x1] ss:$0 sm:$0xff] }
0x1b86   : > { %v3807_v17 = vpop.f32.mrf.mxu1 }
0x1beb   : > { %v2837_v18 = vpop.xlane.xlu0 %2836 }
0x1bec   : > { %4080 = vrcp.f32 %v2837_v18 }
0x1bef   : > { %v2840_v20 = vpop.xlane.xlu0 %2839 }
0x1bf0   : > { %4082 = vrcp.f32 %v2840_v20 }
0x1bf9   : > { %v4081_v13 = vpop.eup %4080 }
0x1bfa   : > { %v2843_v24 = vmul.f32 %v4081_v13, %v4077_v57  ;;  %v3982_v13 = vld [vmem:[%s5183_s14 + $0x88] sm:$0xff]  }
0x1bfd   : > { %v4083_v23 = vpop.eup %4082 }
0x1bfe   : > { %v2844_v25 = vmul.f32 %v4083_v23, %v4079_v1  ;;  %v3983_v23 = vld [vmem:[%s5183_s14 + $0x80] sm:$0xff]  }
0x1c00   : > { %v2845_v29 = vpack.c.bf16 %v2844_v25, %v2843_v24  ;;  %v3984_v24 = vld [vmem:[%s5183_s14 + $0x78] sm:$0xff]   ;;  %v3985_v25 = vld [vmem:[%s5183_s14 + $0x70] sm:$0xff]  }
0x1c02   : > { %3817 = vmatmul.mubr.msk.bf16.vlgmr.msra.gmra.mxu1 %vm1071_vm13, %v2845_v29  ;;  %v3986_v29 = vld [vmem:[%s5183_s14 + $0x68] sm:$0xff]  }
0x1c03   : > { %3095 = vmatprep.mubr.bf16.mxu1 %v4261_v22  ;;  %3074 = vmatpush1.bf16.msra.mxu1 %v3971_v56 }
0x1c04   : > { %3075 = vmatprep.subr.bf16.mxu1 %v3976_v40 }
0x1c07   : > { %3076 = vmatpush1.bf16.msra.mxu1 %v3974_v55 }
0x1c08   : > { %3077 = vmatprep.subr.bf16.mxu1 %v3979_v49 }
0x1c0b   : > { %3078 = vmatpush1.bf16.msra.mxu1 %v3977_v58 }
0x1cc2   : > { %v2886_v61 = vpop.f32.mrf.mxu1 }
0x1cc4   : > { %v3818_v30 = vpop.f32.mrf.mxu1 }
0x1cc5   : > { %v3991_v30 = vld [vmem:[%s5183_s14 + $0xa0] sm:$0xff]  }
0x1cc6   : > { %v2889_v27 = vpop.f32.mrf.mxu1 }
0x1cc7   : > { %v2893_v32 = vpack.c.bf16 %v2889_v27, %v2886_v61  ;;  %v3990_v61 = vld [vmem:[%s5183_s14 + $0xa8] sm:$0xff]   ;;  %v3577_v27 = vld [vmem:[%s5182_s13 + $0x2] sm:$0x3] }
0x1cc8   : > { %v3819_v21 = vpop.f32.mrf.mxu1 }
0x1cc9   : > { %3823 = vmatmul.mubr.msk.bf16.vlgmr.msra.gmra.mxu0 %vm1021_vm12, %v2893_v32  ;;  %v3023_v32 = vrot.slane %v3577_v27, %v4640_v45  ;;  %v3027_v21 = vrot.slane %v3577_v27, %v4740_v41 }
0x1cca   : > { %3245 = vmatpush1.bf16.msra.mxu0 %v3980_v60 }
0x1ccb   : > { %3246 = vmatprep.subr.bf16.mxu0 %v4261_v22 }
0x1cce   : > { %3247 = vmatpush1.bf16.msra.mxu0 %v3981_v62 }
0x1ccf   : > { %3248 = vmatprep.subr.bf16.mxu0 %v4261_v22 }
0x1cd2   : > { %3249 = vmatpush1.bf16.msra.mxu0 %v3982_v13 }
0x1cd3   : > { %3250 = vmatprep.subr.bf16.mxu0 %v4261_v22 }
0x1cd6   : > { %3251 = vmatpush1.bf16.msra.mxu0 %v3983_v23 }
0x1cd7   : > { %3252 = vmatprep.subr.bf16.mxu0 %v4261_v22 }
0x1cda   : > { %3253 = vmatpush1.bf16.msra.mxu0 %v3984_v24 }
0x1cdb   : > { %3254 = vmatprep.subr.bf16.mxu0 %v4261_v22 }
0x1cde   : > { %3255 = vmatpush1.bf16.msra.mxu0 %v3985_v25 }
0x1cdf   : > { %3256 = vmatprep.subr.bf16.mxu0 %v4261_v22 }
0x1ce2   : > { %3257 = vmatpush1.bf16.msra.mxu0 %v3986_v29 }
0x1ce3   : > { %3258 = vmatprep.subr.bf16.mxu0 %v4261_v22 }
0x1ce6   : > { %3259 = vmatpush1.bf16.msra.mxu0 %v3987_v54 }
0x1ce7   : > { %3268 = vmatprep.subr.bf16.mxu0 %v4261_v22 }
0x1cea   : > { %3269 = vmatpush2.bf16.msra.mxu0 %v3988_v6 }
0x1ceb   : > { %3270 = vmatprep.subr.bf16.mxu0 %v4261_v22 }
0x1cee   : > { %3271 = vmatpush2.bf16.msra.mxu0 %v3989_v59 }
0x1cef   : > { %3272 = vmatprep.subr.bf16.mxu0 %v4261_v22 }
0x1cf2   : > { %3273 = vmatpush2.bf16.msra.mxu0 %v3990_v61 }
0x1cf3   : > { %3274 = vmatprep.subr.bf16.mxu0 %v4261_v22 }
0x1cf6   : > { %3275 = vmatpush2.bf16.msra.mxu0 %v3991_v30 }
0x1d89   : > { %v2942_v34 = vpop.f32.mrf.mxu0 }
0x1d8a   : > { %v2949_v35 = vadd.f32 %v2942_v34, %v2768_v5 }
0x1d8b   : > { %v3824_v36 = vpop.f32.mrf.mxu0 }
0x1d8c   : > { %v2951_v37 = vadd.f32 %v2949_v35, %v4867_v16 }
0x1d8d   : > { %v2945_v33 = vpop.f32.mrf.mxu0 }
0x1d8e   : > { %v5027_v8 = vadd.f32 %v3572_v26, %v2951_v37  ;;  %v2950_v31 = vadd.f32 %v2945_v33, %v2769_v15 }
0x1d8f   : > { %v3825_v38 = vpop.f32.mrf.mxu0 }
0x1d90   : > { %v2952_v39 = vadd.f32 %v2950_v31, %v4872_v52  ;;  %v2967_v10 = vsel %vm878_vm6, %v5027_v8, 0.0 }
0x1d91   : > { %2968 = vadd.xlane.f32.xlu0 %v2967_v10 }
0x1d92   : > { %v5032_v42 = vadd.f32 %v3572_v26, %v2952_v39 }
0x1d94   : > { %v2970_v47 = vsel %vm878_vm6, %v5032_v42, 0.0 }
0x1d95   : > { %2971 = vadd.xlane.f32.xlu0 %v2970_v47 }
0x1e1a   : > { %v2969_v48 = vpop.xlane.xlu0 %2968 }
0x1e1b   : > { %v2973_v7 = vmul.f32 0.020833334, %v2969_v48 }
0x1e1d   : > { %v2975_v16 = vsub.f32 %v5027_v8, %v2973_v7 }
0x1e1e   : > { %v2972_v19 = vpop.xlane.xlu0 %2971 }
0x1e1f   : > { %v2974_v12 = vmul.f32 0.020833334, %v2972_v19  ;;  %v2977_v50 = vmul.f32 %v2975_v16, %v2975_v16 }
0x1e21   : > { %v2976_v51 = vsub.f32 %v5032_v42, %v2974_v12  ;;  %v2979_v52 = vsel %vm878_vm6, %v2977_v50, 0.0 }
0x1e22   : > { %2980 = vadd.xlane.f32.xlu0 %v2979_v52 }
0x1e23   : > { %v2978_v53 = vmul.f32 %v2976_v51, %v2976_v51 }
0x1e25   : > { %v2982_v43 = vsel %vm878_vm6, %v2978_v53, 0.0 }
0x1e26   : > { %2983 = vadd.xlane.f32.xlu0 %v2982_v43 }
0x1eab   : > { %v2981_v63 = vpop.xlane.xlu0 %2980 }
0x1eac   : > { %v2985_v44 = vmul.f32 0.020833334, %v2981_v63 }
0x1eae   : > { %v2987_v28 = vadd.f32 1e-05, %v2985_v44 }
0x1eaf   : > { %v2984_v57 = vpop.xlane.xlu0 %2983 }
0x1eb0   : > { %4084 = vrsqrt.f32 %v2987_v28  ;;  %v2986_v0 = vmul.f32 0.020833334, %v2984_v57 }
0x1eb2   : > { %v2988_v1 = vadd.f32 1e-05, %v2986_v0 }
0x1eb4   : > { %4086 = vrsqrt.f32 %v2988_v1 }
0x1ebd   : > { %v4085_v3 = vpop.eup %4084 }
0x1ebe   : > { %v2991_v4 = vmul.f32 %v4085_v3, %v2975_v16 }
0x1ec0   : > { %v2999_v11 = vmul.f32 %v3575_v2, %v2991_v4 }
0x1ec1   : > { %v4087_v5 = vpop.eup %4086 }
0x1ec2   : > { %v2992_v9 = vmul.f32 %v4087_v5, %v2976_v51  ;;  %v3007_v17 = vadd.f32 %v3576_v14, %v2999_v11 }
0x1ec4   : > { %v3000_v15 = vmul.f32 %v3575_v2, %v2992_v9 }
0x1ec6   : > { %v3008_v18 = vadd.f32 %v3576_v14, %v3000_v15 }
0x1ec8   : > { %v3016_v20 = vpack.c.bf16 %v3008_v18, %v3007_v17  ;;  %v3623_v18 = vld [vmem:[%s5184_s15 + $0x1] ss:$0 sm:$0xff] }
0x1eca   : > { %3584 = vmatmul.mubr.msk.bf16.vlgmr.msra.gmra.mxu1 %vm878_vm6, %v3016_v20 }
0x1f8a   : > { %v3097_v34 = vpop.f32.mrf.mxu1 }
0x1f8b   : > { %v3098_v35 = vadd.f32 %v3097_v34, %v3023_v32 }
0x1f8c   : > { %v3099_v26 = vpop.f32.mrf.mxu1 }
0x1f8d   : > { %v3110_v36 = vmul.f32 0.044715, %v3098_v35  ;;  %v3100_v37 = vadd.f32 %v3099_v26, %v3027_v21  ;;  %v3106_v4 = vmul.f32 0.5, %v3098_v35 }
0x1f8e   : > { %v3101_v33 = vpop.f32.mrf.mxu1 }
0x1f8f   : > { %v3114_v31 = vmul.f32 %v3110_v36, %v3098_v35  ;;  %v3111_v38 = vmul.f32 0.044715, %v3100_v37  ;;  %v3102_v39 = vadd.f32 %v3101_v33, %v3023_v32  ;;  %v3107_v0 = vmul.f32 0.5, %v3100_v37 }
0x1f90   : > { %v3103_v10 = vpop.f32.mrf.mxu1 }
0x1f91   : > { %v3118_v22 = vmul.f32 %v3114_v31, %v3098_v35  ;;  %v3115_v47 = vmul.f32 %v3111_v38, %v3100_v37  ;;  %v3112_v48 = vmul.f32 0.044715, %v3102_v39  ;;  %v3104_v7 = vadd.f32 %v3103_v10, %v3027_v21 }
0x1f92   : > { %v3108_v28 = vmul.f32 0.5, %v3102_v39 }
0x1f93   : > { %v3122_v16 = vadd.f32 %v3118_v22, %v3098_v35  ;;  %v3119_v19 = vmul.f32 %v3115_v47, %v3100_v37  ;;  %v3116_v12 = vmul.f32 %v3112_v48, %v3102_v39  ;;  %v3113_v45 = vmul.f32 0.044715, %v3104_v7  ;;  %v3624_v22 = vld [vmem:[%s5185_s16] ss:$0 sm:$0xff] }
0x1f94   : > { %v3109_v1 = vmul.f32 0.5, %v3104_v7  ;;  %v3625_v48 = vld [vmem:[%s5186_s17] ss:$0 sm:$0xff] }
0x1f95   : > { %v3123_v50 = vadd.f32 %v3119_v19, %v3100_v37  ;;  %v3120_v41 = vmul.f32 %v3116_v12, %v3102_v39  ;;  %v3117_v51 = vmul.f32 %v3113_v45, %v3104_v7  ;;  %v3126_v52 = vmul.f32 0.7978846, %v3122_v16 }
0x1f97   : > { %v3127_v53 = vmul.f32 0.7978846, %v3123_v50  ;;  %v3124_v43 = vadd.f32 %v3120_v41, %v3102_v39  ;;  %v3121_v46 = vmul.f32 %v3117_v51, %v3104_v7 }
0x1f99   : > { %4088 = vtanh.f32 %v3127_v53  ;;  %v3128_v56 = vmul.f32 0.7978846, %v3124_v43  ;;  %v3125_v40 = vadd.f32 %v3121_v46, %v3104_v7 }
0x1f9a   : > { %4090 = vtanh.f32 %v3126_v52 }
0x1f9b   : > { %4092 = vtanh.f32 %v3128_v56  ;;  %v3129_v55 = vmul.f32 0.7978846, %v3125_v40 }
0x1f9d   : > { %4094 = vtanh.f32 %v3129_v55 }
0x1fa6   : > { %v4089_v49 = vpop.eup %4088 }
0x1fa7   : > { %v4091_v58 = vpop.eup %4090  ;;  %v3135_v62 = vadd.f32 1.0, %v4089_v49 }
0x1fa8   : > { %v4093_v60 = vpop.eup %4092  ;;  %v3134_v57 = vadd.f32 1.0, %v4091_v58 }
0x1fa9   : > { %v3136_v63 = vadd.f32 1.0, %v4093_v60  ;;  %v3139_v5 = vmul.f32 %v3135_v62, %v3107_v0 }
0x1faa   : > { %v4095_v44 = vpop.eup %4094  ;;  %v3138_v11 = vmul.f32 %v3134_v57, %v3106_v4 }
0x1fab   : > { %v3137_v3 = vadd.f32 1.0, %v4095_v44  ;;  %v3140_v2 = vmul.f32 %v3136_v63, %v3108_v28 }
0x1fad   : > { %v3141_v9 = vmul.f32 %v3137_v3, %v3109_v1  ;;  %v3167_v15 = vpack.c.bf16 %v3140_v2, %v3138_v11 }
0x1faf   : > { %v3168_v14 = vpack.c.bf16 %v3141_v9, %v3139_v5 }
0x1fb1   : > { %3621 = vmatprep.mubr.msk.bf16.mxu0 %vm2028_vm0, %v3168_v14 }
0x1fb2   : > { %3277 = vmatmul.mubr.bf16.vlgmr.msra.gmra.mxu0 %v3167_v15 }
0x2072   : > { %v3278_v17 = vpop.f32.mrf.mxu0 }
0x2073   : > { %v3285_v20 = vadd.f32 %v3278_v17, %v5027_v8 }
0x2074   : > { %v3280_v13 = vpop.f32.mrf.mxu0 }
0x2075   : > { %v3295_v23 = vadd.f32 %v3623_v18, %v3285_v20 }
0x2076   : > { %v3281_v24 = vpop.f32.mrf.mxu0 }
0x2077   : > { %v3286_v25 = vadd.f32 %v3281_v24, %v5032_v42  ;;  %v3299_v29 = vsel %vm878_vm6, %v3295_v23, 0.0 }
0x2078   : > { %3300 = vadd.xlane.f32.xlu1 %v3299_v29  ;;  %v3283_v54 = vpop.f32.mrf.mxu0 }
0x2079   : > { %v3296_v6 = vadd.f32 %v3623_v18, %v3286_v25 }
0x207b   : > { %v3302_v59 = vsel %vm878_vm6, %v3296_v6, 0.0 }
0x207c   : > { %3303 = vadd.xlane.f32.xlu0 %v3302_v59 }
0x2101   : > { %v3301_v61 = vpop.xlane.xlu1 %3300 }
0x2102   : > { %v3305_v30 = vmul.f32 0.020833334, %v3301_v61 }
0x2104   : > { %v3307_v27 = vsub.f32 %v3295_v23, %v3305_v30 }
0x2105   : > { %v3304_v32 = vpop.xlane.xlu0 %3303 }
0x2106   : > { %v3306_v21 = vmul.f32 0.020833334, %v3304_v32  ;;  %v3309_v34 = vmul.f32 %v3307_v27, %v3307_v27 }
0x2108   : > { %v3308_v8 = vsub.f32 %v3296_v6, %v3306_v21  ;;  %v3311_v35 = vsel %vm878_vm6, %v3309_v34, 0.0 }
0x2109   : > { %3312 = vadd.xlane.f32.xlu0 %v3311_v35 }
0x210a   : > { %v3310_v26 = vmul.f32 %v3308_v8, %v3308_v8 }
0x210c   : > { %v3314_v42 = vsel %vm878_vm6, %v3310_v26, 0.0 }
0x210d   : > { %3315 = vadd.xlane.f32.xlu0 %v3314_v42 }
0x2192   : > { %v3313_v36 = vpop.xlane.xlu0 %3312 }
0x2193   : > { %v3317_v37 = vmul.f32 0.020833334, %v3313_v36 }
0x2195   : > { %v3319_v33 = vadd.f32 1e-05, %v3317_v37 }
0x2196   : > { %v3316_v31 = vpop.xlane.xlu0 %3315 }
0x2197   : > { %4096 = vrsqrt.f32 %v3319_v33  ;;  %v3318_v38 = vmul.f32 0.020833334, %v3316_v31 }
0x2199   : > { %v3320_v39 = vadd.f32 1e-05, %v3318_v38 }
0x219b   : > { %4098 = vrsqrt.f32 %v3320_v39 }
0x21a4   : > { %v4097_v10 = vpop.eup %4096 }
0x21a5   : > { %v3323_v47 = vmul.f32 %v4097_v10, %v3307_v27 }
0x21a7   : > { %v3331_v7 = vmul.f32 %v3624_v22, %v3323_v47 }
0x21a8   : > { %v4099_v16 = vpop.eup %4098 }
0x21a9   : > { %v3339_v19 = vadd.f32 %v3625_v48, %v3331_v7  ;;  %v3324_v12 = vmul.f32 %v4099_v16, %v3308_v8 }
0x21ab   : > { %v3332_v45 = vmul.f32 %v3624_v22, %v3324_v12  ;;  %3341 = vst.msk [vmem:[%s637_s2] sm:$0xff] %vm878_vm6, %v3339_v19 }
0x21ad   : > { %v3340_v50 = vadd.f32 %v3625_v48, %v3332_v45 }
0x21af   : > { %3342 = vst.msk [vmem:[%s637_s2 + $0x8] sm:$0xff] %vm878_vm6, %v3340_v50 }
0x21b0   : > { %4193 = shalt.err (!%p4190_p11)
}
0x21b1   : > { %s4194_s12 = scalar_lea.hbm %s5122_s26, 256  ;;  %s4198_s1 = scalar_lea.hbm %s5251_s20, 512 }
0x21b2   : > { %p4195_p9 = scmp.ne.s32.totalorder %s5122_s26, %s4194_s12  ;;  %p4199_p6 = scmp.lt.s32.totalorder %s5122_s26, %s5251_s20 }
0x21b3   : > { %p4200_p8 = scmp.lt.s32.totalorder %s4198_s1, %s4194_s12 }
0x21b4   : > { %p4196_p1 = pnand %p4195_p9, %p5252_p7 }
0x21b5   : > { %p4201_p5 = por %p4200_p8, %p4199_p6 }
0x21b6   : > { %p4197_p4 = pneg %p4196_p1 }
0x21b8   : > { %p4202_p2 = pnand %p4201_p5, %p4197_p4 }
0x21ba   : > { %4205 = shalt.err (!%p4202_p2)
}
0x21bb   : > { %s4276_s30 = smov 128  }
0x21bc   : > { %3844 = dma.vmem_to_hbm [thread:$0]  (%p5252_p7), %s5124_s24, 256, %s5122_s26, %s3344_s0, %s4276_s30, %s4276_s30, %s5244_s22  }
0x21bd PF: > { %s5253_s23 = sld [smem:[#allocation12_spill]] }
0x21be   : > { %s5254_s25 = sld [smem:[#allocation15_spill]] }
0x21bf   : > { %s5255_s2 = sld [smem:[#allocation14_spill]] }
0x21c3   : > { %s3372_s19 = sand.u32 1, %s5253_s23  }
0x21c4   : > { %p5256_p12 = scmp.ne.s32.totalorder %s5254_s25, 0  ;;  %s3373_s12 = scalar_lea.sflag [#allocation4], %s3372_s19 }
0x21c5   : > { %p5257_p13 = scmp.ge.s32.totalorder %s5255_s2, 2 }
0x21c7   : > { %p3858_p0 = pnand %p5257_p13, %p5256_p12 }
0x21c9   : > { %p3859_p10 = pneg %p3858_p0 }
0x21cb   : > { %4231 = dma.done.wait (%p3859_p10), %s3373_s12, 256  }
0x21cc   : > { %4233 = vsyncadd (%p3859_p10), %s3373_s12, 4294967040  ;;  %s5258_s30 = sld [smem:[#allocation16_spill]]  ;;  %s5261_s27 = smov %s4240_s28 }
0x21cd   : > { %s5259_s18 = sld [smem:[#allocation13_spill]] }
0x21ce   : > { %s5260_s29 = sld [smem:[#allocation18_spill]] }
0x21d2   : > { %p32_p3 = scmp.ge.s32.totalorder %s5258_s30, 4  }
0x21d3   : > { %s5262_s28 = smov %s5259_s18 }
0x21d4   :  { %34 = sbr.rel (!%p32_p3) target bundleno = 13 (0xd), region = 160 }
0x21d9   :  { %3378 = vsyncpa [#allocation3], 1 }
0x21da   :  { %3380 = vsyncpa [#allocation3 + $0x1], 1 }
0x21db   :  { %3381 = vsyncpa [#allocation6], 1 }
0x21dc   :  { %3382 = vsyncpa [#allocation4], 1 }
0x21dd   :  { %3384 = vsyncpa [#allocation4 + $0x1], 1 }

</bundles_post_ra>
